<compile_context>
chip_gen: v7x
topology: tpu7x:2x2x1
jax: 0.10.0
libtpu: 0.0.40
codegen_flags: <defaults>
</compile_context>

<pallas_src>
import jax
import jax.numpy as jnp
from jax.experimental import pallas as pl
from jax.experimental.pallas import tpu as pltpu

N_GRAPHS = 16         # graphs per forward call (batched)
B_TILE = 8            # graphs per grid step
N_NODES = 32
IN_DIM = 8
HIDDEN = 32
N_CLASSES = 8
C_PAD = 128           # lane-dense padded class dimension
N_LAYERS = 4          # net_params['L'] = 4 (ginlayers[0..3] in the module)
BN_EPS = 1e-5
GIN_EPS = 0.0         # learn_eps_GIN=False -> fixed eps = 0


# ----------------------------- Fused Pallas kernel -----------------------------

def _fused_forward_kernel(adj_ref, feat_ref, sn_ref,
                          wstack_ref, vecs_ref, pred_w_ref, pred_b_ref,
                          o_ref):
    # adj_ref:    (B_TILE, N, N)   adjacency with (1+eps)*I folded in
    # feat_ref:   (B_TILE*N, H)    features zero-padded from IN_DIM to H cols
    # sn_ref:     (B_TILE*N, 1)    graph-norm factors
    # wstack_ref: (2L+1, H, H)     [emb_w_pad, w0_0, w1_0, ..., w0_{L-1}, w1_{L-1}]
    #                              (BN scales folded into the linears)
    # vecs_ref:   (1+4L, H)        [emb_b, then per layer t1', t2', s3, t3]
    # pred_w_ref: (L+1, H, C_PAD)  readout weights, classes zero-padded
    # pred_b_ref: (1, C_PAD)       readout bias pre-summed over heads
    sn = sn_ref[...]

    # embedding_h (emb_w zero-padded to (H,H); padded feat cols are zero)
    h = jnp.dot(feat_ref[...], wstack_ref[0],
                preferred_element_type=jnp.float32) + vecs_ref[0:1]

    # deferred readout: per-node class contributions, pooled once at the end
    r = jnp.dot(h, pred_w_ref[0], preferred_element_type=jnp.float32)

    for l in range(N_LAYERS):
        v = 1 + 4 * l
        t1 = vecs_ref[v + 0:v + 1]     # folded b0*s1 + t1
        t2 = vecs_ref[v + 1:v + 2]     # folded b1*s2 + t2
        s3 = vecs_ref[v + 2:v + 3]     # bn_node_h scale
        t3 = vecs_ref[v + 3:v + 4]     # bn_node_h shift

        # neighbour aggregation; (1+eps)*h self-term folded into adj_aug
        h3 = h.reshape(B_TILE, N_NODES, HIDDEN)
        x = jnp.einsum('bnm,bmh->bnh', adj_ref[...], h3,
                       preferred_element_type=jnp.float32)
        x = x.reshape(B_TILE * N_NODES, HIDDEN)

        # MLP linear[0] + folded BN + relu
        x = jnp.maximum(
            jnp.dot(x, wstack_ref[1 + 2 * l],
                    preferred_element_type=jnp.float32) + t1, 0.0)
        # MLP linear[1] + ApplyNodeFunc folded BN + relu
        x = jnp.maximum(
            jnp.dot(x, wstack_ref[2 + 2 * l],
                    preferred_element_type=jnp.float32) + t2, 0.0)
        # graph_norm
        x = x * sn
        # GINLayer bn_node_h + relu
        x = jnp.maximum(x * s3 + t3, 0.0)
        # residual (dropout is identity at eval)
        h = h + x

        # readout contribution of hidden_rep[l + 1]
        r = r + jnp.dot(h, pred_w_ref[l + 1], preferred_element_type=jnp.float32)

    # sum-pool over nodes within each graph + pre-summed readout bias
    score = jnp.sum(r.reshape(B_TILE, N_NODES, C_PAD), axis=1) + pred_b_ref[...]
    o_ref[...] = score


def gin_net_forward(adj_aug, feat_pad, sn2d, folded):
    n_graphs = adj_aug.shape[0]
    assert n_graphs % B_TILE == 0
    grid = (n_graphs // B_TILE,)
    bn_rows = B_TILE * N_NODES

    args = (adj_aug, feat_pad, sn2d,
            folded["wstack"], folded["vecs"], folded["pred_w"], folded["pred_b"])

    flops = n_graphs * (
        2 * N_NODES * HIDDEN * HIDDEN                       # embedding (padded)
        + (N_LAYERS + 1) * 2 * N_NODES * HIDDEN * C_PAD     # readout heads
        + N_LAYERS * (2 * N_NODES * N_NODES * HIDDEN        # aggregation
                      + 2 * 2 * N_NODES * HIDDEN * HIDDEN)) # MLP linears
    bytes_accessed = (sum(int(a.size) * a.dtype.itemsize for a in args)
                      + n_graphs * C_PAD * 4)

    scores = pl.pallas_call(
        _fused_forward_kernel,
        out_shape=jax.ShapeDtypeStruct((n_graphs, C_PAD), jnp.float32),
        grid=grid,
        in_specs=[
            pl.BlockSpec((B_TILE, N_NODES, N_NODES), lambda b: (b, 0, 0)),
            pl.BlockSpec((bn_rows, HIDDEN), lambda b: (b, 0)),
            pl.BlockSpec((bn_rows, 1), lambda b: (b, 0)),
            pl.BlockSpec((2 * N_LAYERS + 1, HIDDEN, HIDDEN), lambda b: (0, 0, 0)),
            pl.BlockSpec((1 + 4 * N_LAYERS, HIDDEN), lambda b: (0, 0)),
            pl.BlockSpec((N_LAYERS + 1, HIDDEN, C_PAD), lambda b: (0, 0, 0)),
            pl.BlockSpec((1, C_PAD), lambda b: (0, 0)),
        ],
        out_specs=pl.BlockSpec((B_TILE, C_PAD), lambda b: (b, 0)),
        compiler_params=pltpu.CompilerParams(
            dimension_semantics=("parallel",)),
        cost_estimate=pl.CostEstimate(
            flops=flops, transcendentals=0, bytes_accessed=bytes_accessed),
    )(*args)
    return scores[:, :N_CLASSES]


# ----------------------------- Parameter / input prep -----------------------------

def fold_params(params):
    """Fold eval-mode BN affines into linears, pack slabs, pad lanes."""
    w0_list, w1_list = [], []
    vec_rows = [params["emb_b"]]                        # (1, H)
    for (w0, b0, s1, t1, w1, b1, s2, t2, s3, t3) in params["gin_layers"]:
        w0_list.append(w0 * s1)                         # column-scale linear[0]
        w1_list.append(w1 * s2)                         # column-scale linear[1]
        vec_rows += [b0 * s1 + t1, b1 * s2 + t2, s3, t3]

    emb_w_pad = jnp.zeros((HIDDEN, HIDDEN), jnp.float32).at[:IN_DIM].set(
        params["emb_w"])
    wstack = [emb_w_pad]
    for l in range(N_LAYERS):
        wstack += [w0_list[l], w1_list[l]]
    wstack = jnp.stack(wstack)                          # (2L+1, H, H)
    vecs = jnp.concatenate(vec_rows, axis=0)            # (1+4L, H)

    pred_w_pad = jnp.zeros((N_LAYERS + 1, HIDDEN, C_PAD), jnp.float32)
    pred_w_pad = pred_w_pad.at[:, :, :N_CLASSES].set(params["pred_w"])
    pred_b_pad = jnp.zeros((1, C_PAD), jnp.float32)
    pred_b_pad = pred_b_pad.at[:, :N_CLASSES].set(
        jnp.sum(params["pred_b"], axis=0))              # pre-summed over heads

    return {"wstack": wstack, "vecs": vecs,
            "pred_w": pred_w_pad, "pred_b": pred_b_pad}


def prepare_graph_inputs(adj, feat, snorm_n):
    """adj (B,N,N), feat (B,N,IN_DIM), snorm_n (B,N,1) -> kernel operands."""
    b = adj.shape[0]
    eye = jnp.eye(N_NODES, dtype=jnp.float32)
    adj_aug = adj + (1.0 + GIN_EPS) * eye[None]         # fold GIN self-term
    feat_pad = jnp.zeros((b * N_NODES, HIDDEN), jnp.float32)
    feat_pad = feat_pad.at[:, :IN_DIM].set(feat.reshape(b * N_NODES, IN_DIM))
    sn2d = snorm_n.reshape(b * N_NODES, 1).astype(jnp.float32)
    return adj_aug, feat_pad, sn2d


# ----------------------------- Pure-JAX reference -----------------------------

def ref_forward(adj, feat, snorm_n, params):
    scores = []
    for g in range(adj.shape[0]):
        h = feat[g] @ params["emb_w"] + params["emb_b"]
        hidden_rep = [h]
        for (w0, b0, s1, t1, w1, b1, s2, t2, s3, t3) in params["gin_layers"]:
            x = (1.0 + GIN_EPS) * h + adj[g] @ h
            x = jnp.maximum((x @ w0 + b0) * s1 + t1, 0.0)
            x = x @ w1 + b1
            x = jnp.maximum(x * s2 + t2, 0.0)
            x = x * snorm_n[g]
            x = jnp.maximum(x * s3 + t3, 0.0)
            h = h + x
            hidden_rep.append(h)
        score = jnp.zeros((1, N_CLASSES), jnp.float32)
        for i, hh in enumerate(hidden_rep):
            pooled = jnp.sum(hh, axis=0, keepdims=True)
            score = score + pooled @ params["pred_w"][i] + params["pred_b"][i]
        scores.append(score[0])
    return jnp.stack(scores)


def init_params(key):
    def lin(k, fan_in, fan_out):
        kw, kb = jax.random.split(k)
        bound = 1.0 / jnp.sqrt(float(fan_in))
        w = jax.random.uniform(kw, (fan_in, fan_out), minval=-bound,
                               maxval=bound, dtype=jnp.float32)
        b = jax.random.uniform(kb, (1, fan_out), minval=-bound,
                               maxval=bound, dtype=jnp.float32)
        return w, b

    def bn_affine(dim):
        # PyTorch default BN init, eval mode: gamma=1, beta=0, rm=0, rv=1
        gamma = jnp.ones((dim,), jnp.float32)
        beta = jnp.zeros((dim,), jnp.float32)
        rm = jnp.zeros((dim,), jnp.float32)
        rv = jnp.ones((dim,), jnp.float32)
        scale = gamma / jnp.sqrt(rv + BN_EPS)
        shift = beta - rm * scale
        return scale.reshape(1, -1), shift.reshape(1, -1)

    n_keys = 1 + 2 * N_LAYERS + (N_LAYERS + 1)
    keys = jax.random.split(key, n_keys)
    emb_w, emb_b = lin(keys[0], IN_DIM, HIDDEN)

    gin_layers = []
    ki = 1
    for _ in range(N_LAYERS):
        w0, b0 = lin(keys[ki], HIDDEN, HIDDEN); ki += 1
        w1, b1 = lin(keys[ki], HIDDEN, HIDDEN); ki += 1
        s1, t1 = bn_affine(HIDDEN)   # MLP internal BN
        s2, t2 = bn_affine(HIDDEN)   # ApplyNodeFunc BN
        s3, t3 = bn_affine(HIDDEN)   # GINLayer bn_node_h
        gin_layers.append((w0, b0, s1, t1, w1, b1, s2, t2, s3, t3))

    pred_w, pred_b = [], []
    for _ in range(N_LAYERS + 1):
        w, b = lin(keys[ki], HIDDEN, N_CLASSES); ki += 1
        pred_w.append(w)
        pred_b.append(b)

    return {
        "emb_w": emb_w, "emb_b": emb_b,
        "gin_layers": gin_layers,
        "pred_w": jnp.stack(pred_w),     # (L+1, H, C)
        "pred_b": jnp.stack(pred_b),     # (L+1, 1, C)
    }


if __name__ == "__main__":
    key = jax.random.PRNGKey(0)
    k_adj, k_feat, k_par = jax.random.split(key, 3)

    # Batch of random symmetric 0/1 adjacencies without self loops.
    upper = (jax.random.uniform(k_adj, (N_GRAPHS, N_NODES, N_NODES)) < 0.2)
    upper = jnp.triu(upper.astype(jnp.float32), 1)
    adj = upper + jnp.swapaxes(upper, -1, -2)

    feat = jax.random.normal(k_feat, (N_GRAPHS, N_NODES, IN_DIM),
                             dtype=jnp.float32)
    snorm_n = jnp.full((N_GRAPHS, N_NODES, 1),
                       1.0 / jnp.sqrt(float(N_NODES)), dtype=jnp.float32)

    params = init_params(k_par)
    folded = fold_params(params)
    adj_aug, feat_pad, sn2d = prepare_graph_inputs(adj, feat, snorm_n)

    scores = gin_net_forward(adj_aug, feat_pad, sn2d, folded)
    scores = jax.block_until_ready(scores)

    ref = ref_forward(adj, feat, snorm_n, params)
    assert scores.shape == (N_GRAPHS, N_CLASSES)
    assert jnp.allclose(scores, ref, atol=2e-3, rtol=2e-4), (
        float(jnp.max(jnp.abs(scores - ref))))
    print("KERNEL_OK")
</pallas_src>

<mosaic_0001>
module attributes {stable_mosaic.version = 11 : i64} {
  func.func @_fused_forward_kernel(%arg0: i32, %arg1: memref<8x32x32xf32, #tpu.memory_space<vmem>>, %arg2: memref<256x32xf32, #tpu.memory_space<vmem>>, %arg3: memref<256x1xf32, #tpu.memory_space<vmem>>, %arg4: memref<9x32x32xf32, #tpu.memory_space<vmem>>, %arg5: memref<17x32xf32, #tpu.memory_space<vmem>>, %arg6: memref<5x32x128xf32, #tpu.memory_space<vmem>>, %arg7: memref<1x128xf32, #tpu.memory_space<vmem>>, %arg8: memref<8x128xf32, #tpu.memory_space<vmem>>) attributes {dimension_semantics = [#tpu.dimension_semantics<parallel>], iteration_bounds = array<i64: 2>, scalar_prefetch = 0 : i64, scratch_operands = 0 : i64, tpu.core_type = #tpu.core_type<tc>, window_params = [{transform_indices = @transform_0, window_bounds = array<i64: 8, 32, 32>}, {transform_indices = @transform_1, window_bounds = array<i64: 256, 32>}, {transform_indices = @transform_2, window_bounds = array<i64: 256, 1>}, {pipeline_mode = #tpu.pipeline_mode<synchronous>, transform_indices = @transform_3, window_bounds = array<i64: 9, 32, 32>}, {pipeline_mode = #tpu.pipeline_mode<synchronous>, transform_indices = @transform_4, window_bounds = array<i64: 17, 32>}, {pipeline_mode = #tpu.pipeline_mode<synchronous>, transform_indices = @transform_5, window_bounds = array<i64: 5, 32, 128>}, {pipeline_mode = #tpu.pipeline_mode<synchronous>, transform_indices = @transform_6, window_bounds = array<i64: 1, 128>}, {transform_indices = @transform_7, window_bounds = array<i64: 8, 128>}]} {
    %c0 = arith.constant 0 : index
    %c0_0 = arith.constant 0 : index
    %0 = vector.load %arg3[%c0, %c0_0] : memref<256x1xf32, #tpu.memory_space<vmem>>, vector<256x1xf32>
    %c0_1 = arith.constant 0 : index
    %c0_2 = arith.constant 0 : index
    %1 = vector.load %arg2[%c0_1, %c0_2] : memref<256x32xf32, #tpu.memory_space<vmem>>, vector<256x32xf32>
    %c0_3 = arith.constant 0 : index
    %c0_4 = arith.constant 0 : index
    %c0_5 = arith.constant 0 : index
    %2 = vector.load %arg4[%c0_3, %c0_4, %c0_5] : memref<9x32x32xf32, #tpu.memory_space<vmem>>, vector<1x32x32xf32>
    %3 = vector.shape_cast %2 : vector<1x32x32xf32> to vector<32x32xf32>
    %cst = arith.constant dense<0.000000e+00> : vector<256x32xf32>
    %4 = tpu.matmul %1, %3, %cst {dimension_numbers = #tpu.dot_dimension_numbers<[1], [0], [0], [1], [0, 0, 1, 1], [], []>} : vector<256x32xf32>, vector<32x32xf32>, vector<256x32xf32> -> vector<256x32xf32>
    %c0_6 = arith.constant 0 : index
    %c0_7 = arith.constant 0 : index
    %5 = vector.load %arg5[%c0_6, %c0_7] : memref<17x32xf32, #tpu.memory_space<vmem>>, vector<1x32xf32>
    %6 = vector.broadcast %5 : vector<1x32xf32> to vector<256x32xf32>
    %7 = arith.addf %4, %6 : vector<256x32xf32>
    %c0_8 = arith.constant 0 : index
    %c0_9 = arith.constant 0 : index
    %c0_10 = arith.constant 0 : index
    %8 = vector.load %arg6[%c0_8, %c0_9, %c0_10] : memref<5x32x128xf32, #tpu.memory_space<vmem>>, vector<1x32x128xf32>
    %9 = vector.shape_cast %8 : vector<1x32x128xf32> to vector<32x128xf32>
    %cst_11 = arith.constant dense<0.000000e+00> : vector<256x128xf32>
    %10 = tpu.matmul %7, %9, %cst_11 {dimension_numbers = #tpu.dot_dimension_numbers<[1], [0], [0], [1], [0, 0, 1, 1], [], []>} : vector<256x32xf32>, vector<32x128xf32>, vector<256x128xf32> -> vector<256x128xf32>
    %c1 = arith.constant 1 : index
    %c0_12 = arith.constant 0 : index
    %11 = vector.load %arg5[%c1, %c0_12] : memref<17x32xf32, #tpu.memory_space<vmem>>, vector<1x32xf32>
    %c2 = arith.constant 2 : index
    %c0_13 = arith.constant 0 : index
    %12 = vector.load %arg5[%c2, %c0_13] : memref<17x32xf32, #tpu.memory_space<vmem>>, vector<1x32xf32>
    %c3 = arith.constant 3 : index
    %c0_14 = arith.constant 0 : index
    %13 = vector.load %arg5[%c3, %c0_14] : memref<17x32xf32, #tpu.memory_space<vmem>>, vector<1x32xf32>
    %c4 = arith.constant 4 : index
    %c0_15 = arith.constant 0 : index
    %14 = vector.load %arg5[%c4, %c0_15] : memref<17x32xf32, #tpu.memory_space<vmem>>, vector<1x32xf32>
    %15 = vector.shape_cast %7 : vector<256x32xf32> to vector<8x32x32xf32>
    %c0_16 = arith.constant 0 : index
    %c0_17 = arith.constant 0 : index
    %c0_18 = arith.constant 0 : index
    %16 = vector.load %arg1[%c0_16, %c0_17, %c0_18] : memref<8x32x32xf32, #tpu.memory_space<vmem>>, vector<8x32x32xf32>
    "tpu.trace_start"() <{level = 10 : i32, message = "bnm,bmh->bnh"}> : () -> ()
    %cst_19 = arith.constant dense<0.000000e+00> : vector<8x32x32xf32>
    %17 = tpu.matmul %16, %15, %cst_19 {dimension_numbers = #tpu.dot_dimension_numbers<[2], [1], [1], [2], [0, 0, 0, 1, 1, 2], [0], [0]>} : vector<8x32x32xf32>, vector<8x32x32xf32>, vector<8x32x32xf32> -> vector<8x32x32xf32>
    "tpu.trace_stop"() : () -> ()
    %18 = vector.shape_cast %17 : vector<8x32x32xf32> to vector<256x32xf32>
    %c1_20 = arith.constant 1 : index
    %c0_21 = arith.constant 0 : index
    %c0_22 = arith.constant 0 : index
    %19 = vector.load %arg4[%c1_20, %c0_21, %c0_22] : memref<9x32x32xf32, #tpu.memory_space<vmem>>, vector<1x32x32xf32>
    %20 = vector.shape_cast %19 : vector<1x32x32xf32> to vector<32x32xf32>
    %cst_23 = arith.constant dense<0.000000e+00> : vector<256x32xf32>
    %21 = tpu.matmul %18, %20, %cst_23 {dimension_numbers = #tpu.dot_dimension_numbers<[1], [0], [0], [1], [0, 0, 1, 1], [], []>} : vector<256x32xf32>, vector<32x32xf32>, vector<256x32xf32> -> vector<256x32xf32>
    %22 = vector.broadcast %11 : vector<1x32xf32> to vector<256x32xf32>
    %23 = arith.addf %21, %22 : vector<256x32xf32>
    %cst_24 = arith.constant 0.000000e+00 : f32
    %24 = vector.broadcast %cst_24 : f32 to vector<256x32xf32>
    %25 = arith.maximumf %23, %24 : vector<256x32xf32>
    %c2_25 = arith.constant 2 : index
    %c0_26 = arith.constant 0 : index
    %c0_27 = arith.constant 0 : index
    %26 = vector.load %arg4[%c2_25, %c0_26, %c0_27] : memref<9x32x32xf32, #tpu.memory_space<vmem>>, vector<1x32x32xf32>
    %27 = vector.shape_cast %26 : vector<1x32x32xf32> to vector<32x32xf32>
    %cst_28 = arith.constant dense<0.000000e+00> : vector<256x32xf32>
    %28 = tpu.matmul %25, %27, %cst_28 {dimension_numbers = #tpu.dot_dimension_numbers<[1], [0], [0], [1], [0, 0, 1, 1], [], []>} : vector<256x32xf32>, vector<32x32xf32>, vector<256x32xf32> -> vector<256x32xf32>
    %29 = vector.broadcast %12 : vector<1x32xf32> to vector<256x32xf32>
    %30 = arith.addf %28, %29 : vector<256x32xf32>
    %cst_29 = arith.constant 0.000000e+00 : f32
    %31 = vector.broadcast %cst_29 : f32 to vector<256x32xf32>
    %32 = arith.maximumf %30, %31 : vector<256x32xf32>
    %33 = vector.broadcast %0 : vector<256x1xf32> to vector<256x32xf32>
    %34 = arith.mulf %32, %33 : vector<256x32xf32>
    %35 = vector.broadcast %13 : vector<1x32xf32> to vector<256x32xf32>
    %36 = arith.mulf %34, %35 : vector<256x32xf32>
    %37 = vector.broadcast %14 : vector<1x32xf32> to vector<256x32xf32>
    %38 = arith.addf %36, %37 : vector<256x32xf32>
    %cst_30 = arith.constant 0.000000e+00 : f32
    %39 = vector.broadcast %cst_30 : f32 to vector<256x32xf32>
    %40 = arith.maximumf %38, %39 : vector<256x32xf32>
    %41 = arith.addf %7, %40 : vector<256x32xf32>
    %c1_31 = arith.constant 1 : index
    %c0_32 = arith.constant 0 : index
    %c0_33 = arith.constant 0 : index
    %42 = vector.load %arg6[%c1_31, %c0_32, %c0_33] : memref<5x32x128xf32, #tpu.memory_space<vmem>>, vector<1x32x128xf32>
    %43 = vector.shape_cast %42 : vector<1x32x128xf32> to vector<32x128xf32>
    %cst_34 = arith.constant dense<0.000000e+00> : vector<256x128xf32>
    %44 = tpu.matmul %41, %43, %cst_34 {dimension_numbers = #tpu.dot_dimension_numbers<[1], [0], [0], [1], [0, 0, 1, 1], [], []>} : vector<256x32xf32>, vector<32x128xf32>, vector<256x128xf32> -> vector<256x128xf32>
    %45 = arith.addf %10, %44 : vector<256x128xf32>
    %c5 = arith.constant 5 : index
    %c0_35 = arith.constant 0 : index
    %46 = vector.load %arg5[%c5, %c0_35] : memref<17x32xf32, #tpu.memory_space<vmem>>, vector<1x32xf32>
    %c6 = arith.constant 6 : index
    %c0_36 = arith.constant 0 : index
    %47 = vector.load %arg5[%c6, %c0_36] : memref<17x32xf32, #tpu.memory_space<vmem>>, vector<1x32xf32>
    %c7 = arith.constant 7 : index
    %c0_37 = arith.constant 0 : index
    %48 = vector.load %arg5[%c7, %c0_37] : memref<17x32xf32, #tpu.memory_space<vmem>>, vector<1x32xf32>
    %c8 = arith.constant 8 : index
    %c0_38 = arith.constant 0 : index
    %49 = vector.load %arg5[%c8, %c0_38] : memref<17x32xf32, #tpu.memory_space<vmem>>, vector<1x32xf32>
    %50 = vector.shape_cast %41 : vector<256x32xf32> to vector<8x32x32xf32>
    %c0_39 = arith.constant 0 : index
    %c0_40 = arith.constant 0 : index
    %c0_41 = arith.constant 0 : index
    %51 = vector.load %arg1[%c0_39, %c0_40, %c0_41] : memref<8x32x32xf32, #tpu.memory_space<vmem>>, vector<8x32x32xf32>
    "tpu.trace_start"() <{level = 10 : i32, message = "bnm,bmh->bnh"}> : () -> ()
    %cst_42 = arith.constant dense<0.000000e+00> : vector<8x32x32xf32>
    %52 = tpu.matmul %51, %50, %cst_42 {dimension_numbers = #tpu.dot_dimension_numbers<[2], [1], [1], [2], [0, 0, 0, 1, 1, 2], [0], [0]>} : vector<8x32x32xf32>, vector<8x32x32xf32>, vector<8x32x32xf32> -> vector<8x32x32xf32>
    "tpu.trace_stop"() : () -> ()
    %53 = vector.shape_cast %52 : vector<8x32x32xf32> to vector<256x32xf32>
    %c3_43 = arith.constant 3 : index
    %c0_44 = arith.constant 0 : index
    %c0_45 = arith.constant 0 : index
    %54 = vector.load %arg4[%c3_43, %c0_44, %c0_45] : memref<9x32x32xf32, #tpu.memory_space<vmem>>, vector<1x32x32xf32>
    %55 = vector.shape_cast %54 : vector<1x32x32xf32> to vector<32x32xf32>
    %cst_46 = arith.constant dense<0.000000e+00> : vector<256x32xf32>
    %56 = tpu.matmul %53, %55, %cst_46 {dimension_numbers = #tpu.dot_dimension_numbers<[1], [0], [0], [1], [0, 0, 1, 1], [], []>} : vector<256x32xf32>, vector<32x32xf32>, vector<256x32xf32> -> vector<256x32xf32>
    %57 = vector.broadcast %46 : vector<1x32xf32> to vector<256x32xf32>
    %58 = arith.addf %56, %57 : vector<256x32xf32>
    %cst_47 = arith.constant 0.000000e+00 : f32
    %59 = vector.broadcast %cst_47 : f32 to vector<256x32xf32>
    %60 = arith.maximumf %58, %59 : vector<256x32xf32>
    %c4_48 = arith.constant 4 : index
    %c0_49 = arith.constant 0 : index
    %c0_50 = arith.constant 0 : index
    %61 = vector.load %arg4[%c4_48, %c0_49, %c0_50] : memref<9x32x32xf32, #tpu.memory_space<vmem>>, vector<1x32x32xf32>
    %62 = vector.shape_cast %61 : vector<1x32x32xf32> to vector<32x32xf32>
    %cst_51 = arith.constant dense<0.000000e+00> : vector<256x32xf32>
    %63 = tpu.matmul %60, %62, %cst_51 {dimension_numbers = #tpu.dot_dimension_numbers<[1], [0], [0], [1], [0, 0, 1, 1], [], []>} : vector<256x32xf32>, vector<32x32xf32>, vector<256x32xf32> -> vector<256x32xf32>
    %64 = vector.broadcast %47 : vector<1x32xf32> to vector<256x32xf32>
    %65 = arith.addf %63, %64 : vector<256x32xf32>
    %cst_52 = arith.constant 0.000000e+00 : f32
    %66 = vector.broadcast %cst_52 : f32 to vector<256x32xf32>
    %67 = arith.maximumf %65, %66 : vector<256x32xf32>
    %68 = vector.broadcast %0 : vector<256x1xf32> to vector<256x32xf32>
    %69 = arith.mulf %67, %68 : vector<256x32xf32>
    %70 = vector.broadcast %48 : vector<1x32xf32> to vector<256x32xf32>
    %71 = arith.mulf %69, %70 : vector<256x32xf32>
    %72 = vector.broadcast %49 : vector<1x32xf32> to vector<256x32xf32>
    %73 = arith.addf %71, %72 : vector<256x32xf32>
    %cst_53 = arith.constant 0.000000e+00 : f32
    %74 = vector.broadcast %cst_53 : f32 to vector<256x32xf32>
    %75 = arith.maximumf %73, %74 : vector<256x32xf32>
    %76 = arith.addf %41, %75 : vector<256x32xf32>
    %c2_54 = arith.constant 2 : index
    %c0_55 = arith.constant 0 : index
    %c0_56 = arith.constant 0 : index
    %77 = vector.load %arg6[%c2_54, %c0_55, %c0_56] : memref<5x32x128xf32, #tpu.memory_space<vmem>>, vector<1x32x128xf32>
    %78 = vector.shape_cast %77 : vector<1x32x128xf32> to vector<32x128xf32>
    %cst_57 = arith.constant dense<0.000000e+00> : vector<256x128xf32>
    %79 = tpu.matmul %76, %78, %cst_57 {dimension_numbers = #tpu.dot_dimension_numbers<[1], [0], [0], [1], [0, 0, 1, 1], [], []>} : vector<256x32xf32>, vector<32x128xf32>, vector<256x128xf32> -> vector<256x128xf32>
    %80 = arith.addf %45, %79 : vector<256x128xf32>
    %c9 = arith.constant 9 : index
    %c0_58 = arith.constant 0 : index
    %81 = vector.load %arg5[%c9, %c0_58] : memref<17x32xf32, #tpu.memory_space<vmem>>, vector<1x32xf32>
    %c10 = arith.constant 10 : index
    %c0_59 = arith.constant 0 : index
    %82 = vector.load %arg5[%c10, %c0_59] : memref<17x32xf32, #tpu.memory_space<vmem>>, vector<1x32xf32>
    %c11 = arith.constant 11 : index
    %c0_60 = arith.constant 0 : index
    %83 = vector.load %arg5[%c11, %c0_60] : memref<17x32xf32, #tpu.memory_space<vmem>>, vector<1x32xf32>
    %c12 = arith.constant 12 : index
    %c0_61 = arith.constant 0 : index
    %84 = vector.load %arg5[%c12, %c0_61] : memref<17x32xf32, #tpu.memory_space<vmem>>, vector<1x32xf32>
    %85 = vector.shape_cast %76 : vector<256x32xf32> to vector<8x32x32xf32>
    %c0_62 = arith.constant 0 : index
    %c0_63 = arith.constant 0 : index
    %c0_64 = arith.constant 0 : index
    %86 = vector.load %arg1[%c0_62, %c0_63, %c0_64] : memref<8x32x32xf32, #tpu.memory_space<vmem>>, vector<8x32x32xf32>
    "tpu.trace_start"() <{level = 10 : i32, message = "bnm,bmh->bnh"}> : () -> ()
    %cst_65 = arith.constant dense<0.000000e+00> : vector<8x32x32xf32>
    %87 = tpu.matmul %86, %85, %cst_65 {dimension_numbers = #tpu.dot_dimension_numbers<[2], [1], [1], [2], [0, 0, 0, 1, 1, 2], [0], [0]>} : vector<8x32x32xf32>, vector<8x32x32xf32>, vector<8x32x32xf32> -> vector<8x32x32xf32>
    "tpu.trace_stop"() : () -> ()
    %88 = vector.shape_cast %87 : vector<8x32x32xf32> to vector<256x32xf32>
    %c5_66 = arith.constant 5 : index
    %c0_67 = arith.constant 0 : index
    %c0_68 = arith.constant 0 : index
    %89 = vector.load %arg4[%c5_66, %c0_67, %c0_68] : memref<9x32x32xf32, #tpu.memory_space<vmem>>, vector<1x32x32xf32>
    %90 = vector.shape_cast %89 : vector<1x32x32xf32> to vector<32x32xf32>
    %cst_69 = arith.constant dense<0.000000e+00> : vector<256x32xf32>
    %91 = tpu.matmul %88, %90, %cst_69 {dimension_numbers = #tpu.dot_dimension_numbers<[1], [0], [0], [1], [0, 0, 1, 1], [], []>} : vector<256x32xf32>, vector<32x32xf32>, vector<256x32xf32> -> vector<256x32xf32>
    %92 = vector.broadcast %81 : vector<1x32xf32> to vector<256x32xf32>
    %93 = arith.addf %91, %92 : vector<256x32xf32>
    %cst_70 = arith.constant 0.000000e+00 : f32
    %94 = vector.broadcast %cst_70 : f32 to vector<256x32xf32>
    %95 = arith.maximumf %93, %94 : vector<256x32xf32>
    %c6_71 = arith.constant 6 : index
    %c0_72 = arith.constant 0 : index
    %c0_73 = arith.constant 0 : index
    %96 = vector.load %arg4[%c6_71, %c0_72, %c0_73] : memref<9x32x32xf32, #tpu.memory_space<vmem>>, vector<1x32x32xf32>
    %97 = vector.shape_cast %96 : vector<1x32x32xf32> to vector<32x32xf32>
    %cst_74 = arith.constant dense<0.000000e+00> : vector<256x32xf32>
    %98 = tpu.matmul %95, %97, %cst_74 {dimension_numbers = #tpu.dot_dimension_numbers<[1], [0], [0], [1], [0, 0, 1, 1], [], []>} : vector<256x32xf32>, vector<32x32xf32>, vector<256x32xf32> -> vector<256x32xf32>
    %99 = vector.broadcast %82 : vector<1x32xf32> to vector<256x32xf32>
    %100 = arith.addf %98, %99 : vector<256x32xf32>
    %cst_75 = arith.constant 0.000000e+00 : f32
    %101 = vector.broadcast %cst_75 : f32 to vector<256x32xf32>
    %102 = arith.maximumf %100, %101 : vector<256x32xf32>
    %103 = vector.broadcast %0 : vector<256x1xf32> to vector<256x32xf32>
    %104 = arith.mulf %102, %103 : vector<256x32xf32>
    %105 = vector.broadcast %83 : vector<1x32xf32> to vector<256x32xf32>
    %106 = arith.mulf %104, %105 : vector<256x32xf32>
    %107 = vector.broadcast %84 : vector<1x32xf32> to vector<256x32xf32>
    %108 = arith.addf %106, %107 : vector<256x32xf32>
    %cst_76 = arith.constant 0.000000e+00 : f32
    %109 = vector.broadcast %cst_76 : f32 to vector<256x32xf32>
    %110 = arith.maximumf %108, %109 : vector<256x32xf32>
    %111 = arith.addf %76, %110 : vector<256x32xf32>
    %c3_77 = arith.constant 3 : index
    %c0_78 = arith.constant 0 : index
    %c0_79 = arith.constant 0 : index
    %112 = vector.load %arg6[%c3_77, %c0_78, %c0_79] : memref<5x32x128xf32, #tpu.memory_space<vmem>>, vector<1x32x128xf32>
    %113 = vector.shape_cast %112 : vector<1x32x128xf32> to vector<32x128xf32>
    %cst_80 = arith.constant dense<0.000000e+00> : vector<256x128xf32>
    %114 = tpu.matmul %111, %113, %cst_80 {dimension_numbers = #tpu.dot_dimension_numbers<[1], [0], [0], [1], [0, 0, 1, 1], [], []>} : vector<256x32xf32>, vector<32x128xf32>, vector<256x128xf32> -> vector<256x128xf32>
    %115 = arith.addf %80, %114 : vector<256x128xf32>
    %c13 = arith.constant 13 : index
    %c0_81 = arith.constant 0 : index
    %116 = vector.load %arg5[%c13, %c0_81] : memref<17x32xf32, #tpu.memory_space<vmem>>, vector<1x32xf32>
    %c14 = arith.constant 14 : index
    %c0_82 = arith.constant 0 : index
    %117 = vector.load %arg5[%c14, %c0_82] : memref<17x32xf32, #tpu.memory_space<vmem>>, vector<1x32xf32>
    %c15 = arith.constant 15 : index
    %c0_83 = arith.constant 0 : index
    %118 = vector.load %arg5[%c15, %c0_83] : memref<17x32xf32, #tpu.memory_space<vmem>>, vector<1x32xf32>
    %c16 = arith.constant 16 : index
    %c0_84 = arith.constant 0 : index
    %119 = vector.load %arg5[%c16, %c0_84] : memref<17x32xf32, #tpu.memory_space<vmem>>, vector<1x32xf32>
    %120 = vector.shape_cast %111 : vector<256x32xf32> to vector<8x32x32xf32>
    %c0_85 = arith.constant 0 : index
    %c0_86 = arith.constant 0 : index
    %c0_87 = arith.constant 0 : index
    %121 = vector.load %arg1[%c0_85, %c0_86, %c0_87] : memref<8x32x32xf32, #tpu.memory_space<vmem>>, vector<8x32x32xf32>
    "tpu.trace_start"() <{level = 10 : i32, message = "bnm,bmh->bnh"}> : () -> ()
    %cst_88 = arith.constant dense<0.000000e+00> : vector<8x32x32xf32>
    %122 = tpu.matmul %121, %120, %cst_88 {dimension_numbers = #tpu.dot_dimension_numbers<[2], [1], [1], [2], [0, 0, 0, 1, 1, 2], [0], [0]>} : vector<8x32x32xf32>, vector<8x32x32xf32>, vector<8x32x32xf32> -> vector<8x32x32xf32>
    "tpu.trace_stop"() : () -> ()
    %123 = vector.shape_cast %122 : vector<8x32x32xf32> to vector<256x32xf32>
    %c7_89 = arith.constant 7 : index
    %c0_90 = arith.constant 0 : index
    %c0_91 = arith.constant 0 : index
    %124 = vector.load %arg4[%c7_89, %c0_90, %c0_91] : memref<9x32x32xf32, #tpu.memory_space<vmem>>, vector<1x32x32xf32>
    %125 = vector.shape_cast %124 : vector<1x32x32xf32> to vector<32x32xf32>
    %cst_92 = arith.constant dense<0.000000e+00> : vector<256x32xf32>
    %126 = tpu.matmul %123, %125, %cst_92 {dimension_numbers = #tpu.dot_dimension_numbers<[1], [0], [0], [1], [0, 0, 1, 1], [], []>} : vector<256x32xf32>, vector<32x32xf32>, vector<256x32xf32> -> vector<256x32xf32>
    %127 = vector.broadcast %116 : vector<1x32xf32> to vector<256x32xf32>
    %128 = arith.addf %126, %127 : vector<256x32xf32>
    %cst_93 = arith.constant 0.000000e+00 : f32
    %129 = vector.broadcast %cst_93 : f32 to vector<256x32xf32>
    %130 = arith.maximumf %128, %129 : vector<256x32xf32>
    %c8_94 = arith.constant 8 : index
    %c0_95 = arith.constant 0 : index
    %c0_96 = arith.constant 0 : index
    %131 = vector.load %arg4[%c8_94, %c0_95, %c0_96] : memref<9x32x32xf32, #tpu.memory_space<vmem>>, vector<1x32x32xf32>
    %132 = vector.shape_cast %131 : vector<1x32x32xf32> to vector<32x32xf32>
    %cst_97 = arith.constant dense<0.000000e+00> : vector<256x32xf32>
    %133 = tpu.matmul %130, %132, %cst_97 {dimension_numbers = #tpu.dot_dimension_numbers<[1], [0], [0], [1], [0, 0, 1, 1], [], []>} : vector<256x32xf32>, vector<32x32xf32>, vector<256x32xf32> -> vector<256x32xf32>
    %134 = vector.broadcast %117 : vector<1x32xf32> to vector<256x32xf32>
    %135 = arith.addf %133, %134 : vector<256x32xf32>
    %cst_98 = arith.constant 0.000000e+00 : f32
    %136 = vector.broadcast %cst_98 : f32 to vector<256x32xf32>
    %137 = arith.maximumf %135, %136 : vector<256x32xf32>
    %138 = vector.broadcast %0 : vector<256x1xf32> to vector<256x32xf32>
    %139 = arith.mulf %137, %138 : vector<256x32xf32>
    %140 = vector.broadcast %118 : vector<1x32xf32> to vector<256x32xf32>
    %141 = arith.mulf %139, %140 : vector<256x32xf32>
    %142 = vector.broadcast %119 : vector<1x32xf32> to vector<256x32xf32>
    %143 = arith.addf %141, %142 : vector<256x32xf32>
    %cst_99 = arith.constant 0.000000e+00 : f32
    %144 = vector.broadcast %cst_99 : f32 to vector<256x32xf32>
    %145 = arith.maximumf %143, %144 : vector<256x32xf32>
    %146 = arith.addf %111, %145 : vector<256x32xf32>
    %c4_100 = arith.constant 4 : index
    %c0_101 = arith.constant 0 : index
    %c0_102 = arith.constant 0 : index
    %147 = vector.load %arg6[%c4_100, %c0_101, %c0_102] : memref<5x32x128xf32, #tpu.memory_space<vmem>>, vector<1x32x128xf32>
    %148 = vector.shape_cast %147 : vector<1x32x128xf32> to vector<32x128xf32>
    %cst_103 = arith.constant dense<0.000000e+00> : vector<256x128xf32>
    %149 = tpu.matmul %146, %148, %cst_103 {dimension_numbers = #tpu.dot_dimension_numbers<[1], [0], [0], [1], [0, 0, 1, 1], [], []>} : vector<256x32xf32>, vector<32x128xf32>, vector<256x128xf32> -> vector<256x128xf32>
    %150 = arith.addf %115, %149 : vector<256x128xf32>
    %151 = vector.shape_cast %150 : vector<256x128xf32> to vector<8x32x128xf32>
    %cst_104 = arith.constant dense<0.000000e+00> : vector<8x128xf32>
    %152 = vector.multi_reduction <add>, %151, %cst_104 [1] : vector<8x32x128xf32> to vector<8x128xf32>
    %c0_105 = arith.constant 0 : index
    %c0_106 = arith.constant 0 : index
    %153 = vector.load %arg7[%c0_105, %c0_106] : memref<1x128xf32, #tpu.memory_space<vmem>>, vector<1x128xf32>
    %154 = vector.broadcast %153 : vector<1x128xf32> to vector<8x128xf32>
    %155 = arith.addf %152, %154 : vector<8x128xf32>
    %c0_107 = arith.constant 0 : index
    %c0_108 = arith.constant 0 : index
    %156 = vector.load %arg8[%c0_107, %c0_108] : memref<8x128xf32, #tpu.memory_space<vmem>>, vector<8x128xf32>
    tpu.vector_store %arg8[%c0_107, %c0_108], %155 {strides = array<i32>} : memref<8x128xf32, #tpu.memory_space<vmem>>, vector<8x128xf32>,
    return
  }
  func.func @transform_0(%arg0: i32) -> (i32, i32, i32) {
    %c0_i32 = arith.constant 0 : i32
    %c0_i32_0 = arith.constant 0 : i32
    %c0_i32_1 = arith.constant 0 : i32
    return %arg0, %c0_i32, %c0_i32_0 : i32, i32, i32
  }
  func.func @transform_1(%arg0: i32) -> (i32, i32) {
    %c0_i32 = arith.constant 0 : i32
    %c0_i32_0 = arith.constant 0 : i32
    return %arg0, %c0_i32 : i32, i32
  }
  func.func @transform_2(%arg0: i32) -> (i32, i32) {
    %c0_i32 = arith.constant 0 : i32
    %c0_i32_0 = arith.constant 0 : i32
    return %arg0, %c0_i32 : i32, i32
  }
  func.func @transform_3(%arg0: i32) -> (i32, i32, i32) {
    %c0_i32 = arith.constant 0 : i32
    %c0_i32_0 = arith.constant 0 : i32
    %c0_i32_1 = arith.constant 0 : i32
    %c0_i32_2 = arith.constant 0 : i32
    return %c0_i32, %c0_i32_0, %c0_i32_1 : i32, i32, i32
  }
  func.func @transform_4(%arg0: i32) -> (i32, i32) {
    %c0_i32 = arith.constant 0 : i32
    %c0_i32_0 = arith.constant 0 : i32
    %c0_i32_1 = arith.constant 0 : i32
    return %c0_i32, %c0_i32_0 : i32, i32
  }
  func.func @transform_5(%arg0: i32) -> (i32, i32, i32) {
    %c0_i32 = arith.constant 0 : i32
    %c0_i32_0 = arith.constant 0 : i32
    %c0_i32_1 = arith.constant 0 : i32
    %c0_i32_2 = arith.constant 0 : i32
    return %c0_i32, %c0_i32_0, %c0_i32_1 : i32, i32, i32
  }
  func.func @transform_6(%arg0: i32) -> (i32, i32) {
    %c0_i32 = arith.constant 0 : i32
    %c0_i32_0 = arith.constant 0 : i32
    %c0_i32_1 = arith.constant 0 : i32
    return %c0_i32, %c0_i32_0 : i32, i32
  }
  func.func @transform_7(%arg0: i32) -> (i32, i32) {
    %c0_i32 = arith.constant 0 : i32
    %c0_i32_0 = arith.constant 0 : i32
    return %arg0, %c0_i32 : i32, i32
  }
}

</mosaic_0001>

<bundles_post_ra>
// kernel: tpu_custom_call.1
= control target key start
LH: loop header
LB: loop body
LE: loop exit
PB: predicated region body
PF: predicated region fallthrough
CT: control target
= control target key end

     0   :  { %12 = vsyncpa [#allocation3], 0  ;;  %s15468_s0 = inlined_call_operand.vmem [shape: f32[16,32,32], index: 0, kind: input, shape index: {}]   ;;  %s15469_s1 = inlined_call_operand.vmem [shape: f32[512,32], index: 1, kind: input, shape index: {}]   ;;  %s15470_s2 = inlined_call_operand.vmem [shape: f32[512,1], index: 2, kind: input, shape index: {}]   ;;  %s15471_s3 = inlined_call_operand.vmem [shape: f32[9,32,32], index: 3, kind: input, shape index: {}]   ;;  %s15472_s4 = inlined_call_operand.vmem [shape: f32[17,32], index: 4, kind: input, shape index: {}]   ;;  %s15473_s5 = inlined_call_operand.vmem [shape: f32[5,32,128], index: 5, kind: input, shape index: {}]   ;;  %s15474_s6 = inlined_call_operand.vmem [shape: f32[1,128], index: 6, kind: input, shape index: {}]   ;;  %s15475_s7 = inlined_call_operand.hbm [shape: f32[16,128], index: 7, kind: output, shape index: {}]  }
   0x1   :  { %14 = vsyncpa [#allocation3 + $0x1], 0  ;;  %s12932_s24 = smov 0   ;;  %s12934_s25 = smov 0  }
   0x2   :  { %s12936_s26 = smov 0   ;;  %s12938_s27 = smov 0  }
   0x3 LB: > { %s12953_s28 = sadd.s32 4294967295, %s12888_s27   ;;  %s9637_s29 = sadd.s32 4294967294, %s12888_s27   ;;  %s12888_s27 = sphi %s12938_s27, %s15738_s27   ;;  %s12884_s26 = sphi %s12936_s26, %s15737_s26   ;;  %s12880_s25 = sphi %s12934_s25, %s15736_s25   ;;  %s12876_s24 = sphi %s12932_s24, %s15735_s24  }
   0x4   : > { %s12957_s30 = sadd.s32 1, %s12888_s27   ;;  %s189_s8 = sadd.s32 1, %s12884_s26 }
   0x5   : > { %s186_s9 = ssub.s32 %s12888_s27, %s12957_s30  ;;  %p199_p0 = scmp.ne.s32.totalorder %s12884_s26, %s12880_s25 }
   0x6   : > { %p187_p1 = scmp.eq.s32.totalorder %s186_s9, 0  ;;  %p200_p2 = scmp.eq.s32.totalorder %s12953_s28, 1 }
   0x7   : > { %p205_p3 = scmp.ne.s32.totalorder %s12880_s25, %s12876_s24  ;;  %p206_p4 = scmp.eq.s32.totalorder %s9637_s29, 1 }
   0x8   : > { %s12968_s10 = scalar_select %p187_p1, %s12884_s26, %s189_s8  }
   0x9   : > { %p12970_p5 = por %p200_p2, %p199_p0  ;;  %p12974_p6 = por %p206_p4, %p205_p3 }
   0xa   : > { %p9640_p7 = scmp.ge.s32.totalorder %s12888_s27, 1  ;;  %p264_p8 = scmp.lt.s32.totalorder %s12888_s27, 3 }
   0xc   : > { %p265_p9 = pnand %p9640_p7, %p264_p8 }
   0xe   : > { %268 = sbr.rel (%p265_p9) target bundleno = 3241 (0xca9), region = 48 }
  0x15   : > { %v390_v0 = vld [vmem:[%s15471_s3] sm:$0xff]  ;;  %v391_v1 = vld [vmem:[%s15471_s3 + $0x8] sm:$0xff]  ;;  %v392_v2 = vld [vmem:[%s15471_s3 + $0x10] sm:$0xff]  ;;  %s9645_s19 = sshll.u32 %s12953_s28, 5  ;;  %vm399_vm0 = vcmask 261120   ;;  %s9642_s9 = sshll.u32 %s12953_s28, 3 }
  0x16   : > { %v12288_v3 = vpack.c.bf16 %v391_v1, %v390_v0  ;;  %v393_v4 = vld [vmem:[%s15471_s3 + $0x18] sm:$0xff]  ;;  %p315_p10 = scmp.lt.s32.totalorder %s9645_s19, 63  ;;  %p308_p11 = scmp.lt.s32.totalorder %s9642_s9, 15  ;;  %v9714_v39 = vld [vmem:[%s15471_s3 + $0x20] sm:$0xff]  ;;  %v9715_v40 = vld [vmem:[%s15471_s3 + $0x28] sm:$0xff]  ;;  %vm9518_vm1 = vcmask 1041409  }
  0x17   : > { %v12292_v5 = vpack.c.bf16 %v393_v4, %v392_v2  ;;  %v9716_v41 = vld [vmem:[%s15471_s3 + $0x30] sm:$0xff]  ;;  %v12360_v42 = vpack.c.bf16 %v9715_v40, %v9714_v39  ;;  %v9717_v43 = vld [vmem:[%s15471_s3 + $0x38] sm:$0xff]  ;;  %v13090_v45 = vld [vmem:[%s15472_s4] ss:$0 sm:$0xff]  ;;  %vm9521_vm2 = vcmask 1042434   ;;  %vm9524_vm3 = vcmask 1043459  }
  0x18   : > { %12289 = vmatprep.subr.bf16.mxu1 %v12288_v3  ;;  %s15740_s19 = smov (!%p315_p10, %s9645_s19), 63  ;;  %s15742_s9 = smov (!%p308_p11, %s9642_s9), 15  ;;  %v12364_v44 = vpack.c.bf16 %v9717_v43, %v9716_v41  ;;  %vm9527_vm4 = vcmask 1044484   ;;  %vm9530_vm5 = vcmask 1045509   ;;  %vm9533_vm6 = vcmask 1046534  }
  0x19   : > { %12291 = vmatpush3.bf16.msra.mxu1 %v12288_v3  ;;  %s9646_s22 = sshll.u32 %s15740_s19, 3  ;;  %s10295_s13 = sshll.u32 %s15742_s9, 5  ;;  %12361 = vmatprep.subr.bf16.mxu0 %v12360_v42  ;;  %vm9536_vm7 = vcmask 1047559  }
  0x1a   : > { %12293 = vmatprep.subr.bf16.mxu1 %v12292_v5  ;;  %s13001_s8 = scalar_lea.vmem %s15469_s1, %s9646_s22  ;;  %s13071_s16 = scalar_lea.vmem %s15468_s0, %s10295_s13  ;;  %12363 = vmatpush3.bf16.msra.mxu0 %v12360_v42 }
  0x1b   : > { %v358_v6 = vld [vmem:[%s13001_s8] sm:$0xff]  ;;  %v359_v7 = vld [vmem:[%s13001_s8 + $0x8] sm:$0xff]  ;;  %v360_v8 = vld [vmem:[%s13001_s8 + $0x10] sm:$0xff]  ;;  %12365 = vmatprep.subr.bf16.mxu0 %v12364_v44  ;;  %s13331_s14 = scalar_lea.vmem %s15470_s2, %s9646_s22  ;;  %s304_s17 = sand.u32 1, %s12880_s25  }
  0x1c   : > { %11064 = vmatprep.mubr.msk.f32.mxu1 %vm399_vm0, %v358_v6  ;;  %v361_v9 = vld [vmem:[%s13001_s8 + $0x18] sm:$0xff]  ;;  %v362_v10 = vld [vmem:[%s13001_s8 + $0x20] sm:$0xff]  ;;  %v363_v11 = vld [vmem:[%s13001_s8 + $0x28] sm:$0xff]  ;;  %s9641_s18 = sshll.u32 %s304_s17, 3  ;;  %s10292_s20 = sshll.u32 %s12953_s28, 7 }
  0x1d   : > { %12295 = vmatpush3.bf16.msra.mxu1 %v12292_v5  ;;  %v364_v12 = vld [vmem:[%s13001_s8 + $0x30] sm:$0xff]  ;;  %v365_v13 = vld [vmem:[%s13001_s8 + $0x38] sm:$0xff]  ;;  %v366_v14 = vld [vmem:[%s13001_s8 + $0x40] sm:$0xff]  ;;  %s306_s21 = scalar_lea.vmem [#allocation2], %s9641_s18  ;;  %s9541_s9 = scalar_lea.sflag [#allocation3], %s304_s17 }
  0x1e   : > { %v367_v15 = vld [vmem:[%s13001_s8 + $0x48] sm:$0xff]  ;;  %v368_v16 = vld [vmem:[%s13001_s8 + $0x50] sm:$0xff]  ;;  %v369_v17 = vld [vmem:[%s13001_s8 + $0x58] sm:$0xff]  ;;  %12367 = vmatpush3.bf16.msra.mxu0 %v12364_v44  ;;  %s9554_s23 = sshll.u32 %s306_s21, 4  ;;  %s12891_s28 = smov [#allocation2]   ;;  %s15428_s23 = int_to_ptr.vmem [resolvable:$true] %s9554_s23 }
  0x1f   : > { %v370_v18 = vld [vmem:[%s13001_s8 + $0x60] sm:$0xff]  ;;  %v371_v19 = vld [vmem:[%s13001_s8 + $0x68] sm:$0xff]  ;;  %v372_v20 = vld [vmem:[%s13001_s8 + $0x70] sm:$0xff]  ;;  %s12826_s13 = scalar_lea.vmem %s15428_s23, 128 }
  0x20   : > { %11065 = vmatmul.mubr.msk.f32.vlgmr.msra.gmra.mrb[0].mxu1 %vm399_vm0, %v359_v7  ;;  %v373_v21 = vld [vmem:[%s13001_s8 + $0x78] sm:$0xff]  ;;  %v374_v22 = vld [vmem:[%s13001_s8 + $0x80] sm:$0xff]  ;;  %v375_v23 = vld [vmem:[%s13001_s8 + $0x88] sm:$0xff]  ;;  %p12827_p12 = scmp.ne.s32.totalorder %s15428_s23, %s12826_s13 }
  0x21   : > { %11067 = vmatprep.mubr.msk.f32.mxu1 %vm399_vm0, %v360_v8  ;;  %v376_v24 = vld [vmem:[%s13001_s8 + $0x90] sm:$0xff]  ;;  %v377_v25 = vld [vmem:[%s13001_s8 + $0x98] sm:$0xff]  ;;  %v378_v26 = vld [vmem:[%s13001_s8 + $0xa0] sm:$0xff] }
  0x22   : > { %v379_v27 = vld [vmem:[%s13001_s8 + $0xa8] sm:$0xff]  ;;  %v380_v28 = vld [vmem:[%s13001_s8 + $0xb0] sm:$0xff]  ;;  %v381_v29 = vld [vmem:[%s13001_s8 + $0xb8] sm:$0xff]  ;;  %p12828_p13 = pnand %p12827_p12, %p12970_p5 }
  0x23   : > { %v382_v30 = vld [vmem:[%s13001_s8 + $0xc0] sm:$0xff]  ;;  %v383_v31 = vld [vmem:[%s13001_s8 + $0xc8] sm:$0xff]  ;;  %v384_v32 = vld [vmem:[%s13001_s8 + $0xd0] sm:$0xff] }
  0x24   : > { %11068 = vmatmul.mubr.msk.f32.gmra.mrb[2].mxu1 %vm399_vm0, %v361_v9  ;;  %v385_v33 = vld [vmem:[%s13001_s8 + $0xd8] sm:$0xff]  ;;  %v386_v34 = vld [vmem:[%s13001_s8 + $0xe0] sm:$0xff]  ;;  %v387_v35 = vld [vmem:[%s13001_s8 + $0xe8] sm:$0xff]  ;;  %p12829_p0 = pneg %p12828_p13 }
  0x25   : > { %11070 = vmatprep.mubr.msk.f32.mxu1 %vm399_vm0, %v362_v10  ;;  %v388_v36 = vld [vmem:[%s13001_s8 + $0xf0] sm:$0xff]  ;;  %v389_v37 = vld [vmem:[%s13001_s8 + $0xf8] sm:$0xff]  ;;  %v729_v38 = vld [vmem:[%s13071_s16] sm:$0xff]  ;;  %s15426_s8 = scalar_lea.hbm %s15475_s7, %s10292_s20 }
  0x26   : > { %v730_v60 = vld [vmem:[%s13071_s16 + $0x8] sm:$0xff]  ;;  %v731_v63 = vld [vmem:[%s13071_s16 + $0x10] sm:$0xff]  ;;  %v732_v3 = vld [vmem:[%s13071_s16 + $0x18] sm:$0xff] }
  0x27   : > { %v733_v6 = vld [vmem:[%s13071_s16 + $0x20] sm:$0xff]  ;;  %v734_v10 = vld [vmem:[%s13071_s16 + $0x28] sm:$0xff]  ;;  %v743_v41 = vld [vmem:[%s13071_s16 + $0x70] sm:$0xff] }
  0x28   : > { %11071 = vmatmul.mubr.msk.f32.gmra.mrb[4].mxu1 %vm399_vm0, %v363_v11 }
  0x29   : > { %11073 = vmatprep.mubr.msk.f32.mxu1 %vm399_vm0, %v364_v12 }
  0x2c   : > { %11074 = vmatmul.mubr.msk.f32.gmra.mrb[6].mxu1 %vm399_vm0, %v365_v13  ;;  %v735_v13 = vld [vmem:[%s13071_s16 + $0x30] sm:$0xff] }
  0x2d   : > { %11076 = vmatprep.mubr.msk.f32.mxu1 %vm399_vm0, %v366_v14 }
  0x30   : > { %11077 = vmatmul.mubr.msk.f32.gmra.mrb[8].mxu1 %vm399_vm0, %v367_v15 }
  0x31   : > { %11079 = vmatprep.mubr.msk.f32.mxu1 %vm399_vm0, %v368_v16 }
  0x34   : > { %11080 = vmatmul.mubr.msk.f32.gmra.mrb[10].mxu1 %vm399_vm0, %v369_v17  ;;  %v736_v17 = vld [vmem:[%s13071_s16 + $0x38] sm:$0xff] }
  0x35   : > { %11082 = vmatprep.mubr.msk.f32.mxu1 %vm399_vm0, %v370_v18 }
  0x38   : > { %11083 = vmatmul.mubr.msk.f32.gmra.mrb[12].mxu1 %vm399_vm0, %v371_v19 }
  0x39   : > { %11085 = vmatprep.mubr.msk.f32.mxu1 %vm399_vm0, %v372_v20  ;;  %v737_v20 = vld [vmem:[%s13071_s16 + $0x40] sm:$0xff] }
  0x3c   : > { %11086 = vmatmul.mubr.msk.f32.gmra.mrb[14].mxu1 %vm399_vm0, %v373_v21 }
  0x3d   : > { %11088 = vmatprep.mubr.msk.f32.mxu1 %vm399_vm0, %v374_v22 }
  0x40   : > { %11089 = vmatmul.mubr.msk.f32.gmra.mrb[16].mxu1 %vm399_vm0, %v375_v23 }
  0x41   : > { %11091 = vmatprep.mubr.msk.f32.mxu1 %vm399_vm0, %v376_v24  ;;  %v738_v24 = vld [vmem:[%s13071_s16 + $0x48] sm:$0xff] }
  0x44   : > { %11092 = vmatmul.mubr.msk.f32.gmra.mrb[18].mxu1 %vm399_vm0, %v377_v25 }
  0x45   : > { %11094 = vmatprep.mubr.msk.f32.mxu1 %vm399_vm0, %v378_v26 }
  0x48   : > { %11095 = vmatmul.mubr.msk.f32.gmra.mrb[20].mxu1 %vm399_vm0, %v379_v27  ;;  %v739_v27 = vld [vmem:[%s13071_s16 + $0x50] sm:$0xff] }
  0x49   : > { %11097 = vmatprep.mubr.msk.f32.mxu1 %vm399_vm0, %v380_v28 }
  0x4c   : > { %11098 = vmatmul.mubr.msk.f32.gmra.mrb[22].mxu1 %vm399_vm0, %v381_v29 }
  0x4d   : > { %11100 = vmatprep.mubr.msk.f32.mxu1 %vm399_vm0, %v382_v30 }
  0x50   : > { %11101 = vmatmul.mubr.msk.f32.gmra.mrb[24].mxu1 %vm399_vm0, %v383_v31  ;;  %v740_v31 = vld [vmem:[%s13071_s16 + $0x58] sm:$0xff] }
  0x51   : > { %11103 = vmatprep.mubr.msk.f32.mxu1 %vm399_vm0, %v384_v32 }
  0x54   : > { %11104 = vmatmul.mubr.msk.f32.gmra.mrb[26].mxu1 %vm399_vm0, %v385_v33 }
  0x55   : > { %11106 = vmatprep.mubr.msk.f32.mxu1 %vm399_vm0, %v386_v34  ;;  %v741_v34 = vld [vmem:[%s13071_s16 + $0x60] sm:$0xff] }
  0x58   : > { %11107 = vmatmul.mubr.msk.f32.gmra.mrb[28].mxu1 %vm399_vm0, %v387_v35 }
  0x59   : > { %11109 = vmatprep.mubr.msk.f32.mxu1 %vm399_vm0, %v388_v36 }
  0x5c   : > { %11110 = vmatmul.mubr.msk.f32.gmra.mrb[30].mxu1 %vm399_vm0, %v389_v37 }
  0x5d   : > { %11120 = vmatprep.mubr.msk.f32.mxu1 %vm399_vm0, %v729_v38  ;;  %v742_v38 = vld [vmem:[%s13071_s16 + $0x68] sm:$0xff] }
  0xf3   : > { %v11066_v46 = vpop.f32.mrb[0].mxu1 }
  0xf4   : > { %v13093_v47 = vadd.f32 %v11066_v46, %v13090_v45  ;;  %v562_v48 = vpop.f32.mrb[1].mxu1  ;;  %v744_v46 = vld [vmem:[%s13071_s16 + $0x78] sm:$0xff] }
  0xf5   : > { %v13096_v49 = vadd.f32 %v13090_v45, %v562_v48 }
  0xf6   : > { %15578 = vst [vmem:[#allocation5_spill] sm:$0xff] %v13093_v47 }
  0xf7   : > { %v11069_v50 = vpop.f32.mrb[2].mxu1  ;;  %v12296_v51 = vpack.c.bf16 %v13093_v47, %v13096_v49 }
  0xf8   : > { %v13101_v52 = vadd.f32 %v11069_v50, %v13090_v45  ;;  %v572_v53 = vpop.f32.mrb[3].mxu1 }
  0xf9   : > { %v13104_v54 = vadd.f32 %v13090_v45, %v572_v53  ;;  %12297 = vmatprep.subr.bf16.mxu1 %v12296_v51 }
  0xfa   : > { %12299 = vmatpush3.bf16.msra.mxu1 %v12296_v51  ;;  %v745_v51 = vld [vmem:[%s13071_s16 + $0x80] sm:$0xff] }
  0xfb   : > { %v11072_v55 = vpop.f32.mrb[4].mxu1  ;;  %v12300_v56 = vpack.c.bf16 %v13101_v52, %v13104_v54 }
  0xfc   : > { %v13109_v57 = vadd.f32 %v11072_v55, %v13090_v45  ;;  %v582_v58 = vpop.f32.mrb[5].mxu1 }
  0xfd   : > { %v13112_v59 = vadd.f32 %v13090_v45, %v582_v58  ;;  %12301 = vmatprep.subr.bf16.mxu1 %v12300_v56  ;;  %v746_v58 = vld [vmem:[%s13071_s16 + $0x88] sm:$0xff] }
  0xfe   : > { %12303 = vmatpush3.bf16.msra.mxu1 %v12300_v56 }
  0xff   : > { %v11075_v61 = vpop.f32.mrb[6].mxu1  ;;  %v12304_v62 = vpack.c.bf16 %v13109_v57, %v13112_v59 }
 0x100   : > { %v13119_v0 = vadd.f32 %v11075_v61, %v13090_v45  ;;  %v592_v1 = vpop.f32.mrb[7].mxu1 }
 0x101   : > { %v13122_v2 = vadd.f32 %v13090_v45, %v592_v1  ;;  %11121 = vmatmul.mubr.msk.f32.vlgmr.msra.gmra.mrb[32].mxu1 %vm399_vm0, %v730_v60  ;;  %12305 = vmatprep.subr.bf16.mxu1 %v12304_v62 }
 0x102   : > { %12307 = vmatpush3.bf16.msra.mxu1 %v12304_v62  ;;  %11123 = vmatprep.mubr.msk.f32.mxu1 %vm399_vm0, %v731_v63  ;;  %v747_v62 = vld [vmem:[%s13071_s16 + $0x90] sm:$0xff] }
 0x103   : > { %v11078_v4 = vpop.f32.mrb[8].mxu1  ;;  %v12308_v5 = vpack.c.bf16 %v13119_v0, %v13122_v2 }
 0x104   : > { %v13131_v7 = vadd.f32 %v11078_v4, %v13090_v45  ;;  %v602_v8 = vpop.f32.mrb[9].mxu1  ;;  %v748_v4 = vld [vmem:[%s13071_s16 + $0x98] sm:$0xff] }
 0x105   : > { %v13134_v9 = vadd.f32 %v13090_v45, %v602_v8  ;;  %11124 = vmatmul.mubr.msk.f32.gmra.mrb[34].mxu1 %vm399_vm0, %v732_v3  ;;  %12309 = vmatprep.subr.bf16.mxu1 %v12308_v5  ;;  %v749_v8 = vld [vmem:[%s13071_s16 + $0xa0] sm:$0xff] }
 0x106   : > { %12311 = vmatpush3.bf16.msra.mxu1 %v12308_v5  ;;  %11134 = vmatprep.mubr.msk.f32.mxu1 %vm399_vm0, %v733_v6 }
 0x107   : > { %v11081_v11 = vpop.f32.mrb[10].mxu1  ;;  %v12312_v12 = vpack.c.bf16 %v13131_v7, %v13134_v9 }
 0x108   : > { %v13143_v14 = vadd.f32 %v11081_v11, %v13090_v45  ;;  %v612_v15 = vpop.f32.mrb[11].mxu1 }
 0x109   : > { %v13146_v16 = vadd.f32 %v13090_v45, %v612_v15  ;;  %11135 = vmatmul.mubr.msk.f32.vlgmr.msra.gmra.mrb[36].mxu1 %vm399_vm0, %v734_v10  ;;  %12313 = vmatprep.subr.bf16.mxu1 %v12312_v12 }
 0x10a   : > { %12315 = vmatpush3.bf16.msra.mxu1 %v12312_v12  ;;  %11137 = vmatprep.mubr.msk.f32.mxu1 %vm399_vm0, %v735_v13  ;;  %v750_v13 = vld [vmem:[%s13071_s16 + $0xa8] sm:$0xff] }
 0x10b   : > { %v11084_v18 = vpop.f32.mrb[12].mxu1  ;;  %v12316_v19 = vpack.c.bf16 %v13143_v14, %v13146_v16 }
 0x10c   : > { %v13155_v21 = vadd.f32 %v11084_v18, %v13090_v45  ;;  %v622_v22 = vpop.f32.mrb[13].mxu1  ;;  %v751_v18 = vld [vmem:[%s13071_s16 + $0xb0] sm:$0xff] }
 0x10d   : > { %v13158_v23 = vadd.f32 %v13090_v45, %v622_v22  ;;  %11138 = vmatmul.mubr.msk.f32.gmra.mrb[38].mxu1 %vm399_vm0, %v736_v17  ;;  %12317 = vmatprep.subr.bf16.mxu1 %v12316_v19 }
 0x10e   : > { %12319 = vmatpush3.bf16.msra.mxu1 %v12316_v19  ;;  %11148 = vmatprep.mubr.msk.f32.mxu1 %vm399_vm0, %v737_v20 }
 0x10f   : > { %v11087_v25 = vpop.f32.mrb[14].mxu1  ;;  %v12320_v26 = vpack.c.bf16 %v13155_v21, %v13158_v23 }
 0x110   : > { %v13167_v28 = vadd.f32 %v11087_v25, %v13090_v45  ;;  %v632_v29 = vpop.f32.mrb[15].mxu1 }
 0x111   : > { %v13170_v30 = vadd.f32 %v13090_v45, %v632_v29  ;;  %11149 = vmatmul.mubr.msk.f32.vlgmr.msra.gmra.mrb[40].mxu1 %vm399_vm0, %v738_v24  ;;  %12321 = vmatprep.subr.bf16.mxu1 %v12320_v26  ;;  %v752_v24 = vld [vmem:[%s13071_s16 + $0xb8] sm:$0xff] }
 0x112   : > { %12323 = vmatpush3.bf16.msra.mxu1 %v12320_v26  ;;  %11151 = vmatprep.mubr.msk.f32.mxu1 %vm399_vm0, %v739_v27  ;;  %v753_v27 = vld [vmem:[%s13071_s16 + $0xc0] sm:$0xff] }
 0x113   : > { %v11090_v32 = vpop.f32.mrb[16].mxu1  ;;  %v12324_v33 = vpack.c.bf16 %v13167_v28, %v13170_v30 }
 0x114   : > { %v13179_v35 = vadd.f32 %v11090_v32, %v13090_v45  ;;  %v642_v36 = vpop.f32.mrb[17].mxu1 }
 0x115   : > { %v13182_v37 = vadd.f32 %v13090_v45, %v642_v36  ;;  %11152 = vmatmul.mubr.msk.f32.gmra.mrb[42].mxu1 %vm399_vm0, %v740_v31  ;;  %12325 = vmatprep.subr.bf16.mxu1 %v12324_v33 }
 0x116   : > { %12327 = vmatpush3.bf16.msra.mxu1 %v12324_v33  ;;  %11162 = vmatprep.mubr.msk.f32.mxu1 %vm399_vm0, %v741_v34  ;;  %v754_v33 = vld [vmem:[%s13071_s16 + $0xc8] sm:$0xff] }
 0x117   : > { %v11093_v39 = vpop.f32.mrb[18].mxu1  ;;  %v12328_v40 = vpack.c.bf16 %v13179_v35, %v13182_v37 }
 0x118   : > { %v13191_v42 = vadd.f32 %v11093_v39, %v13090_v45  ;;  %v652_v43 = vpop.f32.mrb[19].mxu1 }
 0x119   : > { %v13194_v44 = vadd.f32 %v13090_v45, %v652_v43  ;;  %11163 = vmatmul.mubr.msk.f32.vlgmr.msra.gmra.mrb[44].mxu1 %vm399_vm0, %v742_v38  ;;  %12329 = vmatprep.subr.bf16.mxu1 %v12328_v40  ;;  %v755_v38 = vld [vmem:[%s13071_s16 + $0xd0] sm:$0xff]  ;;  %v756_v43 = vld [vmem:[%s13071_s16 + $0xd8] sm:$0xff] }
 0x11a   : > { %12331 = vmatpush3.bf16.msra.mxu1 %v12328_v40  ;;  %11165 = vmatprep.mubr.msk.f32.mxu1 %vm399_vm0, %v743_v41 }
 0x11b   : > { %v11096_v48 = vpop.f32.mrb[20].mxu1  ;;  %v12332_v50 = vpack.c.bf16 %v13191_v42, %v13194_v44 }
 0x11c   : > { %v13203_v53 = vadd.f32 %v11096_v48, %v13090_v45  ;;  %v662_v55 = vpop.f32.mrb[21].mxu1  ;;  %v757_v48 = vld [vmem:[%s13071_s16 + $0xe0] sm:$0xff] }
 0x11d   : > { %v13206_v56 = vadd.f32 %v13090_v45, %v662_v55  ;;  %11166 = vmatmul.mubr.msk.f32.gmra.mrb[46].mxu1 %vm399_vm0, %v744_v46  ;;  %12333 = vmatprep.subr.bf16.mxu1 %v12332_v50  ;;  %v9751_v55 = vld [vmem:[%s15471_s3 + $0x40] sm:$0xff] }
 0x11e   : > { %12335 = vmatpush3.bf16.msra.mxu1 %v12332_v50  ;;  %11176 = vmatprep.mubr.msk.f32.mxu1 %vm399_vm0, %v745_v51  ;;  %v759_v50 = vld [vmem:[%s13071_s16 + $0xf0] sm:$0xff]  ;;  %v760_v51 = vld [vmem:[%s13071_s16 + $0xf8] sm:$0xff] }
 0x11f   : > { %v11099_v60 = vpop.f32.mrb[22].mxu1  ;;  %v12336_v61 = vpack.c.bf16 %v13203_v53, %v13206_v56 }
 0x120   : > { %v13215_v63 = vadd.f32 %v11099_v60, %v13090_v45  ;;  %v672_v1 = vpop.f32.mrb[23].mxu1 }
 0x121   : > { %v13218_v3 = vadd.f32 %v13090_v45, %v672_v1  ;;  %11177 = vmatmul.mubr.msk.f32.vlgmr.msra.gmra.mrb[48].mxu1 %vm399_vm0, %v746_v58  ;;  %12337 = vmatprep.subr.bf16.mxu1 %v12336_v61  ;;  %v9752_v58 = vld [vmem:[%s15471_s3 + $0x48] sm:$0xff] }
 0x122   : > { %12339 = vmatpush3.bf16.msra.mxu1 %v12336_v61  ;;  %11179 = vmatprep.mubr.msk.f32.mxu1 %vm399_vm0, %v747_v62  ;;  %v12368_v60 = vpack.c.bf16 %v9752_v58, %v9751_v55 }
 0x123   : > { %v11102_v5 = vpop.f32.mrb[24].mxu1  ;;  %v12340_v6 = vpack.c.bf16 %v13215_v63, %v13218_v3 }
 0x124   : > { %v13227_v10 = vadd.f32 %v11102_v5, %v13090_v45  ;;  %v682_v11 = vpop.f32.mrb[25].mxu1 }
 0x125   : > { %v13230_v12 = vadd.f32 %v13090_v45, %v682_v11  ;;  %11180 = vmatmul.mubr.msk.f32.gmra.mrb[50].mxu1 %vm399_vm0, %v748_v4  ;;  %12341 = vmatprep.subr.bf16.mxu1 %v12340_v6 }
 0x126   : > { %12343 = vmatpush3.bf16.msra.mxu1 %v12340_v6  ;;  %11190 = vmatprep.mubr.msk.f32.mxu1 %vm399_vm0, %v749_v8 }
 0x127   : > { %v11105_v15 = vpop.f32.mrb[26].mxu1  ;;  %v12344_v17 = vpack.c.bf16 %v13227_v10, %v13230_v12 }
 0x128   : > { %v13239_v19 = vadd.f32 %v11105_v15, %v13090_v45  ;;  %v692_v20 = vpop.f32.mrb[27].mxu1 }
 0x129   : > { %v13242_v22 = vadd.f32 %v13090_v45, %v692_v20  ;;  %11191 = vmatmul.mubr.msk.f32.vlgmr.msra.gmra.mrb[52].mxu1 %vm399_vm0, %v750_v13  ;;  %12345 = vmatprep.subr.bf16.mxu1 %v12344_v17 }
 0x12a   : > { %12347 = vmatpush3.bf16.msra.mxu1 %v12344_v17  ;;  %11193 = vmatprep.mubr.msk.f32.mxu1 %vm399_vm0, %v751_v18 }
 0x12b   : > { %v11108_v25 = vpop.f32.mrb[28].mxu1  ;;  %v12348_v26 = vpack.c.bf16 %v13239_v19, %v13242_v22 }
 0x12c   : > { %v13251_v29 = vadd.f32 %v11108_v25, %v13090_v45  ;;  %v702_v31 = vpop.f32.mrb[29].mxu1 }
 0x12d   : > { %v13254_v32 = vadd.f32 %v13090_v45, %v702_v31  ;;  %11194 = vmatmul.mubr.msk.f32.gmra.mrb[54].mxu1 %vm399_vm0, %v752_v24  ;;  %12349 = vmatprep.subr.bf16.mxu1 %v12348_v26 }
 0x12e   : > { %15579 = vst [vmem:[#allocation6_spill] sm:$0xff] %v13251_v29  ;;  %12351 = vmatpush3.bf16.msra.mxu1 %v12348_v26  ;;  %11204 = vmatprep.mubr.msk.f32.mxu1 %vm399_vm0, %v753_v27 }
 0x12f   : > { %v11111_v34 = vpop.f32.mrb[30].mxu1  ;;  %v12352_v36 = vpack.c.bf16 %v13251_v29, %v13254_v32 }
 0x130   : > { %v13263_v39 = vadd.f32 %v11111_v34, %v13090_v45  ;;  %v712_v40 = vpop.f32.mrb[31].mxu1 }
 0x131   : > { %v13266_v41 = vadd.f32 %v13090_v45, %v712_v40  ;;  %11205 = vmatmul.mubr.msk.f32.vlgmr.msra.gmra.mrb[56].mxu1 %vm399_vm0, %v754_v33  ;;  %12353 = vmatprep.subr.bf16.mxu1 %v12352_v36  ;;  %v758_v45 = vld [vmem:[%s13071_s16 + $0xe8] sm:$0xff] }
 0x132   : > { %15580 = vst [vmem:[#allocation7_spill] sm:$0xff] %v13263_v39  ;;  %12355 = vmatpush3.bf16.msra.mxu1 %v12352_v36  ;;  %11207 = vmatprep.mubr.msk.f32.mxu1 %vm399_vm0, %v755_v38 }
 0x133   : > { %15581 = vst [vmem:[#allocation8_spill] sm:$0xff] %v13266_v41  ;;  %v12356_v46 = vpack.c.bf16 %v13263_v39, %v13266_v41 }
 0x135   : > { %11208 = vmatmul.mubr.msk.f32.gmra.mrb[58].mxu1 %vm399_vm0, %v756_v43  ;;  %12357 = vmatprep.subr.bf16.mxu1 %v12356_v46 }
 0x136   : > { %12359 = vmatpush3.bf16.msra.mxu1 %v12356_v46  ;;  %11218 = vmatprep.mubr.msk.f32.mxu1 %vm399_vm0, %v757_v48 }
 0x137   : > { %12369 = vmatprep.subr.bf16.mxu1 %v12368_v60 }
 0x139   : > { %11219 = vmatmul.mubr.msk.f32.vlgmr.msra.gmra.mrb[60].mxu1 %vm399_vm0, %v758_v45 }
 0x13a   : > { %11221 = vmatprep.mubr.msk.f32.mxu1 %vm399_vm0, %v759_v50  ;;  %12371 = vmatpush3.bf16.msra.mxu1 %v12368_v60 }
 0x13d   : > { %11222 = vmatmul.mubr.msk.f32.gmra.mrb[62].mxu1 %vm399_vm0, %v760_v51 }
 0x1d4   : > { %v11122_v61 = vpop.f32.mrb[32].mxu1 }
 0x1d5   : > { %v839_v62 = vpop.f32.mrb[33].mxu1 }
 0x1d6   : > { %11232 = vmatprep.mubr.msk.f32.mxu0 %vm399_vm0, %v839_v62  ;;  %v9754_v62 = vld [vmem:[%s15471_s3 + $0x58] sm:$0xff] }
 0x1d7   : > { %11233 = vmatmul.mubr.msk.f32.vlgmr.msra.gmra.mrb[0].mxu0 %vm399_vm0, %v11122_v61  ;;  %v9753_v61 = vld [vmem:[%s15471_s3 + $0x50] sm:$0xff] }
 0x1d8   : > { %v11125_v1 = vpop.f32.mrb[34].mxu1 }
 0x1d9   : > { %v849_v4 = vpop.f32.mrb[35].mxu1 }
 0x1da   : > { %11235 = vmatprep.mubr.msk.f32.mxu0 %vm399_vm0, %v849_v4  ;;  %v12890_v4 = vmov 0  }
 0x1db   : > { %11236 = vmatmul.mubr.msk.f32.gmra.mrb[2].mxu0 %vm399_vm0, %v11125_v1  ;;  %v12372_v1 = vpack.c.bf16 %v9754_v62, %v9753_v61  ;;  %12824 = vset.pattern.permute.xlu0 %v12890_v4  ;;  %v354_v61 = vld [vmem:[%s13331_s14 + $0xe0] sm:$0xff]  ;;  %v355_v62 = vld [vmem:[%s13331_s14 + $0xe8] sm:$0xff] }
 0x1dc   : > { %v11136_v5 = vpop.f32.mrb[36].mxu1  ;;  %12825 = vset.pattern.permute.xlu1 %v12890_v4  ;;  %v357_v4 = vld [vmem:[%s13331_s14 + $0xf8] sm:$0xff] }
 0x1dd   : > { %v936_v6 = vpop.f32.mrb[37].mxu1  ;;  %12373 = vmatprep.subr.bf16.mxu1 %v12372_v1 }
 0x1de   : > { %11238 = vmatprep.mubr.msk.f32.mxu0 %vm399_vm0, %v936_v6  ;;  %12375 = vmatpush3.bf16.msra.mxu1 %v12372_v1  ;;  %v328_v6 = vld [vmem:[%s13331_s14 + $0x10] sm:$0xff] }
 0x1df   : > { %11239 = vmatmul.mubr.msk.f32.gmra.mrb[4].mxu0 %vm399_vm0, %v11136_v5  ;;  %v326_v5 = vld [vmem:[%s13331_s14] sm:$0xff]  ;;  %2273 = vperm.xlu1 %12825, %v328_v6   ;;  %v356_v1 = vld [vmem:[%s13331_s14 + $0xf0] sm:$0xff] }
 0x1e0   : > { %v11139_v8 = vpop.f32.mrb[38].mxu1  ;;  %2263 = vperm.xlu0 %12824, %v326_v5   ;;  %v13368_v5 = vld [vmem:[%s15472_s4 + $0x1] ss:$0 sm:$0xff] }
 0x1e1   : > { %v946_v11 = vpop.f32.mrb[39].mxu1 }
 0x1e2   : > { %11241 = vmatprep.mubr.msk.f32.mxu0 %vm399_vm0, %v946_v11  ;;  %v329_v11 = vld [vmem:[%s13331_s14 + $0x18] sm:$0xff] }
 0x1e3   : > { %11242 = vmatmul.mubr.msk.f32.gmra.mrb[6].mxu0 %vm399_vm0, %v11139_v8  ;;  %v327_v8 = vld [vmem:[%s13331_s14 + $0x8] sm:$0xff]  ;;  %2278 = vperm.xlu1 %12825, %v329_v11  }
 0x1e4   : > { %v11150_v13 = vpop.f32.mrb[40].mxu1  ;;  %2268 = vperm.xlu0 %12824, %v327_v8  }
 0x1e5   : > { %v1033_v15 = vpop.f32.mrb[41].mxu1 }
 0x1e6   : > { %11244 = vmatprep.mubr.msk.f32.mxu0 %vm399_vm0, %v1033_v15  ;;  %v331_v15 = vld [vmem:[%s13331_s14 + $0x28] sm:$0xff] }
 0x1e7   : > { %11245 = vmatmul.mubr.msk.f32.gmra.mrb[8].mxu0 %vm399_vm0, %v11150_v13  ;;  %v330_v13 = vld [vmem:[%s13331_s14 + $0x20] sm:$0xff]  ;;  %2288 = vperm.xlu1 %12825, %v331_v15  }
 0x1e8   : > { %v11153_v17 = vpop.f32.mrb[42].mxu1  ;;  %2283 = vperm.xlu0 %12824, %v330_v13  }
 0x1e9   : > { %v1043_v18 = vpop.f32.mrb[43].mxu1 }
 0x1ea   : > { %11247 = vmatprep.mubr.msk.f32.mxu0 %vm399_vm0, %v1043_v18  ;;  %v333_v18 = vld [vmem:[%s13331_s14 + $0x38] sm:$0xff] }
 0x1eb   : > { %11248 = vmatmul.mubr.msk.f32.gmra.mrb[10].mxu0 %vm399_vm0, %v11153_v17  ;;  %v332_v17 = vld [vmem:[%s13331_s14 + $0x30] sm:$0xff]  ;;  %2298 = vperm.xlu1 %12825, %v333_v18  }
 0x1ec   : > { %v11164_v20 = vpop.f32.mrb[44].mxu1  ;;  %2293 = vperm.xlu0 %12824, %v332_v17  }
 0x1ed   : > { %v1130_v24 = vpop.f32.mrb[45].mxu1 }
 0x1ee   : > { %11250 = vmatprep.mubr.msk.f32.mxu0 %vm399_vm0, %v1130_v24  ;;  %v335_v24 = vld [vmem:[%s13331_s14 + $0x48] sm:$0xff] }
 0x1ef   : > { %11251 = vmatmul.mubr.msk.f32.gmra.mrb[12].mxu0 %vm399_vm0, %v11164_v20  ;;  %v334_v20 = vld [vmem:[%s13331_s14 + $0x40] sm:$0xff]  ;;  %2308 = vperm.xlu1 %12825, %v335_v24  }
 0x1f0   : > { %v11167_v25 = vpop.f32.mrb[46].mxu1  ;;  %2303 = vperm.xlu0 %12824, %v334_v20  }
 0x1f1   : > { %v1140_v26 = vpop.f32.mrb[47].mxu1 }
 0x1f2   : > { %11253 = vmatprep.mubr.msk.f32.mxu0 %vm399_vm0, %v1140_v26  ;;  %v337_v26 = vld [vmem:[%s13331_s14 + $0x58] sm:$0xff] }
 0x1f3   : > { %11254 = vmatmul.mubr.msk.f32.gmra.mrb[14].mxu0 %vm399_vm0, %v11167_v25  ;;  %v336_v25 = vld [vmem:[%s13331_s14 + $0x50] sm:$0xff]  ;;  %2318 = vperm.xlu1 %12825, %v337_v26  }
 0x1f4   : > { %v11178_v27 = vpop.f32.mrb[48].mxu1  ;;  %2313 = vperm.xlu0 %12824, %v336_v25  }
 0x1f5   : > { %v1227_v31 = vpop.f32.mrb[49].mxu1 }
 0x1f6   : > { %11256 = vmatprep.mubr.msk.f32.mxu0 %vm399_vm0, %v1227_v31  ;;  %v339_v31 = vld [vmem:[%s13331_s14 + $0x68] sm:$0xff] }
 0x1f7   : > { %11257 = vmatmul.mubr.msk.f32.gmra.mrb[16].mxu0 %vm399_vm0, %v11178_v27  ;;  %v338_v27 = vld [vmem:[%s13331_s14 + $0x60] sm:$0xff]  ;;  %2328 = vperm.xlu1 %12825, %v339_v31  }
 0x1f8   : > { %v11181_v33 = vpop.f32.mrb[50].mxu1  ;;  %2323 = vperm.xlu0 %12824, %v338_v27  }
 0x1f9   : > { %v1237_v34 = vpop.f32.mrb[51].mxu1 }
 0x1fa   : > { %11259 = vmatprep.mubr.msk.f32.mxu0 %vm399_vm0, %v1237_v34  ;;  %v341_v34 = vld [vmem:[%s13331_s14 + $0x78] sm:$0xff] }
 0x1fb   : > { %11260 = vmatmul.mubr.msk.f32.gmra.mrb[18].mxu0 %vm399_vm0, %v11181_v33  ;;  %v340_v33 = vld [vmem:[%s13331_s14 + $0x70] sm:$0xff]  ;;  %2338 = vperm.xlu1 %12825, %v341_v34  }
 0x1fc   : > { %v11192_v36 = vpop.f32.mrb[52].mxu1  ;;  %2333 = vperm.xlu0 %12824, %v340_v33  }
 0x1fd   : > { %v1324_v38 = vpop.f32.mrb[53].mxu1 }
 0x1fe   : > { %11262 = vmatprep.mubr.msk.f32.mxu0 %vm399_vm0, %v1324_v38  ;;  %v343_v38 = vld [vmem:[%s13331_s14 + $0x88] sm:$0xff] }
 0x1ff   : > { %11263 = vmatmul.mubr.msk.f32.gmra.mrb[20].mxu0 %vm399_vm0, %v11192_v36  ;;  %v342_v36 = vld [vmem:[%s13331_s14 + $0x80] sm:$0xff]  ;;  %2348 = vperm.xlu1 %12825, %v343_v38  }
 0x200   : > { %v11195_v40 = vpop.f32.mrb[54].mxu1  ;;  %2343 = vperm.xlu0 %12824, %v342_v36  }
 0x201   : > { %v1334_v43 = vpop.f32.mrb[55].mxu1 }
 0x202   : > { %11265 = vmatprep.mubr.msk.f32.mxu0 %vm399_vm0, %v1334_v43  ;;  %v345_v43 = vld [vmem:[%s13331_s14 + $0x98] sm:$0xff] }
 0x203   : > { %11266 = vmatmul.mubr.msk.f32.gmra.mrb[22].mxu0 %vm399_vm0, %v11195_v40  ;;  %v344_v40 = vld [vmem:[%s13331_s14 + $0x90] sm:$0xff]  ;;  %2358 = vperm.xlu1 %12825, %v345_v43  }
 0x204   : > { %v11206_v46 = vpop.f32.mrb[56].mxu1  ;;  %2353 = vperm.xlu0 %12824, %v344_v40  }
 0x205   : > { %v1421_v48 = vpop.f32.mrb[57].mxu1 }
 0x206   : > { %11268 = vmatprep.mubr.msk.f32.mxu0 %vm399_vm0, %v1421_v48  ;;  %v347_v48 = vld [vmem:[%s13331_s14 + $0xa8] sm:$0xff] }
 0x207   : > { %11269 = vmatmul.mubr.msk.f32.gmra.mrb[24].mxu0 %vm399_vm0, %v11206_v46  ;;  %v346_v46 = vld [vmem:[%s13331_s14 + $0xa0] sm:$0xff]  ;;  %2368 = vperm.xlu1 %12825, %v347_v48  }
 0x208   : > { %v11209_v45 = vpop.f32.mrb[58].mxu1  ;;  %2363 = vperm.xlu0 %12824, %v346_v46  }
 0x209   : > { %v1431_v50 = vpop.f32.mrb[59].mxu1 }
 0x20a   : > { %11271 = vmatprep.mubr.msk.f32.mxu0 %vm399_vm0, %v1431_v50  ;;  %v349_v50 = vld [vmem:[%s13331_s14 + $0xb8] sm:$0xff] }
 0x20b   : > { %11272 = vmatmul.mubr.msk.f32.gmra.mrb[26].mxu0 %vm399_vm0, %v11209_v45  ;;  %v348_v45 = vld [vmem:[%s13331_s14 + $0xb0] sm:$0xff]  ;;  %2378 = vperm.xlu1 %12825, %v349_v50  }
 0x20c   : > { %v11220_v51 = vpop.f32.mrb[60].mxu1  ;;  %2373 = vperm.xlu0 %12824, %v348_v45  }
 0x20d   : > { %v1518_v55 = vpop.f32.mrb[61].mxu1 }
 0x20e   : > { %11274 = vmatprep.mubr.msk.f32.mxu0 %vm399_vm0, %v1518_v55  ;;  %v351_v55 = vld [vmem:[%s13331_s14 + $0xc8] sm:$0xff] }
 0x20f   : > { %11275 = vmatmul.mubr.msk.f32.gmra.mrb[28].mxu0 %vm399_vm0, %v11220_v51  ;;  %v350_v51 = vld [vmem:[%s13331_s14 + $0xc0] sm:$0xff]  ;;  %2388 = vperm.xlu1 %12825, %v351_v55  }
 0x210   : > { %v11223_v58 = vpop.f32.mrb[62].mxu1  ;;  %2383 = vperm.xlu0 %12824, %v350_v51  }
 0x211   : > { %v1528_v60 = vpop.f32.mrb[63].mxu1 }
 0x212   : > { %11277 = vmatprep.mubr.msk.f32.mxu0 %vm399_vm0, %v1528_v60  ;;  %v353_v60 = vld [vmem:[%s13331_s14 + $0xd8] sm:$0xff] }
 0x213   : > { %11278 = vmatmul.mubr.msk.f32.gmra.mrb[30].mxu0 %vm399_vm0, %v11223_v58  ;;  %v352_v58 = vld [vmem:[%s13331_s14 + $0xd0] sm:$0xff]  ;;  %2398 = vperm.xlu1 %12825, %v353_v60   ;;  %s12830_s14 = sshll.u32 %s12891_s28, 4  ;;  %s12831_s14 = int_to_ptr.vmem [resolvable:$false] %s12830_s14 }
 0x214   : > { %2393 = vperm.xlu0 %12824, %v352_v58   ;;  %s12832_s19 = scalar_lea.vmem %s12831_s14, 256  ;;  %p12833_p1 = scmp.lt.s32.totalorder %s15428_s23, %s12831_s14 }
 0x215   : > { %p12834_p2 = scmp.lt.s32.totalorder %s12832_s19, %s12826_s13 }
 0x217   : > { %2408 = vperm.xlu1 %12825, %v355_v62   ;;  %p12835_p3 = por %p12834_p2, %p12833_p1 }
 0x218   : > { %2403 = vperm.xlu0 %12824, %v354_v61  }
 0x219   : > { %p12836_p4 = pnand %p12835_p3, %p12829_p0 }
 0x21b   : > { %2418 = vperm.xlu1 %12825, %v357_v4  }
 0x21c   : > { %2413 = vperm.xlu0 %12824, %v356_v1  }
 0x2aa   : > { %v11234_v6 = vpop.f32.mrb[0].mxu0 }
 0x2ab   : > { %v1714_v8 = vadd.f32 %v11234_v6, %v13368_v5  ;;  %v1708_v11 = vpop.f32.mrb[1].mxu0 }
 0x2ac   : > { %v1709_v13 = vadd.f32 %v13368_v5, %v1708_v11 }
 0x2ad   : > { %v1868_v18 = vmax.f32 %v1714_v8, 0.0 }
 0x2ae   : > { %v1867_v15 = vmax.f32 %v1709_v13, 0.0  ;;  %v11237_v17 = vpop.f32.mrb[2].mxu0 }
 0x2af   : > { %v1724_v20 = vadd.f32 %v11237_v17, %v13368_v5  ;;  %v1718_v24 = vpop.f32.mrb[3].mxu0 }
 0x2b0   : > { %v1719_v25 = vadd.f32 %v13368_v5, %v1718_v24  ;;  %11288 = vmatprep.mubr.msk.f32.mxu1 %vm399_vm0, %v1867_v15 }
 0x2b1   : > { %11289 = vmatmul.mubr.msk.f32.vlgmr.msra.gmra.mrb[64].mxu1 %vm399_vm0, %v1868_v18  ;;  %v1870_v31 = vmax.f32 %v1724_v20, 0.0 }
 0x2b2   : > { %v1869_v26 = vmax.f32 %v1719_v25, 0.0  ;;  %v11240_v27 = vpop.f32.mrb[4].mxu0 }
 0x2b3   : > { %v1734_v33 = vadd.f32 %v11240_v27, %v13368_v5  ;;  %v1728_v34 = vpop.f32.mrb[5].mxu0 }
 0x2b4   : > { %v1729_v36 = vadd.f32 %v13368_v5, %v1728_v34  ;;  %11291 = vmatprep.mubr.msk.f32.mxu1 %vm399_vm0, %v1869_v26 }
 0x2b5   : > { %11292 = vmatmul.mubr.msk.f32.gmra.mrb[66].mxu1 %vm399_vm0, %v1870_v31  ;;  %v1872_v43 = vmax.f32 %v1734_v33, 0.0 }
 0x2b6   : > { %v1871_v38 = vmax.f32 %v1729_v36, 0.0  ;;  %v11243_v40 = vpop.f32.mrb[6].mxu0 }
 0x2b7   : > { %v1744_v46 = vadd.f32 %v11243_v40, %v13368_v5  ;;  %v1738_v48 = vpop.f32.mrb[7].mxu0 }
 0x2b8   : > { %v1739_v45 = vadd.f32 %v13368_v5, %v1738_v48  ;;  %11294 = vmatprep.mubr.msk.f32.mxu1 %vm399_vm0, %v1871_v38 }
 0x2b9   : > { %11295 = vmatmul.mubr.msk.f32.gmra.mrb[68].mxu1 %vm399_vm0, %v1872_v43  ;;  %v1874_v55 = vmax.f32 %v1744_v46, 0.0 }
 0x2ba   : > { %v1873_v50 = vmax.f32 %v1739_v45, 0.0  ;;  %v11246_v51 = vpop.f32.mrb[8].mxu0 }
 0x2bb   : > { %v1754_v58 = vadd.f32 %v11246_v51, %v13368_v5  ;;  %v1748_v60 = vpop.f32.mrb[9].mxu0 }
 0x2bc   : > { %v1749_v61 = vadd.f32 %v13368_v5, %v1748_v60  ;;  %11297 = vmatprep.mubr.msk.f32.mxu1 %vm399_vm0, %v1873_v50 }
 0x2bd   : > { %11298 = vmatmul.mubr.msk.f32.gmra.mrb[70].mxu1 %vm399_vm0, %v1874_v55  ;;  %v1876_v4 = vmax.f32 %v1754_v58, 0.0 }
 0x2be   : > { %v1875_v62 = vmax.f32 %v1749_v61, 0.0  ;;  %v11249_v1 = vpop.f32.mrb[10].mxu0 }
 0x2bf   : > { %v1764_v6 = vadd.f32 %v11249_v1, %v13368_v5  ;;  %v1758_v8 = vpop.f32.mrb[11].mxu0 }
 0x2c0   : > { %v1759_v11 = vadd.f32 %v13368_v5, %v1758_v8  ;;  %11300 = vmatprep.mubr.msk.f32.mxu1 %vm399_vm0, %v1875_v62 }
 0x2c1   : > { %11301 = vmatmul.mubr.msk.f32.gmra.mrb[72].mxu1 %vm399_vm0, %v1876_v4  ;;  %v1878_v17 = vmax.f32 %v1764_v6, 0.0 }
 0x2c2   : > { %v1877_v13 = vmax.f32 %v1759_v11, 0.0  ;;  %v11252_v15 = vpop.f32.mrb[12].mxu0 }
 0x2c3   : > { %v1774_v18 = vadd.f32 %v11252_v15, %v13368_v5  ;;  %v1768_v20 = vpop.f32.mrb[13].mxu0 }
 0x2c4   : > { %v1769_v24 = vadd.f32 %v13368_v5, %v1768_v20  ;;  %11303 = vmatprep.mubr.msk.f32.mxu1 %vm399_vm0, %v1877_v13 }
 0x2c5   : > { %11304 = vmatmul.mubr.msk.f32.gmra.mrb[74].mxu1 %vm399_vm0, %v1878_v17  ;;  %v1880_v27 = vmax.f32 %v1774_v18, 0.0 }
 0x2c6   : > { %v1879_v25 = vmax.f32 %v1769_v24, 0.0  ;;  %v11255_v26 = vpop.f32.mrb[14].mxu0 }
 0x2c7   : > { %v1784_v31 = vadd.f32 %v11255_v26, %v13368_v5  ;;  %v1778_v33 = vpop.f32.mrb[15].mxu0 }
 0x2c8   : > { %v1779_v34 = vadd.f32 %v13368_v5, %v1778_v33  ;;  %11306 = vmatprep.mubr.msk.f32.mxu1 %vm399_vm0, %v1879_v25 }
 0x2c9   : > { %11307 = vmatmul.mubr.msk.f32.gmra.mrb[76].mxu1 %vm399_vm0, %v1880_v27  ;;  %v1882_v40 = vmax.f32 %v1784_v31, 0.0 }
 0x2ca   : > { %v1881_v36 = vmax.f32 %v1779_v34, 0.0  ;;  %v11258_v38 = vpop.f32.mrb[16].mxu0 }
 0x2cb   : > { %v1794_v43 = vadd.f32 %v11258_v38, %v13368_v5  ;;  %v1788_v46 = vpop.f32.mrb[17].mxu0 }
 0x2cc   : > { %v1789_v48 = vadd.f32 %v13368_v5, %v1788_v46  ;;  %11309 = vmatprep.mubr.msk.f32.mxu1 %vm399_vm0, %v1881_v36 }
 0x2cd   : > { %11310 = vmatmul.mubr.msk.f32.gmra.mrb[78].mxu1 %vm399_vm0, %v1882_v40  ;;  %v1884_v51 = vmax.f32 %v1794_v43, 0.0 }
 0x2ce   : > { %v1883_v45 = vmax.f32 %v1789_v48, 0.0  ;;  %v11261_v50 = vpop.f32.mrb[18].mxu0 }
 0x2cf   : > { %v1804_v55 = vadd.f32 %v11261_v50, %v13368_v5  ;;  %v1798_v58 = vpop.f32.mrb[19].mxu0 }
 0x2d0   : > { %v1799_v60 = vadd.f32 %v13368_v5, %v1798_v58  ;;  %11312 = vmatprep.mubr.msk.f32.mxu1 %vm399_vm0, %v1883_v45 }
 0x2d1   : > { %11313 = vmatmul.mubr.msk.f32.gmra.mrb[80].mxu1 %vm399_vm0, %v1884_v51  ;;  %v1886_v1 = vmax.f32 %v1804_v55, 0.0 }
 0x2d2   : > { %v1885_v61 = vmax.f32 %v1799_v60, 0.0  ;;  %v11264_v62 = vpop.f32.mrb[20].mxu0 }
 0x2d3   : > { %v1814_v4 = vadd.f32 %v11264_v62, %v13368_v5  ;;  %v1808_v6 = vpop.f32.mrb[21].mxu0 }
 0x2d4   : > { %v1809_v8 = vadd.f32 %v13368_v5, %v1808_v6  ;;  %11315 = vmatprep.mubr.msk.f32.mxu1 %vm399_vm0, %v1885_v61 }
 0x2d5   : > { %11316 = vmatmul.mubr.msk.f32.gmra.mrb[82].mxu1 %vm399_vm0, %v1886_v1  ;;  %v1888_v15 = vmax.f32 %v1814_v4, 0.0 }
 0x2d6   : > { %v1887_v11 = vmax.f32 %v1809_v8, 0.0  ;;  %v11267_v13 = vpop.f32.mrb[22].mxu0 }
 0x2d7   : > { %v1824_v17 = vadd.f32 %v11267_v13, %v13368_v5  ;;  %v1818_v18 = vpop.f32.mrb[23].mxu0  ;;  %v9790_v13 = vld [vmem:[%s15473_s5 + $0x20] sm:$0xff] }
 0x2d8   : > { %v1819_v20 = vadd.f32 %v13368_v5, %v1818_v18  ;;  %11318 = vmatprep.mubr.msk.f32.mxu1 %vm399_vm0, %v1887_v11  ;;  %v9793_v18 = vld [vmem:[%s15473_s5 + $0x38] sm:$0xff] }
 0x2d9   : > { %11319 = vmatmul.mubr.msk.f32.gmra.mrb[84].mxu1 %vm399_vm0, %v1888_v15  ;;  %v1890_v26 = vmax.f32 %v1824_v17, 0.0  ;;  %v9791_v15 = vld [vmem:[%s15473_s5 + $0x28] sm:$0xff]  ;;  %v9792_v17 = vld [vmem:[%s15473_s5 + $0x30] sm:$0xff] }
 0x2da   : > { %v1889_v24 = vmax.f32 %v1819_v20, 0.0  ;;  %v11270_v25 = vpop.f32.mrb[24].mxu0  ;;  %v12380_v20 = vpack.c.bf16 %v9793_v18, %v9792_v17 }
 0x2db   : > { %v1834_v27 = vadd.f32 %v11270_v25, %v13368_v5  ;;  %v1828_v31 = vpop.f32.mrb[25].mxu0  ;;  %v721_v25 = vld [vmem:[%s15473_s5] sm:$0xff] }
 0x2dc   : > { %v1829_v33 = vadd.f32 %v13368_v5, %v1828_v31  ;;  %11321 = vmatprep.mubr.msk.f32.mxu1 %vm399_vm0, %v1889_v24  ;;  %v3240_v24 = vld [vmem:[%s13071_s16] sm:$0xff]  ;;  %v13457_v31 = vpop.permute.xlu1 %2273 }
 0x2dd   : > { %11322 = vmatmul.mubr.msk.f32.gmra.mrb[86].mxu1 %vm399_vm0, %v1890_v26  ;;  %v1892_v38 = vmax.f32 %v1834_v27, 0.0  ;;  %v722_v26 = vld [vmem:[%s15473_s5 + $0x8] sm:$0xff]  ;;  %15582 = vst [vmem:[#allocation9_spill] sm:$0xff] %v13457_v31 }
 0x2de   : > { %v1891_v34 = vmax.f32 %v1829_v33, 0.0  ;;  %v11273_v36 = vpop.f32.mrb[26].mxu0  ;;  %v13454_v27 = vpack.c.bf16 %v722_v26, %v721_v25  ;;  %v13459_v33 = vpop.permute.xlu0 %2263 }
 0x2df   : > { %v1844_v40 = vadd.f32 %v11273_v36, %v13368_v5  ;;  %v1838_v43 = vpop.f32.mrb[27].mxu0  ;;  %15583 = vst [vmem:[#allocation10_spill] sm:$0xff] %v13459_v33 }
 0x2e0   : > { %v1839_v46 = vadd.f32 %v13368_v5, %v1838_v43  ;;  %11324 = vmatprep.mubr.msk.f32.mxu1 %vm399_vm0, %v1891_v34  ;;  %v13461_v34 = vpop.permute.xlu1 %2278 }
 0x2e1   : > { %11325 = vmatmul.mubr.msk.f32.gmra.mrb[88].mxu1 %vm399_vm0, %v1892_v38  ;;  %v1894_v50 = vmax.f32 %v1844_v40, 0.0  ;;  %15584 = vst [vmem:[#allocation11_spill] sm:$0xff] %v13461_v34 }
 0x2e2   : > { %v1893_v48 = vmax.f32 %v1839_v46, 0.0  ;;  %v11276_v45 = vpop.f32.mrb[28].mxu0  ;;  %v13463_v36 = vpop.permute.xlu0 %2268 }
 0x2e3   : > { %v1854_v51 = vadd.f32 %v11276_v45, %v13368_v5  ;;  %v1848_v55 = vpop.f32.mrb[29].mxu0  ;;  %15585 = vst [vmem:[#allocation12_spill] sm:$0xff] %v13463_v36  ;;  %v13478_v45 = vld [vmem:[%s15472_s4 + $0x2] ss:$0 sm:$0xff] }
 0x2e4   : > { %v1849_v58 = vadd.f32 %v13368_v5, %v1848_v55  ;;  %11327 = vmatprep.mubr.msk.f32.mxu1 %vm399_vm0, %v1893_v48  ;;  %v13465_v38 = vpop.permute.xlu1 %2288 }
 0x2e5   : > { %11328 = vmatmul.mubr.msk.f32.gmra.mrb[90].mxu1 %vm399_vm0, %v1894_v50  ;;  %v1896_v62 = vmax.f32 %v1854_v51, 0.0  ;;  %15586 = vst [vmem:[#allocation13_spill] sm:$0xff] %v13465_v38 }
 0x2e6   : > { %v1895_v60 = vmax.f32 %v1849_v58, 0.0  ;;  %v11279_v61 = vpop.f32.mrb[30].mxu0  ;;  %v13467_v40 = vpop.permute.xlu0 %2283 }
 0x2e7   : > { %v1864_v1 = vadd.f32 %v11279_v61, %v13368_v5  ;;  %v1858_v4 = vpop.f32.mrb[31].mxu0 }
 0x2e8   : > { %v1859_v6 = vadd.f32 %v13368_v5, %v1858_v4  ;;  %11330 = vmatprep.mubr.msk.f32.mxu1 %vm399_vm0, %v1895_v60  ;;  %v12376_v5 = vpack.c.bf16 %v9791_v15, %v9790_v13  ;;  %v13469_v43 = vpop.permute.xlu1 %2298 }
 0x2e9   : > { %11331 = vmatmul.mubr.msk.f32.gmra.mrb[92].mxu1 %vm399_vm0, %v1896_v62  ;;  %v1898_v11 = vmax.f32 %v1864_v1, 0.0  ;;  %15587 = vst [vmem:[#allocation14_spill] sm:$0xff] %v13469_v43  ;;  %v13489_v1 = vld [vmem:[%s15472_s4 + $0x3] ss:$0 sm:$0xff] }
 0x2ea   : > { %v1897_v8 = vmax.f32 %v1859_v6, 0.0  ;;  %12377 = vmatprep.subr.bf16.mxu0 %v12376_v5  ;;  %v13471_v46 = vpop.permute.xlu0 %2293 }
 0x2eb   : > { %12379 = vmatpush3.bf16.msra.mxu0 %v12376_v5  ;;  %15588 = vst [vmem:[#allocation15_spill] sm:$0xff] %v13471_v46  ;;  %v13498_v5 = vld [vmem:[%s15472_s4 + $0x4] ss:$0 sm:$0xff] }
 0x2ec   : > { %11333 = vmatprep.mubr.msk.f32.mxu1 %vm399_vm0, %v1897_v8  ;;  %12381 = vmatprep.subr.bf16.mxu0 %v12380_v20  ;;  %v13473_v48 = vpop.permute.xlu1 %2308 }
 0x2ed   : > { %11334 = vmatmul.mubr.msk.f32.gmra.mrb[94].mxu1 %vm399_vm0, %v1898_v11  ;;  %15589 = vst [vmem:[#allocation16_spill] sm:$0xff] %v13473_v48 }
 0x2ee   : > { %11456 = vmatprep.mubr.msk.f32.mxu1 %vm399_vm0, %v3240_v24  ;;  %v13480_v50 = vpop.permute.xlu0 %2303 }
 0x2ef   : > { %12383 = vmatpush3.bf16.msra.mxu0 %v12380_v20  ;;  %15590 = vst [vmem:[#allocation17_spill] sm:$0xff] %v13480_v50 }
 0x2f0   : > { %12385 = vmatprep.subr.bf16.mxu0 %v13454_v27  ;;  %v13484_v62 = vpop.permute.xlu1 %2318 }
 0x2f1   : > { %15591 = vst [vmem:[#allocation18_spill] sm:$0xff] %v13484_v62 }
 0x2f2   : > { %v13491_v8 = vpop.permute.xlu0 %2313 }
 0x2f3   : > { %15592 = vst [vmem:[#allocation19_spill] sm:$0xff] %v13491_v8 }
 0x384   : > { %v11290_v51 = vpop.f32.mrb[64].mxu1 }
 0x385   : > { %v2076_v55 = vadd.f32 %v11290_v51, %v13478_v45  ;;  %v2070_v58 = vpop.f32.mrb[65].mxu1 }
 0x386   : > { %v2071_v60 = vadd.f32 %v13478_v45, %v2070_v58 }
 0x387   : > { %v2230_v61 = vmax.f32 %v2076_v55, 0.0 }
 0x388   : > { %v2229_v4 = vmax.f32 %v2071_v60, 0.0  ;;  %v11293_v6 = vpop.f32.mrb[66].mxu1 }
 0x389   : > { %v2422_v11 = vmul.f32 %v13463_v36, %v2230_v61  ;;  %v2086_v13 = vadd.f32 %v11293_v6, %v13478_v45  ;;  %v2080_v15 = vpop.f32.mrb[67].mxu1  ;;  %v13507_v6 = vpop.permute.xlu1 %2328  ;;  %v723_v36 = vld [vmem:[%s15473_s5 + $0x10] sm:$0xff] }
 0x38a   : > { %v2421_v17 = vmul.f32 %v13459_v33, %v2229_v4  ;;  %v2081_v18 = vadd.f32 %v13478_v45, %v2080_v15  ;;  %15593 = vst [vmem:[#allocation20_spill] sm:$0xff] %v13507_v6 }
 0x38b   : > { %v2458_v20 = vmul.f32 %v13489_v1, %v2422_v11  ;;  %v2232_v24 = vmax.f32 %v2086_v13, 0.0  ;;  %v13512_v13 = vpop.permute.xlu0 %2323 }
 0x38c   : > { %v2457_v25 = vmul.f32 %v13489_v1, %v2421_v17  ;;  %v2231_v26 = vmax.f32 %v2081_v18, 0.0  ;;  %v11296_v51 = vpop.f32.mrb[68].mxu1  ;;  %15594 = vst [vmem:[#allocation21_spill] sm:$0xff] %v13512_v13 }
 0x38d   : > { %v2494_v55 = vadd.f32 %v13498_v5, %v2458_v20  ;;  %v2424_v58 = vmul.f32 %v13461_v34, %v2232_v24  ;;  %v2096_v60 = vadd.f32 %v11296_v51, %v13478_v45  ;;  %v2090_v61 = vpop.f32.mrb[69].mxu1 }
 0x38e   : > { %v2493_v4 = vadd.f32 %v13498_v5, %v2457_v25  ;;  %v2423_v15 = vmul.f32 %v13457_v31, %v2231_v26  ;;  %v2091_v11 = vadd.f32 %v13478_v45, %v2090_v61  ;;  %v724_v25 = vld [vmem:[%s15473_s5 + $0x18] sm:$0xff] }
 0x38f   : > { %v2526_v17 = vmax.f32 %v2494_v55, 0.0  ;;  %v2460_v18 = vmul.f32 %v13489_v1, %v2424_v58  ;;  %v2234_v33 = vmax.f32 %v2096_v60, 0.0  ;;  %v12388_v39 = vpack.c.bf16 %v724_v25, %v723_v36 }
 0x390   : > { %v2525_v20 = vmax.f32 %v2493_v4, 0.0  ;;  %v2459_v24 = vmul.f32 %v13489_v1, %v2423_v15  ;;  %v2233_v34 = vmax.f32 %v2091_v11, 0.0  ;;  %v11299_v51 = vpop.f32.mrb[70].mxu1 }
 0x391   : > { %v13523_v26 = vadd.f32 %v2526_v17, %v13093_v47  ;;  %v2496_v55 = vadd.f32 %v13498_v5, %v2460_v18  ;;  %v2426_v58 = vmul.f32 %v13465_v38, %v2234_v33  ;;  %v2106_v60 = vadd.f32 %v11299_v51, %v13478_v45  ;;  %v2100_v61 = vpop.f32.mrb[71].mxu1  ;;  %v13535_v18 = vpop.permute.xlu1 %2338 }
 0x392   : > { %v2495_v4 = vadd.f32 %v13498_v5, %v2459_v24  ;;  %v2425_v15 = vmul.f32 %v13467_v40, %v2233_v34  ;;  %v2101_v11 = vadd.f32 %v13478_v45, %v2100_v61  ;;  %v13532_v31 = vadd.f32 %v2525_v20, %v13096_v49  ;;  %15595 = vst [vmem:[#allocation22_spill] sm:$0xff] %v13535_v18  ;;  %v13542_v20 = vpop.permute.xlu0 %2333 }
 0x393   : > { %v2528_v41 = vmax.f32 %v2496_v55, 0.0  ;;  %v2462_v17 = vmul.f32 %v13489_v1, %v2426_v58  ;;  %v2236_v47 = vmax.f32 %v2106_v60, 0.0  ;;  %15596 = vst [vmem:[#allocation23_spill] sm:$0xff] %v13542_v20 }
 0x394   : > { %v2527_v33 = vmax.f32 %v2495_v4, 0.0  ;;  %v2461_v51 = vmul.f32 %v13489_v1, %v2425_v15  ;;  %v2235_v38 = vmax.f32 %v2101_v11, 0.0  ;;  %v11302_v29 = vpop.f32.mrb[72].mxu1  ;;  %11344 = vmatprep.mubr.msk.f32.mxu0 %vm399_vm0, %v13532_v31  ;;  %v12392_v34 = vpack.c.bf16 %v13523_v26, %v13532_v31 }
 0x395   : > { %v2498_v24 = vadd.f32 %v13498_v5, %v2462_v17  ;;  %v2428_v55 = vmul.f32 %v13469_v43, %v2236_v47  ;;  %v2116_v36 = vadd.f32 %v11302_v29, %v13478_v45  ;;  %v2110_v25 = vpop.f32.mrb[73].mxu1  ;;  %11345 = vmatmul.mubr.msk.f32.vlgmr.msra.gmra.mrb[32].mxu0 %vm399_vm0, %v13523_v26  ;;  %v13550_v58 = vadd.f32 %v2528_v41, %v13101_v52 }
 0x396   : > { %v2497_v60 = vadd.f32 %v13498_v5, %v2461_v51  ;;  %v2427_v61 = vmul.f32 %v13471_v46, %v2235_v38  ;;  %v2111_v4 = vadd.f32 %v13478_v45, %v2110_v25  ;;  %12393 = vmatprep.subr.bf16.mxu1 %v12392_v34  ;;  %v13556_v15 = vadd.f32 %v2527_v33, %v13104_v54 }
 0x397   : > { %v2530_v47 = vmax.f32 %v2498_v24, 0.0  ;;  %v2464_v29 = vmul.f32 %v13489_v1, %v2428_v55  ;;  %v2238_v11 = vmax.f32 %v2116_v36, 0.0  ;;  %12395 = vmatpush3.bf16.msra.mxu1 %v12392_v34  ;;  %12387 = vmatpush3.bf16.msra.mxu0 %v13454_v27  ;;  %v13573_v36 = vpop.permute.xlu1 %2348 }
 0x398   : > { %v2529_v17 = vmax.f32 %v2497_v60, 0.0  ;;  %v2463_v41 = vmul.f32 %v13489_v1, %v2427_v61  ;;  %v2237_v43 = vmax.f32 %v2111_v4, 0.0  ;;  %v11305_v51 = vpop.f32.mrb[74].mxu1  ;;  %11347 = vmatprep.mubr.msk.f32.mxu0 %vm399_vm0, %v13556_v15  ;;  %v12396_v38 = vpack.c.bf16 %v13550_v58, %v13556_v15  ;;  %12389 = vmatprep.subr.bf16.mxu0 %v12388_v39  ;;  %15598 = vst [vmem:[#allocation25_spill] sm:$0xff] %v13573_v36 }
 0x399   : > { %v2500_v33 = vadd.f32 %v13498_v5, %v2464_v29  ;;  %v2430_v24 = vmul.f32 %v13473_v48, %v2238_v11  ;;  %v2126_v34 = vadd.f32 %v11305_v51, %v13478_v45  ;;  %v2120_v27 = vpop.f32.mrb[75].mxu1  ;;  %11348 = vmatmul.mubr.msk.f32.gmra.mrb[34].mxu0 %vm399_vm0, %v13550_v58  ;;  %v13571_v55 = vadd.f32 %v2530_v47, %v13109_v57  ;;  %v13581_v29 = vpop.permute.xlu0 %2343  ;;  %v3241_v48 = vld [vmem:[%s13071_s16 + $0x8] sm:$0xff] }
 0x39a   : > { %v2499_v25 = vadd.f32 %v13498_v5, %v2463_v41  ;;  %v2429_v60 = vmul.f32 %v13480_v50, %v2237_v43  ;;  %v2121_v61 = vadd.f32 %v13478_v45, %v2120_v27  ;;  %12397 = vmatprep.subr.bf16.mxu1 %v12396_v38  ;;  %v13579_v4 = vadd.f32 %v2529_v17, %v13112_v59  ;;  %v3242_v27 = vld [vmem:[%s13071_s16 + $0x10] sm:$0xff] }
 0x39b   : > { %15597 = vst [vmem:[#allocation24_spill] sm:$0xff] %v13571_v55  ;;  %15600 = vst [vmem:[#allocation27_spill] sm:$0xff] %v13581_v29  ;;  %v2532_v11 = vmax.f32 %v2500_v33, 0.0  ;;  %v2466_v51 = vmul.f32 %v13489_v1, %v2430_v24  ;;  %v2240_v47 = vmax.f32 %v2126_v34, 0.0  ;;  %12399 = vmatpush3.bf16.msra.mxu1 %v12396_v38  ;;  %12391 = vmatpush3.bf16.msra.mxu0 %v12388_v39 }
 0x39c   : > { %15599 = vst [vmem:[#allocation26_spill] sm:$0xff] %v13579_v4  ;;  %v2531_v46 = vmax.f32 %v2499_v25, 0.0  ;;  %v2465_v41 = vmul.f32 %v13489_v1, %v2429_v60  ;;  %v2239_v43 = vmax.f32 %v2121_v61, 0.0  ;;  %v11308_v50 = vpop.f32.mrb[76].mxu1  ;;  %11350 = vmatprep.mubr.msk.f32.mxu0 %vm399_vm0, %v13579_v4  ;;  %v12400_v17 = vpack.c.bf16 %v13571_v55, %v13579_v4 }
 0x39d   : > { %v2502_v33 = vadd.f32 %v13498_v5, %v2466_v51  ;;  %v2432_v24 = vmul.f32 %v13484_v62, %v2240_v47  ;;  %v2136_v38 = vadd.f32 %v11308_v50, %v13478_v45  ;;  %v2130_v39 = vpop.f32.mrb[77].mxu1  ;;  %11351 = vmatmul.mubr.msk.f32.gmra.mrb[36].mxu0 %vm399_vm0, %v13571_v55  ;;  %v13597_v34 = vadd.f32 %v2532_v11, %v13119_v0  ;;  %v3243_v11 = vld [vmem:[%s13071_s16 + $0x18] sm:$0xff]  ;;  %v13609_v62 = vpop.permute.xlu1 %2358 }
 0x39e   : > { %v2501_v25 = vadd.f32 %v13498_v5, %v2465_v41  ;;  %v2431_v60 = vmul.f32 %v13491_v8, %v2239_v43  ;;  %v2131_v61 = vadd.f32 %v13478_v45, %v2130_v39  ;;  %11457 = vmatmul.mubr.msk.f32.vlgmr.msra.gmra.mrb[96].mxu1 %vm399_vm0, %v3241_v48  ;;  %12401 = vmatprep.subr.bf16.mxu1 %v12400_v17  ;;  %v3244_v48 = vld [vmem:[%s13071_s16 + $0x20] sm:$0xff]  ;;  %v13613_v55 = vpop.permute.xlu0 %2353 }
 0x39f   : > { %v2468_v51 = vmul.f32 %v13489_v1, %v2432_v24  ;;  %v2242_v50 = vmax.f32 %v2136_v38, 0.0  ;;  %12403 = vmatpush3.bf16.msra.mxu1 %v12400_v17  ;;  %v13605_v47 = vadd.f32 %v2531_v46, %v13122_v2  ;;  %11459 = vmatprep.mubr.msk.f32.mxu1 %vm399_vm0, %v3242_v27  ;;  %15602 = vst [vmem:[#allocation29_spill] sm:$0xff] %v13609_v62  ;;  %v2534_v41 = vmax.f32 %v2502_v33, 0.0 }
 0x3a0   : > { %v2533_v43 = vmax.f32 %v2501_v25, 0.0  ;;  %v2467_v8 = vmul.f32 %v13489_v1, %v2431_v60  ;;  %v2241_v39 = vmax.f32 %v2131_v61, 0.0  ;;  %v11311_v4 = vpop.f32.mrb[78].mxu1  ;;  %15603 = vst [vmem:[#allocation30_spill] sm:$0xff] %v13613_v55 }
 0x3a1   : > { %15601 = vst [vmem:[#allocation28_spill] sm:$0xff] %v13605_v47  ;;  %v2504_v24 = vadd.f32 %v13498_v5, %v2468_v51  ;;  %v2434_v17 = vmul.f32 %v13507_v6, %v2242_v50  ;;  %v2146_v46 = vadd.f32 %v11311_v4, %v13478_v45  ;;  %11353 = vmatprep.mubr.msk.f32.mxu0 %vm399_vm0, %v13605_v47  ;;  %v2140_v27 = vpop.f32.mrb[79].mxu1 }
 0x3a2   : > { %v12404_v33 = vpack.c.bf16 %v13597_v34, %v13605_v47  ;;  %v2503_v38 = vadd.f32 %v13498_v5, %v2467_v8  ;;  %v2433_v25 = vmul.f32 %v13512_v13, %v2241_v39  ;;  %v2141_v60 = vadd.f32 %v13478_v45, %v2140_v27  ;;  %11354 = vmatmul.mubr.msk.f32.gmra.mrb[38].mxu0 %vm399_vm0, %v13597_v34 }
 0x3a3   : > { %11460 = vmatmul.mubr.msk.f32.gmra.mrb[98].mxu1 %vm399_vm0, %v3243_v11  ;;  %v2536_v4 = vmax.f32 %v2504_v24, 0.0  ;;  %v2470_v61 = vmul.f32 %v13489_v1, %v2434_v17  ;;  %v2244_v51 = vmax.f32 %v2146_v46, 0.0  ;;  %v13630_v50 = vadd.f32 %v2533_v43, %v13134_v9  ;;  %v3245_v11 = vld [vmem:[%s13071_s16 + $0x28] sm:$0xff] }
 0x3a4   : > { %12405 = vmatprep.subr.bf16.mxu1 %v12404_v33  ;;  %11470 = vmatprep.mubr.msk.f32.mxu1 %vm399_vm0, %v3244_v48  ;;  %v2535_v8 = vmax.f32 %v2503_v38, 0.0  ;;  %v2469_v39 = vmul.f32 %v13489_v1, %v2433_v25  ;;  %v2243_v27 = vmax.f32 %v2141_v60, 0.0  ;;  %v11314_v13 = vpop.f32.mrb[80].mxu1  ;;  %v13635_v6 = vadd.f32 %v2534_v41, %v13131_v7  ;;  %v3246_v38 = vld [vmem:[%s13071_s16 + $0x30] sm:$0xff] }
 0x3a5   : > { %15604 = vst [vmem:[#allocation31_spill] sm:$0xff] %v13630_v50  ;;  %12407 = vmatpush3.bf16.msra.mxu1 %v12404_v33  ;;  %v2506_v24 = vadd.f32 %v13498_v5, %v2470_v61  ;;  %v2436_v17 = vmul.f32 %v13535_v18, %v2244_v51  ;;  %v2156_v46 = vadd.f32 %v11314_v13, %v13478_v45  ;;  %v2150_v43 = vpop.f32.mrb[81].mxu1  ;;  %v13647_v33 = vpop.permute.xlu1 %2368 }
 0x3a6   : > { %15605 = vst [vmem:[#allocation32_spill] sm:$0xff] %v13635_v6  ;;  %11356 = vmatprep.mubr.msk.f32.mxu0 %vm399_vm0, %v13630_v50  ;;  %v13644_v48 = vadd.f32 %v2536_v4, %v13143_v14  ;;  %15606 = vst [vmem:[#allocation33_spill] sm:$0xff] %v13647_v33  ;;  %v2505_v41 = vadd.f32 %v13498_v5, %v2469_v39  ;;  %v2435_v25 = vmul.f32 %v13542_v20, %v2243_v27  ;;  %v13656_v61 = vpop.permute.xlu0 %2363 }
 0x3a7   : > { %v2151_v60 = vadd.f32 %v13478_v45, %v2150_v43  ;;  %11357 = vmatmul.mubr.msk.f32.gmra.mrb[40].mxu0 %vm399_vm0, %v13635_v6  ;;  %v12408_v13 = vpack.c.bf16 %v13635_v6, %v13630_v50  ;;  %15607 = vst [vmem:[#allocation34_spill] sm:$0xff] %v13656_v61  ;;  %v2472_v4 = vmul.f32 %v13489_v1, %v2436_v17  ;;  %v2246_v51 = vmax.f32 %v2156_v46, 0.0  ;;  %v3247_v50 = vld [vmem:[%s13071_s16 + $0x38] sm:$0xff] }
 0x3a8   : > { %11471 = vmatmul.mubr.msk.f32.vlgmr.msra.gmra.mrb[100].mxu1 %vm399_vm0, %v3245_v11  ;;  %v13661_v39 = vadd.f32 %v2535_v8, %v13146_v16  ;;  %v2538_v27 = vmax.f32 %v2506_v24, 0.0  ;;  %v2537_v20 = vmax.f32 %v2505_v41, 0.0  ;;  %v2471_v43 = vmul.f32 %v13489_v1, %v2435_v25  ;;  %v11317_v47 = vpop.f32.mrb[82].mxu1  ;;  %v3248_v24 = vld [vmem:[%s13071_s16 + $0x40] sm:$0xff] }
 0x3a9   : > { %v2245_v18 = vmax.f32 %v2151_v60, 0.0  ;;  %12409 = vmatprep.subr.bf16.mxu1 %v12408_v13  ;;  %11473 = vmatprep.mubr.msk.f32.mxu1 %vm399_vm0, %v3246_v38  ;;  %v2508_v6 = vadd.f32 %v13498_v5, %v2472_v4  ;;  %v2438_v17 = vmul.f32 %v13573_v36, %v2246_v51  ;;  %v2166_v11 = vadd.f32 %v11317_v47, %v13478_v45  ;;  %v2160_v8 = vpop.f32.mrb[83].mxu1  ;;  %v13684_v51 = vpop.permute.xlu1 %2378 }
 0x3aa   : > { %12411 = vmatpush3.bf16.msra.mxu1 %v12408_v13  ;;  %11359 = vmatprep.mubr.msk.f32.mxu0 %vm399_vm0, %v13661_v39  ;;  %v2507_v46 = vadd.f32 %v13498_v5, %v2471_v43  ;;  %v2161_v25 = vadd.f32 %v13478_v45, %v2160_v8  ;;  %v12412_v38 = vpack.c.bf16 %v13644_v48, %v13661_v39 }
 0x3ab   : > { %v2437_v41 = vmul.f32 %v13581_v29, %v2245_v18  ;;  %11360 = vmatmul.mubr.msk.f32.gmra.mrb[42].mxu0 %vm399_vm0, %v13644_v48  ;;  %v2540_v60 = vmax.f32 %v2508_v6, 0.0  ;;  %v2474_v47 = vmul.f32 %v13489_v1, %v2438_v17  ;;  %v2248_v13 = vmax.f32 %v2166_v11, 0.0  ;;  %15609 = vst [vmem:[#allocation36_spill] sm:$0xff] %v13684_v51  ;;  %v13691_v6 = vpop.permute.xlu0 %2373 }
 0x3ac   : > { %11474 = vmatmul.mubr.msk.f32.gmra.mrb[102].mxu1 %vm399_vm0, %v3247_v50  ;;  %v13682_v4 = vadd.f32 %v2537_v20, %v13158_v23  ;;  %v2539_v18 = vmax.f32 %v2507_v46, 0.0  ;;  %v2247_v8 = vmax.f32 %v2161_v25, 0.0  ;;  %12413 = vmatprep.subr.bf16.mxu1 %v12412_v38  ;;  %v11320_v29 = vpop.f32.mrb[84].mxu1  ;;  %v13688_v36 = vadd.f32 %v2538_v27, %v13155_v21  ;;  %15611 = vst [vmem:[#allocation38_spill] sm:$0xff] %v13691_v6  ;;  %v3249_v46 = vld [vmem:[%s13071_s16 + $0x48] sm:$0xff] }
 0x3ad   : > { %v2473_v43 = vmul.f32 %v13489_v1, %v2437_v41  ;;  %11484 = vmatprep.mubr.msk.f32.mxu1 %vm399_vm0, %v3248_v24  ;;  %v2510_v20 = vadd.f32 %v13498_v5, %v2474_v47  ;;  %v2440_v50 = vmul.f32 %v13609_v62, %v2248_v13  ;;  %v2176_v17 = vadd.f32 %v11320_v29, %v13478_v45  ;;  %v2170_v11 = vpop.f32.mrb[85].mxu1  ;;  %v3250_v13 = vld [vmem:[%s13071_s16 + $0x50] sm:$0xff] }
 0x3ae   : > { %15608 = vst [vmem:[#allocation35_spill] sm:$0xff] %v13682_v4  ;;  %15610 = vst [vmem:[#allocation37_spill] sm:$0xff] %v13688_v36  ;;  %12415 = vmatpush3.bf16.msra.mxu1 %v12412_v38  ;;  %11362 = vmatprep.mubr.msk.f32.mxu0 %vm399_vm0, %v13682_v4  ;;  %v2439_v41 = vmul.f32 %v13613_v55, %v2247_v8  ;;  %v2171_v24 = vadd.f32 %v13478_v45, %v2170_v11 }
 0x3af   : > { %v2509_v27 = vadd.f32 %v13498_v5, %v2473_v43  ;;  %11363 = vmatmul.mubr.msk.f32.gmra.mrb[44].mxu0 %vm399_vm0, %v13688_v36  ;;  %v12416_v25 = vpack.c.bf16 %v13688_v36, %v13682_v4  ;;  %v2476_v38 = vmul.f32 %v13489_v1, %v2440_v50  ;;  %v2250_v29 = vmax.f32 %v2176_v17, 0.0 }
 0x3b0   : > { %v13708_v47 = vadd.f32 %v2539_v18, %v13170_v30  ;;  %v2475_v43 = vmul.f32 %v13489_v1, %v2439_v41  ;;  %v2249_v8 = vmax.f32 %v2171_v24, 0.0  ;;  %v11323_v11 = vpop.f32.mrb[86].mxu1  ;;  %v13714_v55 = vadd.f32 %v2540_v60, %v13167_v28  ;;  %v3251_v41 = vld [vmem:[%s13071_s16 + $0x58] sm:$0xff] }
 0x3b1   : > { %v2541_v62 = vmax.f32 %v2509_v27, 0.0  ;;  %11485 = vmatmul.mubr.msk.f32.vlgmr.msra.gmra.mrb[104].mxu1 %vm399_vm0, %v3249_v46  ;;  %12417 = vmatprep.subr.bf16.mxu1 %v12416_v25  ;;  %v2542_v4 = vmax.f32 %v2510_v20, 0.0  ;;  %v13717_v50 = vadd.f32 %v13498_v5, %v2476_v38  ;;  %v2442_v18 = vmul.f32 %v13647_v33, %v2250_v29  ;;  %v2180_v27 = vpop.f32.mrb[87].mxu1  ;;  %v13724_v46 = vpop.permute.xlu1 %2388 }
 0x3b2   : > { %15612 = vst [vmem:[#allocation39_spill] sm:$0xff] %v13708_v47  ;;  %15613 = vst [vmem:[#allocation40_spill] sm:$0xff] %v13714_v55  ;;  %12419 = vmatpush3.bf16.msra.mxu1 %v12416_v25  ;;  %v2186_v17 = vadd.f32 %v11323_v11, %v13478_v45  ;;  %11365 = vmatprep.mubr.msk.f32.mxu0 %vm399_vm0, %v13708_v47  ;;  %v2511_v60 = vadd.f32 %v13498_v5, %v2475_v43  ;;  %v13732_v25 = vpop.permute.xlu0 %2383 }
 0x3b3   : > { %15614 = vst [vmem:[#allocation41_spill] sm:$0xff] %v13724_v46  ;;  %v2441_v20 = vmul.f32 %v13656_v61, %v2249_v8  ;;  %v2181_v24 = vadd.f32 %v13478_v45, %v2180_v27  ;;  %11366 = vmatmul.mubr.msk.f32.gmra.mrb[46].mxu0 %vm399_vm0, %v13714_v55  ;;  %11487 = vmatprep.mubr.msk.f32.mxu1 %vm399_vm0, %v3250_v13  ;;  %15615 = vst [vmem:[#allocation42_spill] sm:$0xff] %v13732_v25  ;;  %v3252_v13 = vld [vmem:[%s13071_s16 + $0x60] sm:$0xff] }
 0x3b4   : > { %v2478_v38 = vmul.f32 %v13489_v1, %v2442_v18  ;;  %v2252_v29 = vmax.f32 %v2186_v17, 0.0  ;;  %v12420_v11 = vpack.c.bf16 %v13714_v55, %v13708_v47  ;;  %v2543_v33 = vmax.f32 %v2511_v60, 0.0  ;;  %v11326_v8 = vpop.f32.mrb[88].mxu1  ;;  %v3256_v55 = vld [vmem:[%s13071_s16 + $0x80] sm:$0xff] }
 0x3b5   : > { %v2477_v43 = vmul.f32 %v13489_v1, %v2441_v20  ;;  %v2251_v36 = vmax.f32 %v2181_v24, 0.0  ;;  %11488 = vmatmul.mubr.msk.f32.gmra.mrb[106].mxu1 %vm399_vm0, %v3251_v41  ;;  %v13740_v27 = vadd.f32 %v2541_v62, %v13182_v37  ;;  %v2196_v18 = vadd.f32 %v11326_v8, %v13478_v45  ;;  %v2190_v17 = vpop.f32.mrb[89].mxu1  ;;  %v3253_v24 = vld [vmem:[%s13071_s16 + $0x68] sm:$0xff] }
 0x3b6   : > { %v2444_v61 = vmul.f32 %v13684_v51, %v2252_v29  ;;  %12421 = vmatprep.subr.bf16.mxu1 %v12420_v11  ;;  %v13746_v47 = vadd.f32 %v2542_v4, %v13179_v35  ;;  %v2544_v60 = vmax.f32 %v13717_v50, 0.0  ;;  %v2191_v62 = vadd.f32 %v13478_v45, %v2190_v17  ;;  %11498 = vmatprep.mubr.msk.f32.mxu1 %vm399_vm0, %v3252_v13  ;;  %v13762_v50 = vpop.permute.xlu1 %2398 }
 0x3b7   : > { %15616 = vst [vmem:[#allocation43_spill] sm:$0xff] %v13740_v27  ;;  %v2513_v20 = vadd.f32 %v13498_v5, %v2477_v43  ;;  %v2443_v41 = vmul.f32 %v13691_v6, %v2251_v36  ;;  %12423 = vmatpush3.bf16.msra.mxu1 %v12420_v11  ;;  %11368 = vmatprep.mubr.msk.f32.mxu0 %vm399_vm0, %v13740_v27  ;;  %v2254_v4 = vmax.f32 %v2196_v18, 0.0  ;;  %15618 = vst [vmem:[#allocation45_spill] sm:$0xff] %v13762_v50  ;;  %v13769_v18 = vpop.permute.xlu0 %2393 }
 0x3b8   : > { %15617 = vst [vmem:[#allocation44_spill] sm:$0xff] %v13746_v47  ;;  %v2514_v29 = vadd.f32 %v13498_v5, %v2478_v38  ;;  %v2480_v8 = vmul.f32 %v13489_v1, %v2444_v61  ;;  %11369 = vmatmul.mubr.msk.f32.gmra.mrb[48].mxu0 %vm399_vm0, %v13746_v47  ;;  %v12424_v36 = vpack.c.bf16 %v13746_v47, %v13740_v27  ;;  %v2253_v17 = vmax.f32 %v2191_v62, 0.0  ;;  %v11329_v6 = vpop.f32.mrb[90].mxu1  ;;  %v3254_v61 = vld [vmem:[%s13071_s16 + $0x70] sm:$0xff] }
 0x3b9   : > { %v2545_v11 = vmax.f32 %v2513_v20, 0.0  ;;  %v2479_v43 = vmul.f32 %v13489_v1, %v2443_v41  ;;  %v13766_v38 = vadd.f32 %v2543_v33, %v13194_v44  ;;  %15619 = vst [vmem:[#allocation46_spill] sm:$0xff] %v13769_v18  ;;  %v2446_v13 = vmul.f32 %v13724_v46, %v2254_v4  ;;  %v2200_v27 = vpop.f32.mrb[91].mxu1 }
 0x3ba   : > { %v2516_v51 = vadd.f32 %v13498_v5, %v2480_v8  ;;  %11499 = vmatmul.mubr.msk.f32.vlgmr.msra.gmra.mrb[108].mxu1 %vm399_vm0, %v3253_v24  ;;  %12425 = vmatprep.subr.bf16.mxu1 %v12424_v36  ;;  %v2206_v20 = vadd.f32 %v11329_v6, %v13478_v45  ;;  %v2445_v62 = vmul.f32 %v13732_v25, %v2253_v17  ;;  %v3255_v8 = vld [vmem:[%s13071_s16 + $0x78] sm:$0xff]  ;;  %v2546_v47 = vmax.f32 %v2514_v29, 0.0 }
 0x3bb   : > { %v2515_v41 = vadd.f32 %v13498_v5, %v2479_v43  ;;  %12427 = vmatpush3.bf16.msra.mxu1 %v12424_v36  ;;  %11371 = vmatprep.mubr.msk.f32.mxu0 %vm399_vm0, %v13766_v38  ;;  %v2201_v33 = vadd.f32 %v13478_v45, %v2200_v27  ;;  %v2482_v4 = vmul.f32 %v13489_v1, %v2446_v13 }
 0x3bc   : > { %v2256_v24 = vmax.f32 %v2206_v20, 0.0  ;;  %v13783_v46 = vadd.f32 %v2544_v60, %v13191_v42  ;;  %11501 = vmatprep.mubr.msk.f32.mxu1 %vm399_vm0, %v3254_v61  ;;  %v2481_v43 = vmul.f32 %v13489_v1, %v2445_v62  ;;  %v11332_v36 = vpop.f32.mrb[92].mxu1  ;;  %v13788_v25 = vadd.f32 %v2545_v11, %v13206_v56  ;;  %v13798_v20 = vpop.permute.xlu1 %2408 }
 0x3bd   : > { %v2547_v6 = vmax.f32 %v2515_v41, 0.0  ;;  %v2255_v17 = vmax.f32 %v2201_v33, 0.0  ;;  %v2548_v27 = vmax.f32 %v2516_v51, 0.0  ;;  %v2518_v29 = vadd.f32 %v13498_v5, %v2482_v4  ;;  %v2210_v61 = vpop.f32.mrb[93].mxu1  ;;  %15621 = vst [vmem:[#allocation48_spill] sm:$0xff] %v13798_v20  ;;  %v13806_v33 = vpop.permute.xlu0 %2403 }
 0x3be   : > { %15620 = vst [vmem:[#allocation47_spill] sm:$0xff] %v13788_v25  ;;  %v2448_v13 = vmul.f32 %v13762_v50, %v2256_v24  ;;  %11372 = vmatmul.mubr.msk.f32.gmra.mrb[50].mxu0 %vm399_vm0, %v13783_v46  ;;  %11502 = vmatmul.mubr.msk.f32.gmra.mrb[110].mxu1 %vm399_vm0, %v3255_v8  ;;  %v12428_v60 = vpack.c.bf16 %v13783_v46, %v13766_v38  ;;  %15622 = vst [vmem:[#allocation49_spill] sm:$0xff] %v13806_v33  ;;  %v3257_v50 = vld [vmem:[%s13071_s16 + $0x88] sm:$0xff] }
 0x3bf   : > { %v2517_v11 = vadd.f32 %v13498_v5, %v2481_v43  ;;  %v2447_v41 = vmul.f32 %v13769_v18, %v2255_v17  ;;  %v2216_v51 = vadd.f32 %v11332_v36, %v13478_v45  ;;  %11374 = vmatprep.mubr.msk.f32.mxu0 %vm399_vm0, %v13788_v25  ;;  %v2211_v62 = vadd.f32 %v13478_v45, %v2210_v61 }
 0x3c0   : > { %v2550_v8 = vmax.f32 %v2518_v29, 0.0  ;;  %v2484_v4 = vmul.f32 %v13489_v1, %v2448_v13  ;;  %12429 = vmatprep.subr.bf16.mxu1 %v12428_v60  ;;  %v13810_v24 = vadd.f32 %v2546_v47, %v13203_v53  ;;  %11512 = vmatprep.mubr.msk.f32.mxu1 %vm399_vm0, %v3256_v55  ;;  %v13814_v43 = vadd.f32 %v2547_v6, %v13218_v3  ;;  %v11335_v29 = vpop.f32.mrb[94].mxu1 }
 0x3c1   : > { %v2549_v17 = vmax.f32 %v2517_v11, 0.0  ;;  %v2483_v36 = vmul.f32 %v13489_v1, %v2447_v41  ;;  %12431 = vmatpush3.bf16.msra.mxu1 %v12428_v60  ;;  %v2258_v61 = vmax.f32 %v2216_v51, 0.0  ;;  %v2257_v18 = vmax.f32 %v2211_v62, 0.0  ;;  %v2220_v6 = vpop.f32.mrb[95].mxu1  ;;  %v3258_v41 = vld [vmem:[%s13071_s16 + $0x90] sm:$0xff] }
 0x3c2   : > { %v2520_v13 = vadd.f32 %v13498_v5, %v2484_v4  ;;  %11375 = vmatmul.mubr.msk.f32.gmra.mrb[52].mxu0 %vm399_vm0, %v13810_v24  ;;  %v12432_v47 = vpack.c.bf16 %v13810_v24, %v13788_v25  ;;  %v2226_v55 = vadd.f32 %v11335_v29, %v13478_v45  ;;  %v13825_v11 = vadd.f32 %v2548_v27, %v13215_v63 }
 0x3c3   : > { %v2519_v60 = vadd.f32 %v13498_v5, %v2483_v36  ;;  %v2450_v51 = vmul.f32 %v13798_v20, %v2258_v61  ;;  %v2449_v62 = vmul.f32 %v13806_v33, %v2257_v18  ;;  %11377 = vmatprep.mubr.msk.f32.mxu0 %vm399_vm0, %v13814_v43  ;;  %v2221_v4 = vadd.f32 %v13478_v45, %v2220_v6  ;;  %v13840_v61 = vpop.permute.xlu1 %2418  ;;  %v3260_v6 = vld [vmem:[%s13071_s16 + $0xa0] sm:$0xff] }
 0x3c4   : > { %v2552_v25 = vmax.f32 %v2520_v13, 0.0  ;;  %11513 = vmatmul.mubr.msk.f32.vlgmr.msra.gmra.mrb[112].mxu1 %vm399_vm0, %v3257_v50  ;;  %12433 = vmatprep.subr.bf16.mxu1 %v12432_v47  ;;  %v2260_v29 = vmax.f32 %v2226_v55, 0.0  ;;  %v12436_v27 = vpack.c.bf16 %v13825_v11, %v13814_v43  ;;  %v13838_v36 = vadd.f32 %v2549_v17, %v13230_v12  ;;  %v3259_v50 = vld [vmem:[%s13071_s16 + $0x98] sm:$0xff]  ;;  %v13846_v13 = vpop.permute.xlu0 %2413 }
 0x3c5   : > { %v2551_v18 = vmax.f32 %v2519_v60, 0.0  ;;  %v2486_v33 = vmul.f32 %v13489_v1, %v2450_v51  ;;  %v2485_v20 = vmul.f32 %v13489_v1, %v2449_v62  ;;  %12435 = vmatpush3.bf16.msra.mxu1 %v12432_v47  ;;  %v2259_v45 = vmax.f32 %v2221_v4, 0.0  ;;  %11515 = vmatprep.mubr.msk.f32.mxu1 %vm399_vm0, %v3258_v41 }
 0x3c6   : > { %v2452_v55 = vmul.f32 %v13840_v61, %v2260_v29  ;;  %11378 = vmatmul.mubr.msk.f32.gmra.mrb[54].mxu0 %vm399_vm0, %v13825_v11  ;;  %12437 = vmatprep.subr.bf16.mxu1 %v12436_v27  ;;  %v13852_v17 = vadd.f32 %v2550_v8, %v13227_v10  ;;  %v13856_v60 = vadd.f32 %v2552_v25, %v13239_v19  ;;  %v3261_v29 = vld [vmem:[%s13071_s16 + $0xa8] sm:$0xff] }
 0x3c7   : > { %v2522_v47 = vadd.f32 %v13498_v5, %v2486_v33  ;;  %v2521_v41 = vadd.f32 %v13498_v5, %v2485_v20  ;;  %v2451_v51 = vmul.f32 %v13846_v13, %v2259_v45  ;;  %11380 = vmatprep.mubr.msk.f32.mxu0 %vm399_vm0, %v13838_v36  ;;  %v13864_v62 = vadd.f32 %v2551_v18, %v13242_v22  ;;  %v3262_v18 = vld [vmem:[%s13071_s16 + $0xb0] sm:$0xff] }
 0x3c8   : > { %v2488_v8 = vmul.f32 %v13489_v1, %v2452_v55  ;;  %11516 = vmatmul.mubr.msk.f32.gmra.mrb[114].mxu1 %vm399_vm0, %v3259_v50  ;;  %v12440_v25 = vpack.c.bf16 %v13852_v17, %v13838_v36 }
 0x3c9   : > { %v2554_v4 = vmax.f32 %v2522_v47, 0.0  ;;  %v2553_v33 = vmax.f32 %v2521_v41, 0.0  ;;  %v2487_v20 = vmul.f32 %v13489_v1, %v2451_v51  ;;  %12439 = vmatpush3.bf16.msra.mxu1 %v12436_v27  ;;  %11526 = vmatprep.mubr.msk.f32.mxu1 %vm399_vm0, %v3260_v6  ;;  %v12444_v50 = vpack.c.bf16 %v13856_v60, %v13864_v62  ;;  %v15623_v27 = vld [vmem:[#allocation6_spill] sm:$0xff] }
 0x3ca   : > { %v2524_v45 = vadd.f32 %v13498_v5, %v2488_v8  ;;  %11381 = vmatmul.mubr.msk.f32.gmra.mrb[56].mxu0 %vm399_vm0, %v13852_v17  ;;  %12441 = vmatprep.subr.bf16.mxu1 %v12440_v25  ;;  %v3263_v51 = vld [vmem:[%s13071_s16 + $0xb8] sm:$0xff] }
 0x3cb   : > { %v2523_v55 = vadd.f32 %v13498_v5, %v2487_v20  ;;  %11383 = vmatprep.mubr.msk.f32.mxu0 %vm399_vm0, %v13864_v62  ;;  %v13883_v1 = vadd.f32 %v2553_v33, %v13254_v32  ;;  %v13886_v6 = vadd.f32 %v2554_v4, %v15623_v27  ;;  %v3264_v5 = vld [vmem:[%s13071_s16 + $0xc0] sm:$0xff]  ;;  %v15625_v20 = vld [vmem:[#allocation8_spill] sm:$0xff] }
 0x3cc   : > { %v2556_v47 = vmax.f32 %v2524_v45, 0.0  ;;  %11527 = vmatmul.mubr.msk.f32.vlgmr.msra.gmra.mrb[116].mxu1 %vm399_vm0, %v3261_v29  ;;  %v15624_v4 = vld [vmem:[#allocation7_spill] sm:$0xff]  ;;  %v3265_v29 = vld [vmem:[%s13071_s16 + $0xc8] sm:$0xff]  ;;  %v3266_v45 = vld [vmem:[%s13071_s16 + $0xd0] sm:$0xff] }
 0x3cd   : > { %v2555_v41 = vmax.f32 %v2523_v55, 0.0  ;;  %12443 = vmatpush3.bf16.msra.mxu1 %v12440_v25  ;;  %11529 = vmatprep.mubr.msk.f32.mxu1 %vm399_vm0, %v3262_v18  ;;  %v12448_v8 = vpack.c.bf16 %v13886_v6, %v13883_v1  ;;  %v9890_v55 = vld [vmem:[%s15471_s3 + $0x60] sm:$0xff] }
 0x3ce   : > { %11384 = vmatmul.mubr.msk.f32.gmra.mrb[58].mxu0 %vm399_vm0, %v13856_v60  ;;  %12445 = vmatprep.subr.bf16.mxu1 %v12444_v50  ;;  %v13897_v33 = vadd.f32 %v2556_v47, %v15624_v4  ;;  %v3267_v47 = vld [vmem:[%s13071_s16 + $0xd8] sm:$0xff] }
 0x3cf   : > { %11386 = vmatprep.mubr.msk.f32.mxu0 %vm399_vm0, %v13883_v1  ;;  %v13902_v25 = vadd.f32 %v2555_v41, %v15625_v20  ;;  %v3268_v41 = vld [vmem:[%s13071_s16 + $0xe0] sm:$0xff] }
 0x3d0   : > { %11530 = vmatmul.mubr.msk.f32.gmra.mrb[118].mxu1 %vm399_vm0, %v3263_v51 }
 0x3d1   : > { %12447 = vmatpush3.bf16.msra.mxu1 %v12444_v50  ;;  %11540 = vmatprep.mubr.msk.f32.mxu1 %vm399_vm0, %v3264_v5  ;;  %v12452_v18 = vpack.c.bf16 %v13897_v33, %v13902_v25  ;;  %v9891_v50 = vld [vmem:[%s15471_s3 + $0x68] sm:$0xff]  ;;  %v9892_v5 = vld [vmem:[%s15471_s3 + $0x70] sm:$0xff] }
 0x3d2   : > { %11387 = vmatmul.mubr.msk.f32.gmra.mrb[60].mxu0 %vm399_vm0, %v13886_v6  ;;  %12449 = vmatprep.subr.bf16.mxu1 %v12448_v8  ;;  %v12456_v51 = vpack.c.bf16 %v9891_v50, %v9890_v55  ;;  %v3270_v55 = vld [vmem:[%s13071_s16 + $0xf0] sm:$0xff]  ;;  %v3271_v50 = vld [vmem:[%s13071_s16 + $0xf8] sm:$0xff] }
 0x3d3   : > { %11389 = vmatprep.mubr.msk.f32.mxu0 %vm399_vm0, %v13902_v25 }
 0x3d4   : > { %11541 = vmatmul.mubr.msk.f32.vlgmr.msra.gmra.mrb[120].mxu1 %vm399_vm0, %v3265_v29  ;;  %v3269_v29 = vld [vmem:[%s13071_s16 + $0xe8] sm:$0xff] }
 0x3d5   : > { %12451 = vmatpush3.bf16.msra.mxu1 %v12448_v8  ;;  %11543 = vmatprep.mubr.msk.f32.mxu1 %vm399_vm0, %v3266_v45  ;;  %v9893_v8 = vld [vmem:[%s15471_s3 + $0x78] sm:$0xff]  ;;  %v15626_v45 = vld [vmem:[#allocation5_spill] sm:$0xff] }
 0x3d6   : > { %11390 = vmatmul.mubr.msk.f32.gmra.mrb[62].mxu0 %vm399_vm0, %v13897_v33  ;;  %12453 = vmatprep.subr.bf16.mxu1 %v12452_v18 }
 0x3d7   : > { %11400 = vmatprep.mubr.msk.f32.mxu0 %vm399_vm0, %v13096_v49  ;;  %v12460_v49 = vpack.c.bf16 %v9893_v8, %v9892_v5  ;;  %v9929_v8 = vld [vmem:[%s15471_s3 + $0x90] sm:$0xff] }
 0x3d8   : > { %11544 = vmatmul.mubr.msk.f32.gmra.mrb[122].mxu1 %vm399_vm0, %v3267_v47 }
 0x3d9   : > { %12455 = vmatpush3.bf16.msra.mxu1 %v12452_v18  ;;  %11554 = vmatprep.mubr.msk.f32.mxu1 %vm399_vm0, %v3268_v41 }
 0x3da   : > { %11401 = vmatmul.mubr.msk.f32.vlgmr.msra.gmra.mrb[32].mxu0 %vm399_vm0, %v15626_v45  ;;  %12457 = vmatprep.subr.bf16.mxu1 %v12456_v51 }
 0x3db   : > { %11403 = vmatprep.mubr.msk.f32.mxu0 %vm399_vm0, %v13104_v54  ;;  %v9928_v54 = vld [vmem:[%s15471_s3 + $0x88] sm:$0xff] }
 0x3dc   : > { %11555 = vmatmul.mubr.msk.f32.vlgmr.msra.gmra.mrb[124].mxu1 %vm399_vm0, %v3269_v29  ;;  %v9930_v29 = vld [vmem:[%s15471_s3 + $0x98] sm:$0xff] }
 0x3dd   : > { %11557 = vmatprep.mubr.msk.f32.mxu1 %vm399_vm0, %v3270_v55  ;;  %12459 = vmatpush3.bf16.msra.mxu1 %v12456_v51  ;;  %v12468_v45 = vpack.c.bf16 %v9930_v29, %v9929_v8  ;;  %v14051_v55 = vld [vmem:[%s15472_s4 + $0x5] ss:$0 sm:$0xff] }
 0x3de   : > { %11404 = vmatmul.mubr.msk.f32.gmra.mrb[34].mxu0 %vm399_vm0, %v13101_v52  ;;  %12461 = vmatprep.subr.bf16.mxu1 %v12460_v49  ;;  %v9927_v52 = vld [vmem:[%s15471_s3 + $0x80] sm:$0xff] }
 0x3df   : > { %11406 = vmatprep.mubr.msk.f32.mxu0 %vm399_vm0, %v13112_v59 }
 0x3e0   : > { %11558 = vmatmul.mubr.msk.f32.gmra.mrb[126].mxu1 %vm399_vm0, %v3271_v50 }
 0x3e1   : > { %12463 = vmatpush3.bf16.msra.mxu1 %v12460_v49 }
 0x3e2   : > { %11407 = vmatmul.mubr.msk.f32.gmra.mrb[36].mxu0 %vm399_vm0, %v13109_v57  ;;  %v12464_v57 = vpack.c.bf16 %v9928_v54, %v9927_v52 }
 0x3e3   : > { %11409 = vmatprep.mubr.msk.f32.mxu0 %vm399_vm0, %v13122_v2 }
 0x3e4   : > { %12465 = vmatprep.subr.bf16.mxu0 %v12464_v57 }
 0x3e5   : > { %12467 = vmatpush3.bf16.msra.mxu0 %v12464_v57 }
 0x3e6   : > { %11410 = vmatmul.mubr.msk.f32.gmra.mrb[38].mxu0 %vm399_vm0, %v13119_v0  ;;  %12469 = vmatprep.subr.bf16.mxu0 %v12468_v45 }
 0x3e7   : > { %11412 = vmatprep.mubr.msk.f32.mxu0 %vm399_vm0, %v13134_v9 }
 0x3e9   : > { %12471 = vmatpush3.bf16.msra.mxu0 %v12468_v45 }
 0x3ea   : > { %11413 = vmatmul.mubr.msk.f32.gmra.mrb[40].mxu0 %vm399_vm0, %v13131_v7 }
 0x3eb   : > { %11415 = vmatprep.mubr.msk.f32.mxu0 %vm399_vm0, %v13146_v16 }
 0x3ee   : > { %11416 = vmatmul.mubr.msk.f32.gmra.mrb[42].mxu0 %vm399_vm0, %v13143_v14 }
 0x3ef   : > { %11418 = vmatprep.mubr.msk.f32.mxu0 %vm399_vm0, %v13158_v23 }
 0x3f2   : > { %11419 = vmatmul.mubr.msk.f32.gmra.mrb[44].mxu0 %vm399_vm0, %v13155_v21 }
 0x3f3   : > { %11421 = vmatprep.mubr.msk.f32.mxu0 %vm399_vm0, %v13170_v30 }
 0x3f6   : > { %11422 = vmatmul.mubr.msk.f32.gmra.mrb[46].mxu0 %vm399_vm0, %v13167_v28 }
 0x3f7   : > { %11424 = vmatprep.mubr.msk.f32.mxu0 %vm399_vm0, %v13182_v37 }
 0x3fa   : > { %11425 = vmatmul.mubr.msk.f32.gmra.mrb[48].mxu0 %vm399_vm0, %v13179_v35 }
 0x3fb   : > { %11427 = vmatprep.mubr.msk.f32.mxu0 %vm399_vm0, %v13194_v44 }
 0x3fe   : > { %11428 = vmatmul.mubr.msk.f32.gmra.mrb[50].mxu0 %vm399_vm0, %v13191_v42 }
 0x3ff   : > { %11430 = vmatprep.mubr.msk.f32.mxu0 %vm399_vm0, %v13206_v56 }
 0x402   : > { %11431 = vmatmul.mubr.msk.f32.gmra.mrb[52].mxu0 %vm399_vm0, %v13203_v53 }
 0x403   : > { %11433 = vmatprep.mubr.msk.f32.mxu0 %vm399_vm0, %v13218_v3 }
 0x406   : > { %11434 = vmatmul.mubr.msk.f32.gmra.mrb[54].mxu0 %vm399_vm0, %v13215_v63 }
 0x407   : > { %11436 = vmatprep.mubr.msk.f32.mxu0 %vm399_vm0, %v13230_v12 }
 0x40a   : > { %11437 = vmatmul.mubr.msk.f32.gmra.mrb[56].mxu0 %vm399_vm0, %v13227_v10 }
 0x40b   : > { %11439 = vmatprep.mubr.msk.f32.mxu0 %vm399_vm0, %v13242_v22 }
 0x40e   : > { %11440 = vmatmul.mubr.msk.f32.gmra.mrb[58].mxu0 %vm399_vm0, %v13239_v19 }
 0x40f   : > { %11442 = vmatprep.mubr.msk.f32.mxu0 %vm399_vm0, %v13254_v32 }
 0x412   : > { %11443 = vmatmul.mubr.msk.f32.gmra.mrb[60].mxu0 %vm399_vm0, %v15623_v27 }
 0x413   : > { %11445 = vmatprep.mubr.msk.f32.mxu0 %vm399_vm0, %v15625_v20 }
 0x416   : > { %11446 = vmatmul.mubr.msk.f32.gmra.mrb[62].mxu0 %vm399_vm0, %v15624_v4 }
 0x471   : > { %v11458_v59 = vpop.f32.mrb[96].mxu1 }
 0x472   : > { %v3350_v0 = vpop.f32.mrb[97].mxu1 }
 0x473   : > { %11568 = vmatprep.mubr.msk.f32.mxu1 %vm399_vm0, %v3350_v0 }
 0x474   : > { %11569 = vmatmul.mubr.msk.f32.vlgmr.msra.gmra.mrb[128].mxu1 %vm399_vm0, %v11458_v59 }
 0x476   : > { %v11461_v2 = vpop.f32.mrb[98].mxu1 }
 0x477   : > { %v3360_v7 = vpop.f32.mrb[99].mxu1 }
 0x478   : > { %11571 = vmatprep.mubr.msk.f32.mxu1 %vm399_vm0, %v3360_v7 }
 0x479   : > { %11572 = vmatmul.mubr.msk.f32.gmra.mrb[130].mxu1 %vm399_vm0, %v11461_v2 }
 0x47b   : > { %v11472_v9 = vpop.f32.mrb[100].mxu1 }
 0x47c   : > { %v3447_v14 = vpop.f32.mrb[101].mxu1 }
 0x47d   : > { %11574 = vmatprep.mubr.msk.f32.mxu1 %vm399_vm0, %v3447_v14 }
 0x47e   : > { %11575 = vmatmul.mubr.msk.f32.gmra.mrb[132].mxu1 %vm399_vm0, %v11472_v9 }
 0x47f   : > { %v11475_v16 = vpop.f32.mrb[102].mxu1 }
 0x480   : > { %v3457_v21 = vpop.f32.mrb[103].mxu1 }
 0x481   : > { %11577 = vmatprep.mubr.msk.f32.mxu1 %vm399_vm0, %v3457_v21 }
 0x482   : > { %11578 = vmatmul.mubr.msk.f32.gmra.mrb[134].mxu1 %vm399_vm0, %v11475_v16 }
 0x484   : > { %v11486_v23 = vpop.f32.mrb[104].mxu1 }
 0x485   : > { %v3544_v28 = vpop.f32.mrb[105].mxu1 }
 0x486   : > { %11580 = vmatprep.mubr.msk.f32.mxu1 %vm399_vm0, %v3544_v28 }
 0x487   : > { %11581 = vmatmul.mubr.msk.f32.gmra.mrb[136].mxu1 %vm399_vm0, %v11486_v23 }
 0x488   : > { %v11489_v30 = vpop.f32.mrb[106].mxu1 }
 0x489   : > { %v3554_v35 = vpop.f32.mrb[107].mxu1 }
 0x48a   : > { %11583 = vmatprep.mubr.msk.f32.mxu1 %vm399_vm0, %v3554_v35 }
 0x48b   : > { %11584 = vmatmul.mubr.msk.f32.gmra.mrb[138].mxu1 %vm399_vm0, %v11489_v30 }
 0x48d   : > { %v11500_v37 = vpop.f32.mrb[108].mxu1 }
 0x48e   : > { %v3641_v42 = vpop.f32.mrb[109].mxu1 }
 0x48f   : > { %11586 = vmatprep.mubr.msk.f32.mxu1 %vm399_vm0, %v3641_v42 }
 0x490   : > { %11587 = vmatmul.mubr.msk.f32.gmra.mrb[140].mxu1 %vm399_vm0, %v11500_v37 }
 0x491   : > { %v11503_v44 = vpop.f32.mrb[110].mxu1 }
 0x492   : > { %v3651_v53 = vpop.f32.mrb[111].mxu1 }
 0x493   : > { %11589 = vmatprep.mubr.msk.f32.mxu1 %vm399_vm0, %v3651_v53 }
 0x494   : > { %11590 = vmatmul.mubr.msk.f32.gmra.mrb[142].mxu1 %vm399_vm0, %v11503_v44 }
 0x497   : > { %v11514_v56 = vpop.f32.mrb[112].mxu1 }
 0x498   : > { %v3738_v63 = vpop.f32.mrb[113].mxu1 }
 0x499   : > { %11592 = vmatprep.mubr.msk.f32.mxu1 %vm399_vm0, %v3738_v63 }
 0x49a   : > { %11593 = vmatmul.mubr.msk.f32.gmra.mrb[144].mxu1 %vm399_vm0, %v11514_v56 }
 0x49b   : > { %v11517_v3 = vpop.f32.mrb[114].mxu1 }
 0x49c   : > { %v3748_v10 = vpop.f32.mrb[115].mxu1 }
 0x49d   : > { %11595 = vmatprep.mubr.msk.f32.mxu1 %vm399_vm0, %v3748_v10 }
 0x49e   : > { %11596 = vmatmul.mubr.msk.f32.gmra.mrb[146].mxu1 %vm399_vm0, %v11517_v3 }
 0x49f   : > { %v11528_v12 = vpop.f32.mrb[116].mxu1 }
 0x4a0   : > { %v3835_v19 = vpop.f32.mrb[117].mxu1 }
 0x4a1   : > { %11598 = vmatprep.mubr.msk.f32.mxu1 %vm399_vm0, %v3835_v19 }
 0x4a2   : > { %11599 = vmatmul.mubr.msk.f32.gmra.mrb[148].mxu1 %vm399_vm0, %v11528_v12 }
 0x4a3   : > { %v11531_v22 = vpop.f32.mrb[118].mxu1 }
 0x4a4   : > { %v3845_v32 = vpop.f32.mrb[119].mxu1 }
 0x4a5   : > { %11601 = vmatprep.mubr.msk.f32.mxu1 %vm399_vm0, %v3845_v32 }
 0x4a6   : > { %11602 = vmatmul.mubr.msk.f32.gmra.mrb[150].mxu1 %vm399_vm0, %v11531_v22 }
 0x4a7   : > { %v11542_v27 = vpop.f32.mrb[120].mxu1 }
 0x4a8   : > { %v3932_v4 = vpop.f32.mrb[121].mxu1 }
 0x4a9   : > { %11604 = vmatprep.mubr.msk.f32.mxu1 %vm399_vm0, %v3932_v4 }
 0x4aa   : > { %11605 = vmatmul.mubr.msk.f32.gmra.mrb[152].mxu1 %vm399_vm0, %v11542_v27 }
 0x4ab   : > { %v11545_v20 = vpop.f32.mrb[122].mxu1 }
 0x4ac   : > { %v3942_v18 = vpop.f32.mrb[123].mxu1 }
 0x4ad   : > { %11607 = vmatprep.mubr.msk.f32.mxu1 %vm399_vm0, %v3942_v18 }
 0x4ae   : > { %11608 = vmatmul.mubr.msk.f32.gmra.mrb[154].mxu1 %vm399_vm0, %v11545_v20 }
 0x4af   : > { %v11556_v47 = vpop.f32.mrb[124].mxu1 }
 0x4b0   : > { %v4029_v41 = vpop.f32.mrb[125].mxu1 }
 0x4b1   : > { %11610 = vmatprep.mubr.msk.f32.mxu1 %vm399_vm0, %v4029_v41 }
 0x4b2   : > { %11611 = vmatmul.mubr.msk.f32.gmra.mrb[156].mxu1 %vm399_vm0, %v11556_v47 }
 0x4b3   : > { %v11559_v51 = vpop.f32.mrb[126].mxu1 }
 0x4b4   : > { %v4039_v5 = vpop.f32.mrb[127].mxu1 }
 0x4b5   : > { %11613 = vmatprep.mubr.msk.f32.mxu1 %vm399_vm0, %v4039_v5 }
 0x4b6   : > { %11614 = vmatmul.mubr.msk.f32.gmra.mrb[158].mxu1 %vm399_vm0, %v11559_v51 }
 0x547   : > { %v11570_v49 = vpop.f32.mrb[128].mxu1 }
 0x548   : > { %v4225_v50 = vadd.f32 %v11570_v49, %v14051_v55  ;;  %v4219_v52 = vpop.f32.mrb[129].mxu1 }
 0x549   : > { %v4220_v54 = vadd.f32 %v14051_v55, %v4219_v52 }
 0x54a   : > { %v4379_v0 = vmax.f32 %v4225_v50, 0.0 }
 0x54b   : > { %v4378_v57 = vmax.f32 %v4220_v54, 0.0 }
 0x54c   : > { %v11573_v59 = vpop.f32.mrb[130].mxu1 }
 0x54d   : > { %v4235_v2 = vadd.f32 %v11573_v59, %v14051_v55  ;;  %v4229_v7 = vpop.f32.mrb[131].mxu1  ;;  %11624 = vmatprep.mubr.msk.f32.mxu0 %vm399_vm0, %v4378_v57 }
 0x54e   : > { %v4230_v9 = vadd.f32 %v14051_v55, %v4229_v7  ;;  %11625 = vmatmul.mubr.msk.f32.vlgmr.msra.gmra.mrb[64].mxu0 %vm399_vm0, %v4379_v0 }
 0x54f   : > { %v4381_v16 = vmax.f32 %v4235_v2, 0.0 }
 0x550   : > { %v4380_v14 = vmax.f32 %v4230_v9, 0.0 }
 0x551   : > { %v11576_v21 = vpop.f32.mrb[132].mxu1 }
 0x552   : > { %v4245_v23 = vadd.f32 %v11576_v21, %v14051_v55  ;;  %v4239_v28 = vpop.f32.mrb[133].mxu1  ;;  %11627 = vmatprep.mubr.msk.f32.mxu0 %vm399_vm0, %v4380_v14 }
 0x553   : > { %v4240_v30 = vadd.f32 %v14051_v55, %v4239_v28  ;;  %11628 = vmatmul.mubr.msk.f32.gmra.mrb[66].mxu0 %vm399_vm0, %v4381_v16 }
 0x554   : > { %v4383_v42 = vmax.f32 %v4245_v23, 0.0 }
 0x555   : > { %v4382_v35 = vmax.f32 %v4240_v30, 0.0  ;;  %v11579_v37 = vpop.f32.mrb[134].mxu1 }
 0x556   : > { %v4255_v44 = vadd.f32 %v11579_v37, %v14051_v55  ;;  %v4249_v53 = vpop.f32.mrb[135].mxu1 }
 0x557   : > { %v4250_v56 = vadd.f32 %v14051_v55, %v4249_v53  ;;  %11630 = vmatprep.mubr.msk.f32.mxu0 %vm399_vm0, %v4382_v35 }
 0x558   : > { %11631 = vmatmul.mubr.msk.f32.gmra.mrb[68].mxu0 %vm399_vm0, %v4383_v42  ;;  %v4385_v3 = vmax.f32 %v4255_v44, 0.0 }
 0x559   : > { %v4384_v63 = vmax.f32 %v4250_v56, 0.0 }
 0x55a   : > { %v11582_v10 = vpop.f32.mrb[136].mxu1 }
 0x55b   : > { %v4265_v12 = vadd.f32 %v11582_v10, %v14051_v55  ;;  %v4259_v19 = vpop.f32.mrb[137].mxu1  ;;  %11633 = vmatprep.mubr.msk.f32.mxu0 %vm399_vm0, %v4384_v63 }
 0x55c   : > { %v4260_v22 = vadd.f32 %v14051_v55, %v4259_v19  ;;  %11634 = vmatmul.mubr.msk.f32.gmra.mrb[70].mxu0 %vm399_vm0, %v4385_v3 }
 0x55d   : > { %v4387_v4 = vmax.f32 %v4265_v12, 0.0 }
 0x55e   : > { %v4386_v32 = vmax.f32 %v4260_v22, 0.0  ;;  %v11585_v27 = vpop.f32.mrb[138].mxu1 }
 0x55f   : > { %v4275_v20 = vadd.f32 %v11585_v27, %v14051_v55  ;;  %v4269_v18 = vpop.f32.mrb[139].mxu1 }
 0x560   : > { %v4270_v47 = vadd.f32 %v14051_v55, %v4269_v18  ;;  %11636 = vmatprep.mubr.msk.f32.mxu0 %vm399_vm0, %v4386_v32 }
 0x561   : > { %11637 = vmatmul.mubr.msk.f32.gmra.mrb[72].mxu0 %vm399_vm0, %v4387_v4  ;;  %v4389_v51 = vmax.f32 %v4275_v20, 0.0 }
 0x562   : > { %v4388_v41 = vmax.f32 %v4270_v47, 0.0 }
 0x563   : > { %v11588_v5 = vpop.f32.mrb[140].mxu1 }
 0x564   : > { %v4285_v8 = vadd.f32 %v11588_v5, %v14051_v55  ;;  %v4279_v29 = vpop.f32.mrb[141].mxu1  ;;  %11639 = vmatprep.mubr.msk.f32.mxu0 %vm399_vm0, %v4388_v41 }
 0x565   : > { %v4280_v45 = vadd.f32 %v14051_v55, %v4279_v29  ;;  %11640 = vmatmul.mubr.msk.f32.gmra.mrb[74].mxu0 %vm399_vm0, %v4389_v51 }
 0x566   : > { %v4391_v52 = vmax.f32 %v4285_v8, 0.0 }
 0x567   : > { %v4390_v49 = vmax.f32 %v4280_v45, 0.0  ;;  %v11591_v50 = vpop.f32.mrb[142].mxu1 }
 0x568   : > { %v4295_v54 = vadd.f32 %v11591_v50, %v14051_v55  ;;  %v4289_v57 = vpop.f32.mrb[143].mxu1 }
 0x569   : > { %v4290_v59 = vadd.f32 %v14051_v55, %v4289_v57  ;;  %11642 = vmatprep.mubr.msk.f32.mxu0 %vm399_vm0, %v4390_v49 }
 0x56a   : > { %11643 = vmatmul.mubr.msk.f32.gmra.mrb[76].mxu0 %vm399_vm0, %v4391_v52  ;;  %v4393_v2 = vmax.f32 %v4295_v54, 0.0 }
 0x56b   : > { %v4392_v0 = vmax.f32 %v4290_v59, 0.0 }
 0x56d   : > { %v11594_v7 = vpop.f32.mrb[144].mxu1  ;;  %11645 = vmatprep.mubr.msk.f32.mxu0 %vm399_vm0, %v4392_v0 }
 0x56e   : > { %v4305_v9 = vadd.f32 %v11594_v7, %v14051_v55  ;;  %v4299_v14 = vpop.f32.mrb[145].mxu1  ;;  %11646 = vmatmul.mubr.msk.f32.gmra.mrb[78].mxu0 %vm399_vm0, %v4393_v2 }
 0x56f   : > { %v4300_v16 = vadd.f32 %v14051_v55, %v4299_v14 }
 0x570   : > { %v4395_v28 = vmax.f32 %v4305_v9, 0.0 }
 0x571   : > { %v4394_v21 = vmax.f32 %v4300_v16, 0.0  ;;  %v11597_v23 = vpop.f32.mrb[146].mxu1 }
 0x572   : > { %v4315_v30 = vadd.f32 %v11597_v23, %v14051_v55  ;;  %v4309_v35 = vpop.f32.mrb[147].mxu1 }
 0x573   : > { %v4310_v37 = vadd.f32 %v14051_v55, %v4309_v35  ;;  %11648 = vmatprep.mubr.msk.f32.mxu0 %vm399_vm0, %v4394_v21  ;;  %v9966_v35 = vld [vmem:[%s15473_s5 + $0x40] sm:$0xff] }
 0x574   : > { %11649 = vmatmul.mubr.msk.f32.gmra.mrb[80].mxu0 %vm399_vm0, %v4395_v28  ;;  %v4397_v53 = vmax.f32 %v4315_v30, 0.0 }
 0x575   : > { %v4396_v42 = vmax.f32 %v4310_v37, 0.0  ;;  %v11600_v44 = vpop.f32.mrb[148].mxu1  ;;  %v9967_v37 = vld [vmem:[%s15473_s5 + $0x48] sm:$0xff] }
 0x576   : > { %v4325_v56 = vadd.f32 %v11600_v44, %v14051_v55  ;;  %v4319_v63 = vpop.f32.mrb[149].mxu1  ;;  %v9969_v44 = vld [vmem:[%s15473_s5 + $0x58] sm:$0xff] }
 0x577   : > { %v4320_v3 = vadd.f32 %v14051_v55, %v4319_v63  ;;  %11651 = vmatprep.mubr.msk.f32.mxu0 %vm399_vm0, %v4396_v42  ;;  %v9968_v42 = vld [vmem:[%s15473_s5 + $0x50] sm:$0xff]  ;;  %v14134_v63 = vld [vmem:[%s15472_s4 + $0x6] ss:$0 sm:$0xff] }
 0x578   : > { %11652 = vmatmul.mubr.msk.f32.gmra.mrb[82].mxu0 %vm399_vm0, %v4397_v53  ;;  %v4399_v19 = vmax.f32 %v4325_v56, 0.0  ;;  %v12476_v53 = vpack.c.bf16 %v9969_v44, %v9968_v42  ;;  %v5302_v56 = vld [vmem:[%s13071_s16] sm:$0xff] }
 0x579   : > { %v4398_v10 = vmax.f32 %v4320_v3, 0.0  ;;  %v11603_v12 = vpop.f32.mrb[150].mxu1  ;;  %11736 = vmatprep.mubr.msk.f32.mxu1 %vm399_vm0, %v5302_v56 }
 0x57a   : > { %v4335_v22 = vadd.f32 %v11603_v12, %v14051_v55  ;;  %v4329_v32 = vpop.f32.mrb[151].mxu1 }
 0x57b   : > { %v4330_v27 = vadd.f32 %v14051_v55, %v4329_v32  ;;  %11654 = vmatprep.mubr.msk.f32.mxu0 %vm399_vm0, %v4398_v10  ;;  %v14141_v32 = vld [vmem:[%s15472_s4 + $0x7] ss:$0 sm:$0xff] }
 0x57c   : > { %11655 = vmatmul.mubr.msk.f32.gmra.mrb[84].mxu0 %vm399_vm0, %v4399_v19  ;;  %v4401_v18 = vmax.f32 %v4335_v22, 0.0 }
 0x57d   : > { %v4400_v4 = vmax.f32 %v4330_v27, 0.0  ;;  %v11606_v20 = vpop.f32.mrb[152].mxu1 }
 0x57e   : > { %v4345_v47 = vadd.f32 %v11606_v20, %v14051_v55  ;;  %v4339_v41 = vpop.f32.mrb[153].mxu1  ;;  %v15627_v20 = vld [vmem:[#allocation12_spill] sm:$0xff] }
 0x57f   : > { %v4340_v51 = vadd.f32 %v14051_v55, %v4339_v41  ;;  %11657 = vmatprep.mubr.msk.f32.mxu0 %vm399_vm0, %v4400_v4 }
 0x580   : > { %11658 = vmatmul.mubr.msk.f32.gmra.mrb[86].mxu0 %vm399_vm0, %v4401_v18  ;;  %v4403_v29 = vmax.f32 %v4345_v47, 0.0 }
 0x581   : > { %v4402_v5 = vmax.f32 %v4340_v51, 0.0  ;;  %v11609_v8 = vpop.f32.mrb[154].mxu1  ;;  %v14148_v51 = vld [vmem:[%s15472_s4 + $0x8] ss:$0 sm:$0xff] }
 0x582   : > { %v4355_v45 = vadd.f32 %v11609_v8, %v14051_v55  ;;  %v4349_v49 = vpop.f32.mrb[155].mxu1 }
 0x583   : > { %v4350_v50 = vadd.f32 %v14051_v55, %v4349_v49  ;;  %11660 = vmatprep.mubr.msk.f32.mxu0 %vm399_vm0, %v4402_v5  ;;  %v15628_v5 = vld [vmem:[#allocation10_spill] sm:$0xff] }
 0x584   : > { %11661 = vmatmul.mubr.msk.f32.gmra.mrb[88].mxu0 %vm399_vm0, %v4403_v29  ;;  %v4405_v57 = vmax.f32 %v4355_v45, 0.0 }
 0x585   : > { %v4404_v52 = vmax.f32 %v4350_v50, 0.0  ;;  %v11612_v54 = vpop.f32.mrb[156].mxu1 }
 0x586   : > { %v4365_v59 = vadd.f32 %v11612_v54, %v14051_v55  ;;  %v4359_v0 = vpop.f32.mrb[157].mxu1 }
 0x587   : > { %v4360_v2 = vadd.f32 %v14051_v55, %v4359_v0  ;;  %11663 = vmatprep.mubr.msk.f32.mxu0 %vm399_vm0, %v4404_v52 }
 0x588   : > { %11664 = vmatmul.mubr.msk.f32.gmra.mrb[90].mxu0 %vm399_vm0, %v4405_v57  ;;  %v4407_v14 = vmax.f32 %v4365_v59, 0.0  ;;  %v15629_v57 = vld [vmem:[#allocation11_spill] sm:$0xff] }
 0x589   : > { %v4406_v7 = vmax.f32 %v4360_v2, 0.0  ;;  %v11615_v9 = vpop.f32.mrb[158].mxu1 }
 0x58a   : > { %v4375_v16 = vadd.f32 %v11615_v9, %v14051_v55  ;;  %v4369_v21 = vpop.f32.mrb[159].mxu1 }
 0x58b   : > { %v4370_v23 = vadd.f32 %v14051_v55, %v4369_v21  ;;  %11666 = vmatprep.mubr.msk.f32.mxu0 %vm399_vm0, %v4406_v7  ;;  %v12472_v55 = vpack.c.bf16 %v9967_v37, %v9966_v35  ;;  %v15630_v7 = vld [vmem:[#allocation9_spill] sm:$0xff] }
 0x58c   : > { %11667 = vmatmul.mubr.msk.f32.gmra.mrb[92].mxu0 %vm399_vm0, %v4407_v14  ;;  %v4409_v30 = vmax.f32 %v4375_v16, 0.0 }
 0x58d   : > { %v4408_v28 = vmax.f32 %v4370_v23, 0.0  ;;  %12473 = vmatprep.subr.bf16.mxu0 %v12472_v55 }
 0x58e   : > { %12475 = vmatpush3.bf16.msra.mxu0 %v12472_v55 }
 0x58f   : > { %11669 = vmatprep.mubr.msk.f32.mxu0 %vm399_vm0, %v4408_v28  ;;  %12477 = vmatprep.subr.bf16.mxu0 %v12476_v53 }
 0x590   : > { %11670 = vmatmul.mubr.msk.f32.gmra.mrb[94].mxu0 %vm399_vm0, %v4409_v30 }
 0x592   : > { %12479 = vmatpush3.bf16.msra.mxu0 %v12476_v53 }
 0x621   : > { %v11626_v3 = vpop.f32.mrb[64].mxu0 }
 0x622   : > { %v4587_v10 = vadd.f32 %v11626_v3, %v14134_v63  ;;  %v4581_v12 = vpop.f32.mrb[65].mxu0  ;;  %v15631_v3 = vld [vmem:[#allocation13_spill] sm:$0xff] }
 0x623   : > { %v4582_v19 = vadd.f32 %v14134_v63, %v4581_v12 }
 0x624   : > { %v4741_v22 = vmax.f32 %v4587_v10, 0.0 }
 0x625   : > { %v4740_v27 = vmax.f32 %v4582_v19, 0.0 }
 0x626   : > { %v11629_v4 = vpop.f32.mrb[66].mxu0  ;;  %v4773_v18 = vmul.f32 %v4741_v22, %v15627_v20 }
 0x627   : > { %v4597_v47 = vadd.f32 %v11629_v4, %v14134_v63  ;;  %v4591_v41 = vpop.f32.mrb[67].mxu0  ;;  %v4772_v8 = vmul.f32 %v4740_v27, %v15628_v5 }
 0x628   : > { %v4592_v29 = vadd.f32 %v14134_v63, %v4591_v41  ;;  %v4809_v45 = vmul.f32 %v14141_v32, %v4773_v18 }
 0x629   : > { %v4743_v49 = vmax.f32 %v4597_v47, 0.0  ;;  %v4808_v50 = vmul.f32 %v14141_v32, %v4772_v8 }
 0x62a   : > { %v4742_v52 = vmax.f32 %v4592_v29, 0.0  ;;  %v4845_v54 = vadd.f32 %v14148_v51, %v4809_v45 }
 0x62b   : > { %v4775_v59 = vmul.f32 %v4743_v49, %v15629_v57  ;;  %v11632_v0 = vpop.f32.mrb[68].mxu0  ;;  %v4844_v2 = vadd.f32 %v14148_v51, %v4808_v50  ;;  %v15632_v50 = vld [vmem:[#allocation14_spill] sm:$0xff] }
 0x62c   : > { %v4774_v9 = vmul.f32 %v4742_v52, %v15630_v7  ;;  %v4607_v14 = vadd.f32 %v11632_v0, %v14134_v63  ;;  %v4601_v16 = vpop.f32.mrb[69].mxu0  ;;  %v4877_v21 = vmax.f32 %v4845_v54, 0.0 }
 0x62d   : > { %v4811_v23 = vmul.f32 %v14141_v32, %v4775_v59  ;;  %v4602_v28 = vadd.f32 %v14134_v63, %v4601_v16  ;;  %v4876_v30 = vmax.f32 %v4844_v2, 0.0  ;;  %v15633_v2 = vld [vmem:[#allocation15_spill] sm:$0xff] }
 0x62e   : > { %v4810_v35 = vmul.f32 %v14141_v32, %v4774_v9  ;;  %v4745_v37 = vmax.f32 %v4607_v14, 0.0  ;;  %v14163_v55 = vadd.f32 %v4877_v21, %v13523_v26 }
 0x62f   : > { %v4847_v42 = vadd.f32 %v14148_v51, %v4811_v23  ;;  %v4744_v44 = vmax.f32 %v4602_v28, 0.0  ;;  %v11635_v53 = vpop.f32.mrb[70].mxu0  ;;  %v14170_v22 = vadd.f32 %v4876_v30, %v13532_v31 }
 0x630   : > { %v4846_v56 = vadd.f32 %v14148_v51, %v4810_v35  ;;  %v4777_v10 = vmul.f32 %v4745_v37, %v15631_v3  ;;  %v4617_v12 = vadd.f32 %v11635_v53, %v14134_v63  ;;  %v4611_v19 = vpop.f32.mrb[71].mxu0  ;;  %v15634_v53 = vld [vmem:[#allocation24_spill] sm:$0xff] }
 0x631   : > { %v4879_v27 = vmax.f32 %v4847_v42, 0.0  ;;  %v4776_v4 = vmul.f32 %v4744_v44, %v13467_v40  ;;  %v4612_v26 = vadd.f32 %v14134_v63, %v4611_v19  ;;  %11680 = vmatprep.mubr.msk.f32.mxu0 %vm399_vm0, %v14170_v22  ;;  %v12480_v8 = vpack.c.bf16 %v14163_v55, %v14170_v22 }
 0x632   : > { %v4878_v18 = vmax.f32 %v4846_v56, 0.0  ;;  %v4813_v47 = vmul.f32 %v14141_v32, %v4777_v10  ;;  %v4747_v41 = vmax.f32 %v4617_v12, 0.0  ;;  %11681 = vmatmul.mubr.msk.f32.vlgmr.msra.gmra.mrb[32].mxu0 %vm399_vm0, %v14163_v55  ;;  %v15635_v12 = vld [vmem:[#allocation16_spill] sm:$0xff] }
 0x633   : > { %v4812_v29 = vmul.f32 %v14141_v32, %v4776_v4  ;;  %v4746_v45 = vmax.f32 %v4612_v26, 0.0  ;;  %v14183_v31 = vadd.f32 %v4879_v27, %v13550_v58  ;;  %12481 = vmatprep.subr.bf16.mxu1 %v12480_v8  ;;  %v15636_v26 = vld [vmem:[#allocation26_spill] sm:$0xff] }
 0x634   : > { %v4849_v49 = vadd.f32 %v14148_v51, %v4813_v47  ;;  %v4779_v52 = vmul.f32 %v4747_v41, %v15632_v50  ;;  %v11638_v54 = vpop.f32.mrb[72].mxu0  ;;  %v14188_v59 = vadd.f32 %v4878_v18, %v13556_v15  ;;  %12483 = vmatpush3.bf16.msra.mxu1 %v12480_v8  ;;  %v5303_v47 = vld [vmem:[%s13071_s16 + $0x8] sm:$0xff]  ;;  %v15637_v8 = vld [vmem:[#allocation17_spill] sm:$0xff] }
 0x635   : > { %v4848_v0 = vadd.f32 %v14148_v51, %v4812_v29  ;;  %v4778_v9 = vmul.f32 %v4746_v45, %v15633_v2  ;;  %v4627_v14 = vadd.f32 %v11638_v54, %v14134_v63  ;;  %v4621_v16 = vpop.f32.mrb[73].mxu0 }
 0x636   : > { %v4881_v21 = vmax.f32 %v4849_v49, 0.0  ;;  %v4815_v58 = vmul.f32 %v14141_v32, %v4779_v52  ;;  %v4622_v23 = vadd.f32 %v14134_v63, %v4621_v16  ;;  %11683 = vmatprep.mubr.msk.f32.mxu0 %vm399_vm0, %v14188_v59  ;;  %v12484_v15 = vpack.c.bf16 %v14183_v31, %v14188_v59  ;;  %v5304_v49 = vld [vmem:[%s13071_s16 + $0x10] sm:$0xff] }
 0x637   : > { %v4880_v28 = vmax.f32 %v4848_v0, 0.0  ;;  %v4814_v30 = vmul.f32 %v14141_v32, %v4778_v9  ;;  %v4749_v35 = vmax.f32 %v4627_v14, 0.0  ;;  %11684 = vmatmul.mubr.msk.f32.gmra.mrb[34].mxu0 %vm399_vm0, %v14183_v31 }
 0x638   : > { %v4851_v37 = vadd.f32 %v14148_v51, %v4815_v58  ;;  %v4748_v42 = vmax.f32 %v4622_v23, 0.0  ;;  %v11641_v44 = vpop.f32.mrb[74].mxu0  ;;  %12485 = vmatprep.subr.bf16.mxu1 %v12484_v15  ;;  %v14204_v56 = vadd.f32 %v4881_v21, %v15634_v53  ;;  %v15638_v23 = vld [vmem:[#allocation18_spill] sm:$0xff] }
 0x639   : > { %v4850_v10 = vadd.f32 %v14148_v51, %v4814_v30  ;;  %v4781_v19 = vmul.f32 %v4749_v35, %v15635_v12  ;;  %v4637_v27 = vadd.f32 %v11641_v44, %v14134_v63  ;;  %v4631_v4 = vpop.f32.mrb[75].mxu0  ;;  %12487 = vmatpush3.bf16.msra.mxu1 %v12484_v15  ;;  %v14210_v18 = vadd.f32 %v4880_v28, %v15636_v26  ;;  %v15639_v30 = vld [vmem:[#allocation28_spill] sm:$0xff]  ;;  %v15640_v44 = vld [vmem:[#allocation19_spill] sm:$0xff] }
 0x63a   : > { %v4883_v41 = vmax.f32 %v4851_v37, 0.0  ;;  %v4780_v29 = vmul.f32 %v4748_v42, %v15637_v8  ;;  %v4632_v45 = vadd.f32 %v14134_v63, %v4631_v4  ;;  %v5305_v37 = vld [vmem:[%s13071_s16 + $0x18] sm:$0xff] }
 0x63b   : > { %v4882_v52 = vmax.f32 %v4850_v10, 0.0  ;;  %v4817_v54 = vmul.f32 %v14141_v32, %v4781_v19  ;;  %v4751_v0 = vmax.f32 %v4637_v27, 0.0  ;;  %11686 = vmatprep.mubr.msk.f32.mxu0 %vm399_vm0, %v14210_v18  ;;  %v12488_v9 = vpack.c.bf16 %v14204_v56, %v14210_v18  ;;  %v5306_v19 = vld [vmem:[%s13071_s16 + $0x20] sm:$0xff] }
 0x63c   : > { %v4816_v14 = vmul.f32 %v14141_v32, %v4780_v29  ;;  %v4750_v16 = vmax.f32 %v4632_v45, 0.0  ;;  %11687 = vmatmul.mubr.msk.f32.gmra.mrb[36].mxu0 %vm399_vm0, %v14204_v56  ;;  %11737 = vmatmul.mubr.msk.f32.vlgmr.msra.gmra.mrb[160].mxu1 %vm399_vm0, %v5303_v47  ;;  %v14226_v21 = vadd.f32 %v4883_v41, %v13597_v34 }
 0x63d   : > { %v4853_v58 = vadd.f32 %v14148_v51, %v4817_v54  ;;  %v4783_v15 = vmul.f32 %v4751_v0, %v15638_v23  ;;  %v11644_v28 = vpop.f32.mrb[76].mxu0  ;;  %12489 = vmatprep.subr.bf16.mxu1 %v12488_v9  ;;  %v14231_v35 = vadd.f32 %v4882_v52, %v15639_v30  ;;  %11739 = vmatprep.mubr.msk.f32.mxu1 %vm399_vm0, %v5304_v49  ;;  %v15641_v0 = vld [vmem:[#allocation32_spill] sm:$0xff]  ;;  %v15643_v30 = vld [vmem:[#allocation31_spill] sm:$0xff] }
 0x63e   : > { %v4852_v42 = vadd.f32 %v14148_v51, %v4816_v14  ;;  %v4782_v53 = vmul.f32 %v4750_v16, %v15640_v44  ;;  %v4647_v10 = vadd.f32 %v11644_v28, %v14134_v63  ;;  %v4641_v34 = vpop.f32.mrb[77].mxu0  ;;  %12491 = vmatpush3.bf16.msra.mxu1 %v12488_v9  ;;  %v15642_v16 = vld [vmem:[#allocation20_spill] sm:$0xff] }
 0x63f   : > { %v4885_v27 = vmax.f32 %v4853_v58, 0.0  ;;  %v4819_v4 = vmul.f32 %v14141_v32, %v4783_v15  ;;  %v4642_v26 = vadd.f32 %v14134_v63, %v4641_v34  ;;  %11689 = vmatprep.mubr.msk.f32.mxu0 %vm399_vm0, %v14231_v35  ;;  %v12492_v47 = vpack.c.bf16 %v14226_v21, %v14231_v35 }
 0x640   : > { %v4884_v41 = vmax.f32 %v4852_v42, 0.0  ;;  %v4818_v29 = vmul.f32 %v14141_v32, %v4782_v53  ;;  %v4753_v45 = vmax.f32 %v4647_v10, 0.0  ;;  %11690 = vmatmul.mubr.msk.f32.gmra.mrb[38].mxu0 %vm399_vm0, %v14226_v21  ;;  %11740 = vmatmul.mubr.msk.f32.gmra.mrb[162].mxu1 %vm399_vm0, %v5305_v37  ;;  %v5307_v42 = vld [vmem:[%s13071_s16 + $0x28] sm:$0xff]  ;;  %v15644_v10 = vld [vmem:[#allocation21_spill] sm:$0xff] }
 0x641   : > { %v4855_v49 = vadd.f32 %v14148_v51, %v4819_v4  ;;  %v4752_v52 = vmax.f32 %v4642_v26, 0.0  ;;  %v11647_v54 = vpop.f32.mrb[78].mxu0  ;;  %12493 = vmatprep.subr.bf16.mxu1 %v12492_v47  ;;  %v14251_v9 = vadd.f32 %v4885_v27, %v15641_v0  ;;  %11750 = vmatprep.mubr.msk.f32.mxu1 %vm399_vm0, %v5306_v19  ;;  %v5308_v4 = vld [vmem:[%s13071_s16 + $0x30] sm:$0xff] }
 0x642   : > { %v4854_v14 = vadd.f32 %v14148_v51, %v4818_v29  ;;  %v4785_v58 = vmul.f32 %v4753_v45, %v15642_v16  ;;  %v4657_v15 = vadd.f32 %v11647_v54, %v14134_v63  ;;  %v4651_v28 = vpop.f32.mrb[79].mxu0  ;;  %12495 = vmatpush3.bf16.msra.mxu1 %v12492_v47  ;;  %v14258_v37 = vadd.f32 %v4884_v41, %v15643_v30  ;;  %v15646_v54 = vld [vmem:[#allocation22_spill] sm:$0xff] }
 0x643   : > { %v4887_v53 = vmax.f32 %v4855_v49, 0.0  ;;  %v4784_v34 = vmul.f32 %v4752_v52, %v15644_v10  ;;  %v4652_v27 = vadd.f32 %v14134_v63, %v4651_v28  ;;  %v15648_v28 = vld [vmem:[#allocation23_spill] sm:$0xff] }
 0x644   : > { %v4886_v19 = vmax.f32 %v4854_v14, 0.0  ;;  %v4821_v26 = vmul.f32 %v14141_v32, %v4785_v58  ;;  %v4755_v29 = vmax.f32 %v4657_v15, 0.0  ;;  %11692 = vmatprep.mubr.msk.f32.mxu0 %vm399_vm0, %v14258_v37  ;;  %v12496_v47 = vpack.c.bf16 %v14251_v9, %v14258_v37  ;;  %v5309_v58 = vld [vmem:[%s13071_s16 + $0x38] sm:$0xff] }
 0x645   : > { %v4820_v41 = vmul.f32 %v14141_v32, %v4784_v34  ;;  %v4754_v45 = vmax.f32 %v4652_v27, 0.0  ;;  %11693 = vmatmul.mubr.msk.f32.gmra.mrb[40].mxu0 %vm399_vm0, %v14251_v9  ;;  %11751 = vmatmul.mubr.msk.f32.vlgmr.msra.gmra.mrb[164].mxu1 %vm399_vm0, %v5307_v42  ;;  %v14274_v49 = vadd.f32 %v4887_v53, %v13644_v48  ;;  %v5310_v42 = vld [vmem:[%s13071_s16 + $0x40] sm:$0xff] }
 0x646   : > { %v4857_v52 = vadd.f32 %v14148_v51, %v4821_v26  ;;  %v4787_v0 = vmul.f32 %v4755_v29, %v15646_v54  ;;  %12497 = vmatprep.subr.bf16.mxu1 %v12496_v47  ;;  %v14279_v14 = vadd.f32 %v4886_v19, %v13661_v39  ;;  %11753 = vmatprep.mubr.msk.f32.mxu1 %vm399_vm0, %v5308_v4 }
 0x647   : > { %15645 = vst [vmem:[#allocation6_spill] sm:$0xff] %v14274_v49  ;;  %v4856_v15 = vadd.f32 %v14148_v51, %v4820_v41  ;;  %v4786_v30 = vmul.f32 %v4754_v45, %v15648_v28  ;;  %v11650_v34 = vpop.f32.mrb[80].mxu0  ;;  %12499 = vmatpush3.bf16.msra.mxu1 %v12496_v47  ;;  %v15649_v45 = vld [vmem:[#allocation37_spill] sm:$0xff]  ;;  %v5311_v28 = vld [vmem:[%s13071_s16 + $0x48] sm:$0xff] }
 0x648   : > { %15647 = vst [vmem:[#allocation7_spill] sm:$0xff] %v14279_v14  ;;  %v4889_v48 = vmax.f32 %v4857_v52, 0.0  ;;  %v4823_v53 = vmul.f32 %v14141_v32, %v4787_v0  ;;  %v4667_v27 = vadd.f32 %v11650_v34, %v14134_v63  ;;  %v4661_v26 = vpop.f32.mrb[81].mxu0  ;;  %11695 = vmatprep.mubr.msk.f32.mxu0 %vm399_vm0, %v14279_v14  ;;  %v12500_v39 = vpack.c.bf16 %v14274_v49, %v14279_v14  ;;  %v15651_v34 = vld [vmem:[#allocation35_spill] sm:$0xff]  ;;  %v15653_v14 = vld [vmem:[#allocation25_spill] sm:$0xff] }
 0x649   : > { %v4888_v4 = vmax.f32 %v4856_v15, 0.0  ;;  %v4822_v19 = vmul.f32 %v14141_v32, %v4786_v30  ;;  %v4662_v29 = vadd.f32 %v14134_v63, %v4661_v26  ;;  %11696 = vmatmul.mubr.msk.f32.gmra.mrb[42].mxu0 %vm399_vm0, %v14274_v49  ;;  %11754 = vmatmul.mubr.msk.f32.gmra.mrb[166].mxu1 %vm399_vm0, %v5309_v58  ;;  %v5312_v49 = vld [vmem:[%s13071_s16 + $0x50] sm:$0xff] }
 0x64a   : > { %v4859_v47 = vadd.f32 %v14148_v51, %v4823_v53  ;;  %v4757_v41 = vmax.f32 %v4667_v27, 0.0  ;;  %12501 = vmatprep.subr.bf16.mxu1 %v12500_v39  ;;  %v14299_v52 = vadd.f32 %v4889_v48, %v15649_v45  ;;  %11764 = vmatprep.mubr.msk.f32.mxu1 %vm399_vm0, %v5310_v42  ;;  %v15654_v45 = vld [vmem:[#allocation27_spill] sm:$0xff] }
 0x64b   : > { %v4858_v0 = vadd.f32 %v14148_v51, %v4822_v19  ;;  %v4756_v15 = vmax.f32 %v4662_v29, 0.0  ;;  %v11653_v30 = vpop.f32.mrb[82].mxu0  ;;  %12503 = vmatpush3.bf16.msra.mxu1 %v12500_v39  ;;  %v14304_v26 = vadd.f32 %v4888_v4, %v15651_v34  ;;  %v15657_v34 = vld [vmem:[#allocation39_spill] sm:$0xff] }
 0x64c   : > { %15650 = vst [vmem:[#allocation8_spill] sm:$0xff] %v14299_v52  ;;  %v4891_v58 = vmax.f32 %v4859_v47, 0.0  ;;  %v4789_v54 = vmul.f32 %v4757_v41, %v15653_v14  ;;  %v4677_v53 = vadd.f32 %v11653_v30, %v14134_v63  ;;  %v4671_v27 = vpop.f32.mrb[83].mxu0  ;;  %v15655_v47 = vld [vmem:[#allocation40_spill] sm:$0xff] }
 0x64d   : > { %15652 = vst [vmem:[#allocation5_spill] sm:$0xff] %v14304_v26  ;;  %v4890_v48 = vmax.f32 %v4858_v0, 0.0  ;;  %v4788_v42 = vmul.f32 %v4756_v15, %v15654_v45  ;;  %v4672_v19 = vadd.f32 %v14134_v63, %v4671_v27  ;;  %11698 = vmatprep.mubr.msk.f32.mxu0 %vm399_vm0, %v14304_v26  ;;  %v12504_v39 = vpack.c.bf16 %v14299_v52, %v14304_v26  ;;  %v15659_v45 = vld [vmem:[#allocation29_spill] sm:$0xff] }
 0x64e   : > { %v4825_v4 = vmul.f32 %v14141_v32, %v4789_v54  ;;  %v4759_v29 = vmax.f32 %v4677_v53, 0.0  ;;  %11699 = vmatmul.mubr.msk.f32.gmra.mrb[44].mxu0 %vm399_vm0, %v14299_v52  ;;  %11765 = vmatmul.mubr.msk.f32.vlgmr.msra.gmra.mrb[168].mxu1 %vm399_vm0, %v5311_v28  ;;  %v14321_v41 = vadd.f32 %v4891_v58, %v15655_v47  ;;  %v5313_v54 = vld [vmem:[%s13071_s16 + $0x58] sm:$0xff]  ;;  %v5314_v58 = vld [vmem:[%s13071_s16 + $0x60] sm:$0xff] }
 0x64f   : > { %v4824_v0 = vmul.f32 %v14141_v32, %v4788_v42  ;;  %v4758_v15 = vmax.f32 %v4672_v19, 0.0  ;;  %v11656_v30 = vpop.f32.mrb[84].mxu0  ;;  %12505 = vmatprep.subr.bf16.mxu1 %v12504_v39  ;;  %v14325_v27 = vadd.f32 %v4890_v48, %v15657_v34  ;;  %11767 = vmatprep.mubr.msk.f32.mxu1 %vm399_vm0, %v5312_v49  ;;  %v15660_v19 = vld [vmem:[#allocation30_spill] sm:$0xff]  ;;  %v15661_v34 = vld [vmem:[#allocation33_spill] sm:$0xff] }
 0x650   : > { %15656 = vst [vmem:[#allocation12_spill] sm:$0xff] %v14321_v41  ;;  %v4861_v53 = vadd.f32 %v14148_v51, %v4825_v4  ;;  %v4791_v14 = vmul.f32 %v4759_v29, %v15659_v45  ;;  %v4687_v28 = vadd.f32 %v11656_v30, %v14134_v63  ;;  %v4681_v26 = vpop.f32.mrb[85].mxu0  ;;  %12507 = vmatpush3.bf16.msra.mxu1 %v12504_v39 }
 0x651   : > { %15658 = vst [vmem:[#allocation10_spill] sm:$0xff] %v14325_v27  ;;  %v4860_v42 = vadd.f32 %v14148_v51, %v4824_v0  ;;  %v4790_v47 = vmul.f32 %v4758_v15, %v15660_v19  ;;  %v4682_v52 = vadd.f32 %v14134_v63, %v4681_v26  ;;  %11701 = vmatprep.mubr.msk.f32.mxu0 %vm399_vm0, %v14325_v27  ;;  %v15662_v19 = vld [vmem:[#allocation44_spill] sm:$0xff] }
 0x652   : > { %v12508_v49 = vpack.c.bf16 %v14321_v41, %v14325_v27  ;;  %v4893_v48 = vmax.f32 %v4861_v53, 0.0  ;;  %v4827_v4 = vmul.f32 %v14141_v32, %v4791_v14  ;;  %v4761_v29 = vmax.f32 %v4687_v28, 0.0  ;;  %11702 = vmatmul.mubr.msk.f32.gmra.mrb[46].mxu0 %vm399_vm0, %v14321_v41  ;;  %11768 = vmatmul.mubr.msk.f32.gmra.mrb[170].mxu1 %vm399_vm0, %v5313_v54  ;;  %v5315_v54 = vld [vmem:[%s13071_s16 + $0x68] sm:$0xff] }
 0x653   : > { %v4892_v39 = vmax.f32 %v4860_v42, 0.0  ;;  %v4826_v0 = vmul.f32 %v14141_v32, %v4790_v47  ;;  %v4760_v26 = vmax.f32 %v4682_v52, 0.0  ;;  %v11659_v15 = vpop.f32.mrb[86].mxu0  ;;  %11778 = vmatprep.mubr.msk.f32.mxu1 %vm399_vm0, %v5314_v58  ;;  %v15663_v52 = vld [vmem:[#allocation34_spill] sm:$0xff]  ;;  %v15664_v58 = vld [vmem:[#allocation43_spill] sm:$0xff] }
 0x654   : > { %12509 = vmatprep.subr.bf16.mxu1 %v12508_v49  ;;  %v4863_v30 = vadd.f32 %v14148_v51, %v4827_v4  ;;  %v4793_v53 = vmul.f32 %v4761_v29, %v15661_v34  ;;  %v4697_v14 = vadd.f32 %v11659_v15, %v14134_v63  ;;  %v4691_v28 = vpop.f32.mrb[87].mxu0  ;;  %v14350_v45 = vadd.f32 %v4893_v48, %v15662_v19 }
 0x655   : > { %12511 = vmatpush3.bf16.msra.mxu1 %v12508_v49  ;;  %v4862_v42 = vadd.f32 %v14148_v51, %v4826_v0  ;;  %v4792_v47 = vmul.f32 %v4760_v26, %v15663_v52  ;;  %v4692_v27 = vadd.f32 %v14134_v63, %v4691_v28  ;;  %v14357_v41 = vadd.f32 %v4892_v39, %v15664_v58  ;;  %v5316_v39 = vld [vmem:[%s13071_s16 + $0x70] sm:$0xff] }
 0x656   : > { %v4895_v4 = vmax.f32 %v4863_v30, 0.0  ;;  %v4829_v29 = vmul.f32 %v14141_v32, %v4793_v53  ;;  %v4763_v15 = vmax.f32 %v4697_v14, 0.0  ;;  %v15666_v30 = vld [vmem:[#allocation36_spill] sm:$0xff] }
 0x657   : > { %15665 = vst [vmem:[#allocation11_spill] sm:$0xff] %v14357_v41  ;;  %v4894_v49 = vmax.f32 %v4862_v42, 0.0  ;;  %v4828_v19 = vmul.f32 %v14141_v32, %v4792_v47  ;;  %v4762_v48 = vmax.f32 %v4692_v27, 0.0  ;;  %v11662_v34 = vpop.f32.mrb[88].mxu0  ;;  %11704 = vmatprep.mubr.msk.f32.mxu0 %vm399_vm0, %v14357_v41  ;;  %v12512_v0 = vpack.c.bf16 %v14350_v45, %v14357_v41  ;;  %v5317_v42 = vld [vmem:[%s13071_s16 + $0x78] sm:$0xff] }
 0x658   : > { %11779 = vmatmul.mubr.msk.f32.vlgmr.msra.gmra.mrb[172].mxu1 %vm399_vm0, %v5315_v54  ;;  %v4865_v26 = vadd.f32 %v14148_v51, %v4829_v29  ;;  %v4795_v53 = vmul.f32 %v4763_v15, %v15666_v30  ;;  %v4707_v14 = vadd.f32 %v11662_v34, %v14134_v63  ;;  %v4701_v28 = vpop.f32.mrb[89].mxu0  ;;  %11705 = vmatmul.mubr.msk.f32.gmra.mrb[48].mxu0 %vm399_vm0, %v14350_v45  ;;  %v15667_v47 = vld [vmem:[#allocation38_spill] sm:$0xff] }
 0x659   : > { %v14373_v27 = vadd.f32 %v4895_v4, %v13783_v46  ;;  %v4864_v54 = vadd.f32 %v14148_v51, %v4828_v19  ;;  %v4794_v58 = vmul.f32 %v4762_v48, %v15667_v47  ;;  %v4702_v52 = vadd.f32 %v14134_v63, %v4701_v28  ;;  %12513 = vmatprep.subr.bf16.mxu1 %v12512_v0  ;;  %v15670_v28 = vld [vmem:[#allocation42_spill] sm:$0xff] }
 0x65a   : > { %v14380_v29 = vadd.f32 %v4894_v49, %v13766_v38  ;;  %v4897_v34 = vmax.f32 %v4865_v26, 0.0  ;;  %v4831_v15 = vmul.f32 %v14141_v32, %v4795_v53  ;;  %v4765_v30 = vmax.f32 %v4707_v14, 0.0  ;;  %12515 = vmatpush3.bf16.msra.mxu1 %v12512_v0  ;;  %11781 = vmatprep.mubr.msk.f32.mxu1 %vm399_vm0, %v5316_v39  ;;  %v5318_v49 = vld [vmem:[%s13071_s16 + $0x80] sm:$0xff]  ;;  %v15668_v26 = vld [vmem:[#allocation41_spill] sm:$0xff] }
 0x65b   : > { %v4896_v46 = vmax.f32 %v4864_v54, 0.0  ;;  %v4830_v4 = vmul.f32 %v14141_v32, %v4794_v58  ;;  %v4764_v19 = vmax.f32 %v4702_v52, 0.0  ;;  %v11665_v41 = vpop.f32.mrb[90].mxu0  ;;  %v15671_v58 = vld [vmem:[#allocation47_spill] sm:$0xff] }
 0x65c   : > { %11707 = vmatprep.mubr.msk.f32.mxu0 %vm399_vm0, %v14380_v29  ;;  %11782 = vmatmul.mubr.msk.f32.gmra.mrb[174].mxu1 %vm399_vm0, %v5317_v42  ;;  %v12516_v38 = vpack.c.bf16 %v14373_v27, %v14380_v29  ;;  %v4867_v48 = vadd.f32 %v14148_v51, %v4831_v15  ;;  %v4797_v0 = vmul.f32 %v4765_v30, %v15668_v26  ;;  %v4711_v53 = vpop.f32.mrb[91].mxu0 }
 0x65d   : > { %v4717_v39 = vadd.f32 %v11665_v41, %v14134_v63  ;;  %11708 = vmatmul.mubr.msk.f32.gmra.mrb[50].mxu0 %vm399_vm0, %v14373_v27  ;;  %v14397_v52 = vadd.f32 %v4897_v34, %v13810_v24  ;;  %v4866_v14 = vadd.f32 %v14148_v51, %v4830_v4  ;;  %v4796_v42 = vmul.f32 %v4764_v19, %v15670_v28  ;;  %v5319_v24 = vld [vmem:[%s13071_s16 + $0x88] sm:$0xff] }
 0x65e   : > { %v4712_v54 = vadd.f32 %v14134_v63, %v4711_v53  ;;  %12517 = vmatprep.subr.bf16.mxu1 %v12516_v38  ;;  %v14403_v15 = vadd.f32 %v4896_v46, %v15671_v58  ;;  %v4899_v30 = vmax.f32 %v4867_v48, 0.0  ;;  %v4833_v41 = vmul.f32 %v14141_v32, %v4797_v0  ;;  %11792 = vmatprep.mubr.msk.f32.mxu1 %vm399_vm0, %v5318_v49  ;;  %v5320_v53 = vld [vmem:[%s13071_s16 + $0x90] sm:$0xff] }
 0x65f   : > { %15669 = vst [vmem:[#allocation9_spill] sm:$0xff] %v14397_v52  ;;  %v4767_v26 = vmax.f32 %v4717_v39, 0.0  ;;  %12519 = vmatpush3.bf16.msra.mxu1 %v12516_v38  ;;  %v4898_v34 = vmax.f32 %v4866_v14, 0.0  ;;  %v4832_v4 = vmul.f32 %v14141_v32, %v4796_v42  ;;  %v11668_v19 = vpop.f32.mrb[92].mxu0  ;;  %v15673_v0 = vld [vmem:[#allocation45_spill] sm:$0xff] }
 0x660   : > { %15672 = vst [vmem:[#allocation13_spill] sm:$0xff] %v14403_v15  ;;  %v4766_v47 = vmax.f32 %v4712_v54, 0.0  ;;  %11710 = vmatprep.mubr.msk.f32.mxu0 %vm399_vm0, %v14403_v15  ;;  %v12520_v46 = vpack.c.bf16 %v14397_v52, %v14403_v15  ;;  %v4869_v48 = vadd.f32 %v14148_v51, %v4833_v41  ;;  %v4727_v49 = vadd.f32 %v11668_v19, %v14134_v63  ;;  %v4721_v39 = vpop.f32.mrb[93].mxu0  ;;  %v15674_v54 = vld [vmem:[#allocation46_spill] sm:$0xff]  ;;  %v15675_v15 = vld [vmem:[#allocation48_spill] sm:$0xff] }
 0x661   : > { %v4799_v38 = vmul.f32 %v4767_v26, %v15673_v0  ;;  %11711 = vmatmul.mubr.msk.f32.gmra.mrb[52].mxu0 %vm399_vm0, %v14397_v52  ;;  %v14420_v14 = vadd.f32 %v4899_v30, %v13825_v11  ;;  %v4868_v42 = vadd.f32 %v14148_v51, %v4832_v4  ;;  %v4722_v28 = vadd.f32 %v14134_v63, %v4721_v39  ;;  %v5321_v11 = vld [vmem:[%s13071_s16 + $0x98] sm:$0xff]  ;;  %v5322_v39 = vld [vmem:[%s13071_s16 + $0xa0] sm:$0xff] }
 0x662   : > { %v4798_v58 = vmul.f32 %v4766_v47, %v15674_v54  ;;  %11793 = vmatmul.mubr.msk.f32.vlgmr.msra.gmra.mrb[176].mxu1 %vm399_vm0, %v5319_v24  ;;  %12521 = vmatprep.subr.bf16.mxu1 %v12520_v46  ;;  %v4769_v41 = vmax.f32 %v4727_v49, 0.0  ;;  %v14428_v19 = vadd.f32 %v4898_v34, %v13814_v43  ;;  %v4901_v30 = vmax.f32 %v4869_v48, 0.0 }
 0x663   : > { %v4835_v26 = vmul.f32 %v14141_v32, %v4799_v38  ;;  %12523 = vmatpush3.bf16.msra.mxu1 %v12520_v46  ;;  %11795 = vmatprep.mubr.msk.f32.mxu1 %vm399_vm0, %v5320_v53  ;;  %v4900_v4 = vmax.f32 %v4868_v42, 0.0  ;;  %v4768_v47 = vmax.f32 %v4722_v28, 0.0  ;;  %v11671_v54 = vpop.f32.mrb[94].mxu0  ;;  %v15676_v53 = vld [vmem:[#allocation49_spill] sm:$0xff] }
 0x664   : > { %v4834_v0 = vmul.f32 %v14141_v32, %v4798_v58  ;;  %v4801_v52 = vmul.f32 %v4769_v41, %v15675_v15  ;;  %v4737_v38 = vadd.f32 %v11671_v54, %v14134_v63  ;;  %11713 = vmatprep.mubr.msk.f32.mxu0 %vm399_vm0, %v14428_v19  ;;  %v4731_v43 = vpop.f32.mrb[95].mxu0  ;;  %v12524_v34 = vpack.c.bf16 %v14420_v14, %v14428_v19 }
 0x665   : > { %v4871_v24 = vadd.f32 %v14148_v51, %v4835_v26  ;;  %v4800_v28 = vmul.f32 %v4768_v47, %v15676_v53  ;;  %v4732_v48 = vadd.f32 %v14134_v63, %v4731_v43  ;;  %11714 = vmatmul.mubr.msk.f32.gmra.mrb[54].mxu0 %vm399_vm0, %v14420_v14  ;;  %v14449_v58 = vadd.f32 %v4900_v4, %v13838_v36 }
 0x666   : > { %v4870_v46 = vadd.f32 %v14148_v51, %v4834_v0  ;;  %11796 = vmatmul.mubr.msk.f32.gmra.mrb[178].mxu1 %vm399_vm0, %v5321_v11  ;;  %v4837_v42 = vmul.f32 %v14141_v32, %v4801_v52  ;;  %v4771_v54 = vmax.f32 %v4737_v38, 0.0  ;;  %12525 = vmatprep.subr.bf16.mxu1 %v12524_v34  ;;  %v14454_v41 = vadd.f32 %v4901_v30, %v13852_v17  ;;  %v5323_v11 = vld [vmem:[%s13071_s16 + $0xa8] sm:$0xff] }
 0x667   : > { %v4903_v49 = vmax.f32 %v4871_v24, 0.0  ;;  %11806 = vmatprep.mubr.msk.f32.mxu1 %vm399_vm0, %v5322_v39  ;;  %v4836_v26 = vmul.f32 %v14141_v32, %v4800_v28  ;;  %v4770_v63 = vmax.f32 %v4732_v48, 0.0  ;;  %12527 = vmatpush3.bf16.msra.mxu1 %v12524_v34  ;;  %v5324_v24 = vld [vmem:[%s13071_s16 + $0xb0] sm:$0xff] }
 0x668   : > { %v4902_v0 = vmax.f32 %v4870_v46, 0.0  ;;  %v4873_v47 = vadd.f32 %v14148_v51, %v4837_v42  ;;  %v4803_v52 = vmul.f32 %v4771_v54, %v13840_v61  ;;  %11716 = vmatprep.mubr.msk.f32.mxu0 %vm399_vm0, %v14449_v58  ;;  %v12528_v17 = vpack.c.bf16 %v14454_v41, %v14449_v58  ;;  %v5325_v46 = vld [vmem:[%s13071_s16 + $0xb8] sm:$0xff] }
 0x669   : > { %v14462_v36 = vadd.f32 %v4903_v49, %v13856_v60  ;;  %v4872_v4 = vadd.f32 %v14148_v51, %v4836_v26  ;;  %v4802_v39 = vmul.f32 %v4770_v63, %v13846_v13  ;;  %11717 = vmatmul.mubr.msk.f32.gmra.mrb[56].mxu0 %vm399_vm0, %v14454_v41  ;;  %v5326_v49 = vld [vmem:[%s13071_s16 + $0xc0] sm:$0xff]  ;;  %v5328_v63 = vld [vmem:[%s13071_s16 + $0xd0] sm:$0xff] }
 0x66a   : > { %v14471_v30 = vadd.f32 %v4902_v0, %v13864_v62  ;;  %v4905_v38 = vmax.f32 %v4873_v47, 0.0  ;;  %v4839_v43 = vmul.f32 %v14141_v32, %v4803_v52  ;;  %11807 = vmatmul.mubr.msk.f32.vlgmr.msra.gmra.mrb[180].mxu1 %vm399_vm0, %v5323_v11  ;;  %12529 = vmatprep.subr.bf16.mxu1 %v12528_v17  ;;  %v10034_v11 = vld [vmem:[%s15471_s3 + $0xa0] sm:$0xff]  ;;  %v10035_v47 = vld [vmem:[%s15471_s3 + $0xa8] sm:$0xff] }
 0x66b   : > { %v4904_v60 = vmax.f32 %v4872_v4, 0.0  ;;  %v4838_v34 = vmul.f32 %v14141_v32, %v4802_v39  ;;  %12531 = vmatpush3.bf16.msra.mxu1 %v12528_v17  ;;  %11809 = vmatprep.mubr.msk.f32.mxu1 %vm399_vm0, %v5324_v24  ;;  %v5330_v52 = vld [vmem:[%s13071_s16 + $0xe0] sm:$0xff]  ;;  %v12544_v4 = vpack.c.bf16 %v10035_v47, %v10034_v11  ;;  %v10036_v39 = vld [vmem:[%s15471_s3 + $0xb0] sm:$0xff]  ;;  %v10037_v17 = vld [vmem:[%s15471_s3 + $0xb8] sm:$0xff] }
 0x66c   : > { %11719 = vmatprep.mubr.msk.f32.mxu0 %vm399_vm0, %v14471_v30  ;;  %v12532_v28 = vpack.c.bf16 %v14462_v36, %v14471_v30  ;;  %v4875_v62 = vadd.f32 %v14148_v51, %v4839_v43  ;;  %v14485_v48 = vadd.f32 %v4905_v38, %v13886_v6  ;;  %v5331_v24 = vld [vmem:[%s13071_s16 + $0xe8] sm:$0xff]  ;;  %v5332_v38 = vld [vmem:[%s13071_s16 + $0xf0] sm:$0xff]  ;;  %v12548_v43 = vpack.c.bf16 %v10037_v17, %v10036_v39 }
 0x66d   : > { %v4874_v32 = vadd.f32 %v14148_v51, %v4838_v34  ;;  %11720 = vmatmul.mubr.msk.f32.gmra.mrb[58].mxu0 %vm399_vm0, %v14462_v36  ;;  %v14492_v42 = vadd.f32 %v4904_v60, %v13883_v1  ;;  %v5327_v51 = vld [vmem:[%s13071_s16 + $0xc8] sm:$0xff]  ;;  %v5333_v60 = vld [vmem:[%s13071_s16 + $0xf8] sm:$0xff]  ;;  %v10071_v34 = vld [vmem:[%s15471_s3 + $0xc0] sm:$0xff] }
 0x66e   : > { %12533 = vmatprep.subr.bf16.mxu1 %v12532_v28  ;;  %v4907_v54 = vmax.f32 %v4875_v62, 0.0  ;;  %11810 = vmatmul.mubr.msk.f32.gmra.mrb[182].mxu1 %vm399_vm0, %v5325_v46  ;;  %v10072_v46 = vld [vmem:[%s15471_s3 + $0xc8] sm:$0xff] }
 0x66f   : > { %v4906_v0 = vmax.f32 %v4874_v32, 0.0  ;;  %11722 = vmatprep.mubr.msk.f32.mxu0 %vm399_vm0, %v14492_v42  ;;  %11820 = vmatprep.mubr.msk.f32.mxu1 %vm399_vm0, %v5326_v49  ;;  %v12536_v6 = vpack.c.bf16 %v14485_v48, %v14492_v42 }
 0x670   : > { %12535 = vmatpush3.bf16.msra.mxu1 %v12532_v28  ;;  %v14502_v26 = vadd.f32 %v4907_v54, %v13897_v33  ;;  %v12552_v28 = vpack.c.bf16 %v10072_v46, %v10071_v34 }
 0x671   : > { %11723 = vmatmul.mubr.msk.f32.gmra.mrb[60].mxu0 %vm399_vm0, %v14485_v48  ;;  %12537 = vmatprep.subr.bf16.mxu1 %v12536_v6  ;;  %v14507_v1 = vadd.f32 %v4906_v0, %v13902_v25  ;;  %v5329_v25 = vld [vmem:[%s13071_s16 + $0xd8] sm:$0xff] }
 0x672   : > { %12553 = vmatprep.subr.bf16.mxu0 %v12552_v28 }
 0x673   : > { %11821 = vmatmul.mubr.msk.f32.vlgmr.msra.gmra.mrb[184].mxu1 %vm399_vm0, %v5327_v51  ;;  %11725 = vmatprep.mubr.msk.f32.mxu0 %vm399_vm0, %v14507_v1  ;;  %v12540_v33 = vpack.c.bf16 %v14502_v26, %v14507_v1 }
 0x674   : > { %12539 = vmatpush3.bf16.msra.mxu1 %v12536_v6  ;;  %11823 = vmatprep.mubr.msk.f32.mxu1 %vm399_vm0, %v5328_v63 }
 0x675   : > { %11726 = vmatmul.mubr.msk.f32.gmra.mrb[62].mxu0 %vm399_vm0, %v14502_v26  ;;  %12541 = vmatprep.subr.bf16.mxu1 %v12540_v33 }
 0x676   : > { %12555 = vmatpush3.bf16.msra.mxu0 %v12552_v28 }
 0x677   : > { %11824 = vmatmul.mubr.msk.f32.gmra.mrb[186].mxu1 %vm399_vm0, %v5329_v25 }
 0x678   : > { %12543 = vmatpush3.bf16.msra.mxu1 %v12540_v33  ;;  %11834 = vmatprep.mubr.msk.f32.mxu1 %vm399_vm0, %v5330_v52 }
 0x679   : > { %12545 = vmatprep.subr.bf16.mxu1 %v12544_v4 }
 0x67b   : > { %11835 = vmatmul.mubr.msk.f32.vlgmr.msra.gmra.mrb[188].mxu1 %vm399_vm0, %v5331_v24 }
 0x67c   : > { %11837 = vmatprep.mubr.msk.f32.mxu1 %vm399_vm0, %v5332_v38  ;;  %12547 = vmatpush3.bf16.msra.mxu1 %v12544_v4 }
 0x67d   : > { %12549 = vmatprep.subr.bf16.mxu1 %v12548_v43 }
 0x67f   : > { %11838 = vmatmul.mubr.msk.f32.gmra.mrb[190].mxu1 %vm399_vm0, %v5333_v60 }
 0x680   : > { %12551 = vmatpush3.bf16.msra.mxu1 %v12548_v43 }
 0x70f   : > { %v11738_v62 = vpop.f32.mrb[160].mxu1 }
 0x710   : > { %v5412_v49 = vpop.f32.mrb[161].mxu1 }
 0x711   : > { %11848 = vmatprep.mubr.msk.f32.mxu1 %vm399_vm0, %v5412_v49 }
 0x712   : > { %11849 = vmatmul.mubr.msk.f32.vlgmr.msra.gmra.mrb[192].mxu1 %vm399_vm0, %v11738_v62 }
 0x713   : > { %v11741_v32 = vpop.f32.mrb[162].mxu1 }
 0x714   : > { %v5422_v54 = vpop.f32.mrb[163].mxu1 }
 0x715   : > { %11851 = vmatprep.mubr.msk.f32.mxu1 %vm399_vm0, %v5422_v54 }
 0x716   : > { %11852 = vmatmul.mubr.msk.f32.gmra.mrb[194].mxu1 %vm399_vm0, %v11741_v32 }
 0x718   : > { %v11752_v0 = vpop.f32.mrb[164].mxu1 }
 0x719   : > { %v5509_v6 = vpop.f32.mrb[165].mxu1 }
 0x71a   : > { %11854 = vmatprep.mubr.msk.f32.mxu1 %vm399_vm0, %v5509_v6 }
 0x71b   : > { %11855 = vmatmul.mubr.msk.f32.gmra.mrb[196].mxu1 %vm399_vm0, %v11752_v0 }
 0x71c   : > { %v11755_v51 = vpop.f32.mrb[166].mxu1 }
 0x71d   : > { %v5519_v63 = vpop.f32.mrb[167].mxu1 }
 0x71e   : > { %11857 = vmatprep.mubr.msk.f32.mxu1 %vm399_vm0, %v5519_v63 }
 0x71f   : > { %11858 = vmatmul.mubr.msk.f32.gmra.mrb[198].mxu1 %vm399_vm0, %v11755_v51 }
 0x721   : > { %v11766_v11 = vpop.f32.mrb[168].mxu1 }
 0x722   : > { %v5606_v47 = vpop.f32.mrb[169].mxu1 }
 0x723   : > { %11860 = vmatprep.mubr.msk.f32.mxu1 %vm399_vm0, %v5606_v47  ;;  %v10073_v47 = vld [vmem:[%s15471_s3 + $0xd0] sm:$0xff] }
 0x724   : > { %11861 = vmatmul.mubr.msk.f32.gmra.mrb[200].mxu1 %vm399_vm0, %v11766_v11 }
 0x725   : > { %v11769_v33 = vpop.f32.mrb[170].mxu1 }
 0x726   : > { %v5616_v25 = vpop.f32.mrb[171].mxu1 }
 0x727   : > { %11863 = vmatprep.mubr.msk.f32.mxu1 %vm399_vm0, %v5616_v25 }
 0x728   : > { %11864 = vmatmul.mubr.msk.f32.gmra.mrb[202].mxu1 %vm399_vm0, %v11769_v33  ;;  %v10074_v33 = vld [vmem:[%s15471_s3 + $0xd8] sm:$0xff] }
 0x729   : > { %v12556_v25 = vpack.c.bf16 %v10074_v33, %v10073_v47 }
 0x72b   : > { %v11780_v52 = vpop.f32.mrb[172].mxu1  ;;  %12557 = vmatprep.subr.bf16.mxu0 %v12556_v25 }
 0x72c   : > { %v5703_v4 = vpop.f32.mrb[173].mxu1  ;;  %12559 = vmatpush3.bf16.msra.mxu0 %v12556_v25 }
 0x72d   : > { %11866 = vmatprep.mubr.msk.f32.mxu1 %vm399_vm0, %v5703_v4 }
 0x72e   : > { %11867 = vmatmul.mubr.msk.f32.gmra.mrb[204].mxu1 %vm399_vm0, %v11780_v52  ;;  %v14587_v52 = vld [vmem:[%s15472_s4 + $0x9] ss:$0 sm:$0xff] }
 0x72f   : > { %v11783_v39 = vpop.f32.mrb[174].mxu1 }
 0x730   : > { %v5713_v17 = vpop.f32.mrb[175].mxu1 }
 0x731   : > { %11869 = vmatprep.mubr.msk.f32.mxu1 %vm399_vm0, %v5713_v17 }
 0x732   : > { %11870 = vmatmul.mubr.msk.f32.gmra.mrb[206].mxu1 %vm399_vm0, %v11783_v39 }
 0x735   : > { %v11794_v24 = vpop.f32.mrb[176].mxu1 }
 0x736   : > { %v5800_v38 = vpop.f32.mrb[177].mxu1 }
 0x737   : > { %11872 = vmatprep.mubr.msk.f32.mxu1 %vm399_vm0, %v5800_v38 }
 0x738   : > { %11873 = vmatmul.mubr.msk.f32.gmra.mrb[208].mxu1 %vm399_vm0, %v11794_v24 }
 0x739   : > { %v11797_v43 = vpop.f32.mrb[178].mxu1 }
 0x73a   : > { %v5810_v60 = vpop.f32.mrb[179].mxu1 }
 0x73b   : > { %11875 = vmatprep.mubr.msk.f32.mxu1 %vm399_vm0, %v5810_v60 }
 0x73c   : > { %11876 = vmatmul.mubr.msk.f32.gmra.mrb[210].mxu1 %vm399_vm0, %v11797_v43 }
 0x73d   : > { %v11808_v34 = vpop.f32.mrb[180].mxu1 }
 0x73e   : > { %v5897_v46 = vpop.f32.mrb[181].mxu1 }
 0x73f   : > { %11878 = vmatprep.mubr.msk.f32.mxu1 %vm399_vm0, %v5897_v46 }
 0x740   : > { %11879 = vmatmul.mubr.msk.f32.gmra.mrb[212].mxu1 %vm399_vm0, %v11808_v34 }
 0x741   : > { %v11811_v28 = vpop.f32.mrb[182].mxu1 }
 0x742   : > { %v5907_v62 = vpop.f32.mrb[183].mxu1 }
 0x743   : > { %11881 = vmatprep.mubr.msk.f32.mxu1 %vm399_vm0, %v5907_v62 }
 0x744   : > { %11882 = vmatmul.mubr.msk.f32.gmra.mrb[214].mxu1 %vm399_vm0, %v11811_v28 }
 0x746   : > { %v11822_v49 = vpop.f32.mrb[184].mxu1 }
 0x747   : > { %v5994_v32 = vpop.f32.mrb[185].mxu1 }
 0x748   : > { %11884 = vmatprep.mubr.msk.f32.mxu1 %vm399_vm0, %v5994_v32 }
 0x749   : > { %11885 = vmatmul.mubr.msk.f32.gmra.mrb[216].mxu1 %vm399_vm0, %v11822_v49 }
 0x74a   : > { %v11825_v54 = vpop.f32.mrb[186].mxu1 }
 0x74b   : > { %v6004_v0 = vpop.f32.mrb[187].mxu1 }
 0x74c   : > { %11887 = vmatprep.mubr.msk.f32.mxu1 %vm399_vm0, %v6004_v0 }
 0x74d   : > { %11888 = vmatmul.mubr.msk.f32.gmra.mrb[218].mxu1 %vm399_vm0, %v11825_v54 }
 0x74e   : > { %v11836_v6 = vpop.f32.mrb[188].mxu1 }
 0x74f   : > { %v6091_v51 = vpop.f32.mrb[189].mxu1 }
 0x750   : > { %11890 = vmatprep.mubr.msk.f32.mxu1 %vm399_vm0, %v6091_v51 }
 0x751   : > { %11891 = vmatmul.mubr.msk.f32.gmra.mrb[220].mxu1 %vm399_vm0, %v11836_v6 }
 0x752   : > { %v11839_v63 = vpop.f32.mrb[190].mxu1 }
 0x753   : > { %v6101_v11 = vpop.f32.mrb[191].mxu1 }
 0x754   : > { %11893 = vmatprep.mubr.msk.f32.mxu1 %vm399_vm0, %v6101_v11 }
 0x755   : > { %11894 = vmatmul.mubr.msk.f32.gmra.mrb[222].mxu1 %vm399_vm0, %v11839_v63 }
 0x7e5   : > { %v11850_v4 = vpop.f32.mrb[192].mxu1 }
 0x7e6   : > { %v6287_v39 = vadd.f32 %v11850_v4, %v14587_v52  ;;  %v6281_v17 = vpop.f32.mrb[193].mxu1 }
 0x7e7   : > { %v6282_v24 = vadd.f32 %v14587_v52, %v6281_v17 }
 0x7e8   : > { %v6441_v60 = vmax.f32 %v6287_v39, 0.0 }
 0x7e9   : > { %v6440_v38 = vmax.f32 %v6282_v24, 0.0  ;;  %v11853_v43 = vpop.f32.mrb[194].mxu1 }
 0x7ea   : > { %v6297_v34 = vadd.f32 %v11853_v43, %v14587_v52  ;;  %v6291_v46 = vpop.f32.mrb[195].mxu1 }
 0x7eb   : > { %v6292_v28 = vadd.f32 %v14587_v52, %v6291_v46  ;;  %11904 = vmatprep.mubr.msk.f32.mxu0 %vm399_vm0, %v6440_v38 }
 0x7ec   : > { %11905 = vmatmul.mubr.msk.f32.vlgmr.msra.gmra.mrb[96].mxu0 %vm399_vm0, %v6441_v60  ;;  %v6443_v49 = vmax.f32 %v6297_v34, 0.0 }
 0x7ed   : > { %v6442_v62 = vmax.f32 %v6292_v28, 0.0 }
 0x7ee   : > { %v11856_v32 = vpop.f32.mrb[196].mxu1 }
 0x7ef   : > { %v6307_v54 = vadd.f32 %v11856_v32, %v14587_v52  ;;  %v6301_v0 = vpop.f32.mrb[197].mxu1  ;;  %11907 = vmatprep.mubr.msk.f32.mxu0 %vm399_vm0, %v6442_v62 }
 0x7f0   : > { %v6302_v6 = vadd.f32 %v14587_v52, %v6301_v0  ;;  %11908 = vmatmul.mubr.msk.f32.gmra.mrb[98].mxu0 %vm399_vm0, %v6443_v49 }
 0x7f1   : > { %v6445_v11 = vmax.f32 %v6307_v54, 0.0 }
 0x7f2   : > { %v6444_v51 = vmax.f32 %v6302_v6, 0.0  ;;  %v11859_v63 = vpop.f32.mrb[198].mxu1 }
 0x7f3   : > { %v6317_v47 = vadd.f32 %v11859_v63, %v14587_v52  ;;  %v6311_v33 = vpop.f32.mrb[199].mxu1 }
 0x7f4   : > { %v6312_v25 = vadd.f32 %v14587_v52, %v6311_v33  ;;  %11910 = vmatprep.mubr.msk.f32.mxu0 %vm399_vm0, %v6444_v51 }
 0x7f5   : > { %11911 = vmatmul.mubr.msk.f32.gmra.mrb[100].mxu0 %vm399_vm0, %v6445_v11  ;;  %v6447_v39 = vmax.f32 %v6317_v47, 0.0 }
 0x7f6   : > { %v6446_v4 = vmax.f32 %v6312_v25, 0.0 }
 0x7f7   : > { %v11862_v17 = vpop.f32.mrb[200].mxu1 }
 0x7f8   : > { %v6327_v24 = vadd.f32 %v11862_v17, %v14587_v52  ;;  %v6321_v38 = vpop.f32.mrb[201].mxu1  ;;  %11913 = vmatprep.mubr.msk.f32.mxu0 %vm399_vm0, %v6446_v4 }
 0x7f9   : > { %v6322_v43 = vadd.f32 %v14587_v52, %v6321_v38  ;;  %11914 = vmatmul.mubr.msk.f32.gmra.mrb[102].mxu0 %vm399_vm0, %v6447_v39 }
 0x7fa   : > { %v6449_v46 = vmax.f32 %v6327_v24, 0.0 }
 0x7fb   : > { %v6448_v60 = vmax.f32 %v6322_v43, 0.0  ;;  %v11865_v34 = vpop.f32.mrb[202].mxu1 }
 0x7fc   : > { %v6337_v28 = vadd.f32 %v11865_v34, %v14587_v52  ;;  %v6331_v62 = vpop.f32.mrb[203].mxu1 }
 0x7fd   : > { %v6332_v49 = vadd.f32 %v14587_v52, %v6331_v62  ;;  %11916 = vmatprep.mubr.msk.f32.mxu0 %vm399_vm0, %v6448_v60 }
 0x7fe   : > { %11917 = vmatmul.mubr.msk.f32.gmra.mrb[104].mxu0 %vm399_vm0, %v6449_v46  ;;  %v6451_v54 = vmax.f32 %v6337_v28, 0.0 }
 0x7ff   : > { %v6450_v32 = vmax.f32 %v6332_v49, 0.0 }
 0x801   : > { %v11868_v0 = vpop.f32.mrb[204].mxu1  ;;  %11919 = vmatprep.mubr.msk.f32.mxu0 %vm399_vm0, %v6450_v32 }
 0x802   : > { %v6347_v6 = vadd.f32 %v11868_v0, %v14587_v52  ;;  %v6341_v51 = vpop.f32.mrb[205].mxu1  ;;  %11920 = vmatmul.mubr.msk.f32.gmra.mrb[106].mxu0 %vm399_vm0, %v6451_v54 }
 0x803   : > { %v6342_v63 = vadd.f32 %v14587_v52, %v6341_v51 }
 0x804   : > { %v6453_v33 = vmax.f32 %v6347_v6, 0.0 }
 0x805   : > { %v6452_v11 = vmax.f32 %v6342_v63, 0.0  ;;  %v11871_v47 = vpop.f32.mrb[206].mxu1 }
 0x806   : > { %v6357_v25 = vadd.f32 %v11871_v47, %v14587_v52  ;;  %v6351_v4 = vpop.f32.mrb[207].mxu1 }
 0x807   : > { %v6352_v39 = vadd.f32 %v14587_v52, %v6351_v4  ;;  %11922 = vmatprep.mubr.msk.f32.mxu0 %vm399_vm0, %v6452_v11 }
 0x808   : > { %11923 = vmatmul.mubr.msk.f32.gmra.mrb[108].mxu0 %vm399_vm0, %v6453_v33  ;;  %v6455_v24 = vmax.f32 %v6357_v25, 0.0 }
 0x809   : > { %v6454_v17 = vmax.f32 %v6352_v39, 0.0 }
 0x80b   : > { %v11874_v38 = vpop.f32.mrb[208].mxu1  ;;  %11925 = vmatprep.mubr.msk.f32.mxu0 %vm399_vm0, %v6454_v17 }
 0x80c   : > { %v6367_v43 = vadd.f32 %v11874_v38, %v14587_v52  ;;  %v6361_v60 = vpop.f32.mrb[209].mxu1  ;;  %11926 = vmatmul.mubr.msk.f32.gmra.mrb[110].mxu0 %vm399_vm0, %v6455_v24 }
 0x80d   : > { %v6362_v34 = vadd.f32 %v14587_v52, %v6361_v60 }
 0x80e   : > { %v6457_v62 = vmax.f32 %v6367_v43, 0.0 }
 0x80f   : > { %v6456_v46 = vmax.f32 %v6362_v34, 0.0  ;;  %v11877_v28 = vpop.f32.mrb[210].mxu1 }
 0x810   : > { %v6377_v49 = vadd.f32 %v11877_v28, %v14587_v52  ;;  %v6371_v32 = vpop.f32.mrb[211].mxu1 }
 0x811   : > { %v6372_v54 = vadd.f32 %v14587_v52, %v6371_v32  ;;  %11928 = vmatprep.mubr.msk.f32.mxu0 %vm399_vm0, %v6456_v46 }
 0x812   : > { %11929 = vmatmul.mubr.msk.f32.gmra.mrb[112].mxu0 %vm399_vm0, %v6457_v62  ;;  %v6459_v6 = vmax.f32 %v6377_v49, 0.0 }
 0x813   : > { %v6458_v0 = vmax.f32 %v6372_v54, 0.0  ;;  %v11880_v51 = vpop.f32.mrb[212].mxu1 }
 0x814   : > { %v6387_v63 = vadd.f32 %v11880_v51, %v14587_v52  ;;  %v6381_v11 = vpop.f32.mrb[213].mxu1 }
 0x815   : > { %11931 = vmatprep.mubr.msk.f32.mxu0 %vm399_vm0, %v6458_v0  ;;  %v6382_v47 = vadd.f32 %v14587_v52, %v6381_v11 }
 0x816   : > { %11932 = vmatmul.mubr.msk.f32.gmra.mrb[114].mxu0 %vm399_vm0, %v6459_v6  ;;  %v6461_v4 = vmax.f32 %v6387_v63, 0.0 }
 0x817   : > { %v6460_v33 = vmax.f32 %v6382_v47, 0.0  ;;  %v11883_v25 = vpop.f32.mrb[214].mxu1 }
 0x818   : > { %v6397_v39 = vadd.f32 %v11883_v25, %v14587_v52  ;;  %v6391_v17 = vpop.f32.mrb[215].mxu1 }
 0x819   : > { %v6392_v24 = vadd.f32 %v14587_v52, %v6391_v17  ;;  %11934 = vmatprep.mubr.msk.f32.mxu0 %vm399_vm0, %v6460_v33 }
 0x81a   : > { %11935 = vmatmul.mubr.msk.f32.gmra.mrb[116].mxu0 %vm399_vm0, %v6461_v4  ;;  %v6463_v43 = vmax.f32 %v6397_v39, 0.0 }
 0x81b   : > { %v6462_v38 = vmax.f32 %v6392_v24, 0.0 }
 0x81c   : > { %v11886_v60 = vpop.f32.mrb[216].mxu1 }
 0x81d   : > { %v6407_v34 = vadd.f32 %v11886_v60, %v14587_v52  ;;  %v6401_v46 = vpop.f32.mrb[217].mxu1  ;;  %11937 = vmatprep.mubr.msk.f32.mxu0 %vm399_vm0, %v6462_v38 }
 0x81e   : > { %v6402_v28 = vadd.f32 %v14587_v52, %v6401_v46  ;;  %11938 = vmatmul.mubr.msk.f32.gmra.mrb[118].mxu0 %vm399_vm0, %v6463_v43  ;;  %v10110_v46 = vld [vmem:[%s15473_s5 + $0x60] sm:$0xff] }
 0x81f   : > { %v6465_v32 = vmax.f32 %v6407_v34, 0.0 }
 0x820   : > { %v6464_v62 = vmax.f32 %v6402_v28, 0.0  ;;  %v11889_v49 = vpop.f32.mrb[218].mxu1  ;;  %v10111_v28 = vld [vmem:[%s15473_s5 + $0x68] sm:$0xff] }
 0x821   : > { %v6417_v54 = vadd.f32 %v11889_v49, %v14587_v52  ;;  %v6411_v0 = vpop.f32.mrb[219].mxu1  ;;  %v10113_v49 = vld [vmem:[%s15473_s5 + $0x78] sm:$0xff] }
 0x822   : > { %v6412_v6 = vadd.f32 %v14587_v52, %v6411_v0  ;;  %11940 = vmatprep.mubr.msk.f32.mxu0 %vm399_vm0, %v6464_v62  ;;  %v10112_v62 = vld [vmem:[%s15473_s5 + $0x70] sm:$0xff]  ;;  %v14670_v0 = vld [vmem:[%s15472_s4 + $0xa] ss:$0 sm:$0xff] }
 0x823   : > { %11941 = vmatmul.mubr.msk.f32.gmra.mrb[120].mxu0 %vm399_vm0, %v6465_v32  ;;  %v6467_v11 = vmax.f32 %v6417_v54, 0.0  ;;  %v12564_v32 = vpack.c.bf16 %v10113_v49, %v10112_v62  ;;  %v7364_v54 = vld [vmem:[%s13071_s16] sm:$0xff] }
 0x824   : > { %v6466_v51 = vmax.f32 %v6412_v6, 0.0  ;;  %v11892_v63 = vpop.f32.mrb[220].mxu1  ;;  %12016 = vmatprep.mubr.msk.f32.mxu1 %vm399_vm0, %v7364_v54 }
 0x825   : > { %v6427_v47 = vadd.f32 %v11892_v63, %v14587_v52  ;;  %v6421_v33 = vpop.f32.mrb[221].mxu1 }
 0x826   : > { %v6422_v25 = vadd.f32 %v14587_v52, %v6421_v33  ;;  %11943 = vmatprep.mubr.msk.f32.mxu0 %vm399_vm0, %v6466_v51  ;;  %v14677_v33 = vld [vmem:[%s15472_s4 + $0xb] ss:$0 sm:$0xff] }
 0x827   : > { %11944 = vmatmul.mubr.msk.f32.gmra.mrb[122].mxu0 %vm399_vm0, %v6467_v11  ;;  %v6469_v17 = vmax.f32 %v6427_v47, 0.0 }
 0x828   : > { %v6468_v4 = vmax.f32 %v6422_v25, 0.0  ;;  %v11895_v39 = vpop.f32.mrb[222].mxu1 }
 0x829   : > { %v6437_v24 = vadd.f32 %v11895_v39, %v14587_v52  ;;  %v6431_v38 = vpop.f32.mrb[223].mxu1 }
 0x82a   : > { %v6432_v43 = vadd.f32 %v14587_v52, %v6431_v38  ;;  %11946 = vmatprep.mubr.msk.f32.mxu0 %vm399_vm0, %v6468_v4  ;;  %v12560_v52 = vpack.c.bf16 %v10111_v28, %v10110_v46  ;;  %v14684_v38 = vld [vmem:[%s15472_s4 + $0xc] ss:$0 sm:$0xff] }
 0x82b   : > { %11947 = vmatmul.mubr.msk.f32.gmra.mrb[124].mxu0 %vm399_vm0, %v6469_v17  ;;  %v6471_v34 = vmax.f32 %v6437_v24, 0.0 }
 0x82c   : > { %v6470_v60 = vmax.f32 %v6432_v43, 0.0  ;;  %12561 = vmatprep.subr.bf16.mxu0 %v12560_v52 }
 0x82d   : > { %12563 = vmatpush3.bf16.msra.mxu0 %v12560_v52 }
 0x82e   : > { %11949 = vmatprep.mubr.msk.f32.mxu0 %vm399_vm0, %v6470_v60  ;;  %12565 = vmatprep.subr.bf16.mxu0 %v12564_v32 }
 0x82f   : > { %11950 = vmatmul.mubr.msk.f32.gmra.mrb[126].mxu0 %vm399_vm0, %v6471_v34 }
 0x831   : > { %12567 = vmatpush3.bf16.msra.mxu0 %v12564_v32 }
 0x8bf   : > { %v11906_v6 = vpop.f32.mrb[96].mxu0 }
 0x8c0   : > { %v6649_v51 = vadd.f32 %v11906_v6, %v14670_v0  ;;  %v6643_v63 = vpop.f32.mrb[97].mxu0 }
 0x8c1   : > { %v6644_v11 = vadd.f32 %v14670_v0, %v6643_v63 }
 0x8c2   : > { %v6803_v47 = vmax.f32 %v6649_v51, 0.0 }
 0x8c3   : > { %v6802_v25 = vmax.f32 %v6644_v11, 0.0  ;;  %v11909_v4 = vpop.f32.mrb[98].mxu0 }
 0x8c4   : > { %v6835_v39 = vmul.f32 %v6803_v47, %v15627_v20  ;;  %v6659_v17 = vadd.f32 %v11909_v4, %v14670_v0  ;;  %v6653_v24 = vpop.f32.mrb[99].mxu0 }
 0x8c5   : > { %v6834_v43 = vmul.f32 %v6802_v25, %v15628_v5  ;;  %v6654_v60 = vadd.f32 %v14670_v0, %v6653_v24 }
 0x8c6   : > { %v6871_v34 = vmul.f32 %v14677_v33, %v6835_v39  ;;  %v6805_v46 = vmax.f32 %v6659_v17, 0.0 }
 0x8c7   : > { %v6870_v28 = vmul.f32 %v14677_v33, %v6834_v43  ;;  %v6804_v52 = vmax.f32 %v6654_v60, 0.0 }
 0x8c8   : > { %v6907_v62 = vadd.f32 %v14684_v38, %v6871_v34  ;;  %v6837_v49 = vmul.f32 %v6805_v46, %v15629_v57  ;;  %v11912_v32 = vpop.f32.mrb[100].mxu0 }
 0x8c9   : > { %v6906_v54 = vadd.f32 %v14684_v38, %v6870_v28  ;;  %v6836_v6 = vmul.f32 %v6804_v52, %v15630_v7  ;;  %v6669_v51 = vadd.f32 %v11912_v32, %v14670_v0  ;;  %v6663_v63 = vpop.f32.mrb[101].mxu0 }
 0x8ca   : > { %v6939_v11 = vmax.f32 %v6907_v62, 0.0  ;;  %v6873_v47 = vmul.f32 %v14677_v33, %v6837_v49  ;;  %v6664_v25 = vadd.f32 %v14670_v0, %v6663_v63 }
 0x8cb   : > { %v6938_v4 = vmax.f32 %v6906_v54, 0.0  ;;  %v6872_v39 = vmul.f32 %v14677_v33, %v6836_v6  ;;  %v6807_v17 = vmax.f32 %v6669_v51, 0.0 }
 0x8cc   : > { %v14699_v24 = vadd.f32 %v6939_v11, %v14163_v55  ;;  %v6909_v43 = vadd.f32 %v14684_v38, %v6873_v47  ;;  %v6806_v60 = vmax.f32 %v6664_v25, 0.0  ;;  %v11915_v34 = vpop.f32.mrb[102].mxu0 }
 0x8cd   : > { %v6908_v46 = vadd.f32 %v14684_v38, %v6872_v39  ;;  %v6839_v28 = vmul.f32 %v6807_v17, %v15631_v3  ;;  %v6679_v52 = vadd.f32 %v11915_v34, %v14670_v0  ;;  %v6673_v62 = vpop.f32.mrb[103].mxu0  ;;  %v14706_v49 = vadd.f32 %v6938_v4, %v14170_v22 }
 0x8ce   : > { %v6941_v32 = vmax.f32 %v6909_v43, 0.0  ;;  %v6838_v54 = vmul.f32 %v6806_v60, %v13467_v40  ;;  %v6674_v55 = vadd.f32 %v14670_v0, %v6673_v62 }
 0x8cf   : > { %v6940_v6 = vmax.f32 %v6908_v46, 0.0  ;;  %v6875_v51 = vmul.f32 %v14677_v33, %v6839_v28  ;;  %v6809_v63 = vmax.f32 %v6679_v52, 0.0  ;;  %11960 = vmatprep.mubr.msk.f32.mxu0 %vm399_vm0, %v14706_v49  ;;  %v12568_v11 = vpack.c.bf16 %v14699_v24, %v14706_v49 }
 0x8d0   : > { %v6874_v47 = vmul.f32 %v14677_v33, %v6838_v54  ;;  %v6808_v25 = vmax.f32 %v6674_v55, 0.0  ;;  %11961 = vmatmul.mubr.msk.f32.vlgmr.msra.gmra.mrb[32].mxu0 %vm399_vm0, %v14699_v24  ;;  %v14719_v22 = vadd.f32 %v6941_v32, %v14183_v31 }
 0x8d1   : > { %v6911_v4 = vadd.f32 %v14684_v38, %v6875_v51  ;;  %v6841_v39 = vmul.f32 %v6809_v63, %v15632_v50  ;;  %v11918_v17 = vpop.f32.mrb[104].mxu0  ;;  %12569 = vmatprep.subr.bf16.mxu1 %v12568_v11  ;;  %v14724_v43 = vadd.f32 %v6940_v6, %v14188_v59 }
 0x8d2   : > { %v6910_v60 = vadd.f32 %v14684_v38, %v6874_v47  ;;  %v6840_v34 = vmul.f32 %v6808_v25, %v15633_v2  ;;  %v6689_v46 = vadd.f32 %v11918_v17, %v14670_v0  ;;  %v6683_v28 = vpop.f32.mrb[105].mxu0  ;;  %12571 = vmatpush3.bf16.msra.mxu1 %v12568_v11 }
 0x8d3   : > { %v6943_v52 = vmax.f32 %v6911_v4, 0.0  ;;  %v6877_v31 = vmul.f32 %v14677_v33, %v6841_v39  ;;  %v6684_v62 = vadd.f32 %v14670_v0, %v6683_v28  ;;  %11963 = vmatprep.mubr.msk.f32.mxu0 %vm399_vm0, %v14724_v43  ;;  %v12572_v59 = vpack.c.bf16 %v14719_v22, %v14724_v43 }
 0x8d4   : > { %v6942_v32 = vmax.f32 %v6910_v60, 0.0  ;;  %v6876_v54 = vmul.f32 %v14677_v33, %v6840_v34  ;;  %v6811_v55 = vmax.f32 %v6689_v46, 0.0  ;;  %11964 = vmatmul.mubr.msk.f32.gmra.mrb[34].mxu0 %vm399_vm0, %v14719_v22  ;;  %v7365_v60 = vld [vmem:[%s13071_s16 + $0x8] sm:$0xff] }
 0x8d5   : > { %v6913_v6 = vadd.f32 %v14684_v38, %v6877_v31  ;;  %v6810_v51 = vmax.f32 %v6684_v62, 0.0  ;;  %v11921_v63 = vpop.f32.mrb[106].mxu0  ;;  %12573 = vmatprep.subr.bf16.mxu1 %v12572_v59  ;;  %v14740_v11 = vadd.f32 %v6943_v52, %v14204_v56  ;;  %v7366_v31 = vld [vmem:[%s13071_s16 + $0x10] sm:$0xff] }
 0x8d6   : > { %v6912_v47 = vadd.f32 %v14684_v38, %v6876_v54  ;;  %v6843_v25 = vmul.f32 %v6811_v55, %v15635_v12  ;;  %v6699_v4 = vadd.f32 %v11921_v63, %v14670_v0  ;;  %v6693_v39 = vpop.f32.mrb[107].mxu0  ;;  %12575 = vmatpush3.bf16.msra.mxu1 %v12572_v59  ;;  %v14746_v17 = vadd.f32 %v6942_v32, %v14210_v18 }
 0x8d7   : > { %v6945_v34 = vmax.f32 %v6913_v6, 0.0  ;;  %v6842_v46 = vmul.f32 %v6810_v51, %v15637_v8  ;;  %v6694_v28 = vadd.f32 %v14670_v0, %v6693_v39 }
 0x8d8   : > { %v6944_v56 = vmax.f32 %v6912_v47, 0.0  ;;  %v6879_v52 = vmul.f32 %v14677_v33, %v6843_v25  ;;  %v6813_v62 = vmax.f32 %v6699_v4, 0.0  ;;  %11966 = vmatprep.mubr.msk.f32.mxu0 %vm399_vm0, %v14746_v17  ;;  %v12576_v59 = vpack.c.bf16 %v14740_v11, %v14746_v17  ;;  %v7367_v47 = vld [vmem:[%s13071_s16 + $0x18] sm:$0xff] }
 0x8d9   : > { %v6878_v18 = vmul.f32 %v14677_v33, %v6842_v46  ;;  %v6812_v32 = vmax.f32 %v6694_v28, 0.0  ;;  %11967 = vmatmul.mubr.msk.f32.gmra.mrb[36].mxu0 %vm399_vm0, %v14740_v11  ;;  %12017 = vmatmul.mubr.msk.f32.vlgmr.msra.gmra.mrb[224].mxu1 %vm399_vm0, %v7365_v60  ;;  %v14762_v54 = vadd.f32 %v6945_v34, %v14226_v21  ;;  %v7368_v60 = vld [vmem:[%s13071_s16 + $0x20] sm:$0xff] }
 0x8da   : > { %v6915_v55 = vadd.f32 %v14684_v38, %v6879_v52  ;;  %v6845_v6 = vmul.f32 %v6813_v62, %v15638_v23  ;;  %12577 = vmatprep.subr.bf16.mxu1 %v12576_v59  ;;  %v14767_v63 = vadd.f32 %v6944_v56, %v14231_v35  ;;  %12019 = vmatprep.mubr.msk.f32.mxu1 %vm399_vm0, %v7366_v31 }
 0x8db   : > { %v11924_v51 = vpop.f32.mrb[108].mxu0  ;;  %v6914_v25 = vadd.f32 %v14684_v38, %v6878_v18  ;;  %v6844_v4 = vmul.f32 %v6812_v32, %v15640_v44  ;;  %12579 = vmatpush3.bf16.msra.mxu1 %v12576_v59 }
 0x8dc   : > { %v6709_v39 = vadd.f32 %v11924_v51, %v14670_v0  ;;  %v6703_v21 = vpop.f32.mrb[109].mxu0  ;;  %v6947_v34 = vmax.f32 %v6915_v55, 0.0  ;;  %v6881_v46 = vmul.f32 %v14677_v33, %v6845_v6  ;;  %11969 = vmatprep.mubr.msk.f32.mxu0 %vm399_vm0, %v14767_v63  ;;  %v12580_v35 = vpack.c.bf16 %v14762_v54, %v14767_v63 }
 0x8dd   : > { %v6704_v28 = vadd.f32 %v14670_v0, %v6703_v21  ;;  %v6946_v31 = vmax.f32 %v6914_v25, 0.0  ;;  %v6880_v56 = vmul.f32 %v14677_v33, %v6844_v4  ;;  %11970 = vmatmul.mubr.msk.f32.gmra.mrb[38].mxu0 %vm399_vm0, %v14762_v54  ;;  %12020 = vmatmul.mubr.msk.f32.gmra.mrb[226].mxu1 %vm399_vm0, %v7367_v47  ;;  %v7369_v4 = vld [vmem:[%s13071_s16 + $0x28] sm:$0xff] }
 0x8de   : > { %v6815_v52 = vmax.f32 %v6709_v39, 0.0  ;;  %v6917_v62 = vadd.f32 %v14684_v38, %v6881_v46  ;;  %12581 = vmatprep.subr.bf16.mxu1 %v12580_v35  ;;  %v14787_v32 = vadd.f32 %v6947_v34, %v14251_v9  ;;  %12030 = vmatprep.mubr.msk.f32.mxu1 %vm399_vm0, %v7368_v60  ;;  %v7370_v34 = vld [vmem:[%s13071_s16 + $0x30] sm:$0xff] }
 0x8df   : > { %v6814_v59 = vmax.f32 %v6704_v28, 0.0  ;;  %v11927_v18 = vpop.f32.mrb[110].mxu0  ;;  %v6916_v55 = vadd.f32 %v14684_v38, %v6880_v56  ;;  %12583 = vmatpush3.bf16.msra.mxu1 %v12580_v35  ;;  %v14794_v47 = vadd.f32 %v6946_v31, %v14258_v37  ;;  %v15678_v56 = vld [vmem:[#allocation6_spill] sm:$0xff] }
 0x8e0   : > { %15677 = vst [vmem:[#allocation14_spill] sm:$0xff] %v14787_v32  ;;  %v6847_v6 = vmul.f32 %v6815_v52, %v15642_v16  ;;  %v6719_v51 = vadd.f32 %v11927_v18, %v14670_v0  ;;  %v6713_v25 = vpop.f32.mrb[111].mxu0  ;;  %v6949_v39 = vmax.f32 %v6917_v62, 0.0 }
 0x8e1   : > { %v6846_v21 = vmul.f32 %v6814_v59, %v15644_v10  ;;  %v6714_v9 = vadd.f32 %v14670_v0, %v6713_v25  ;;  %v6948_v60 = vmax.f32 %v6916_v55, 0.0  ;;  %11972 = vmatprep.mubr.msk.f32.mxu0 %vm399_vm0, %v14794_v47  ;;  %v12584_v35 = vpack.c.bf16 %v14787_v32, %v14794_v47  ;;  %v15680_v59 = vld [vmem:[#allocation22_spill] sm:$0xff]  ;;  %v15681_v55 = vld [vmem:[#allocation7_spill] sm:$0xff]  ;;  %v7374_v10 = vld [vmem:[%s13071_s16 + $0x50] sm:$0xff] }
 0x8e2   : > { %v6883_v46 = vmul.f32 %v14677_v33, %v6847_v6  ;;  %v6817_v28 = vmax.f32 %v6719_v51, 0.0  ;;  %11973 = vmatmul.mubr.msk.f32.gmra.mrb[40].mxu0 %vm399_vm0, %v14787_v32  ;;  %12031 = vmatmul.mubr.msk.f32.vlgmr.msra.gmra.mrb[228].mxu1 %vm399_vm0, %v7369_v4  ;;  %v14810_v52 = vadd.f32 %v6949_v39, %v15678_v56  ;;  %v7371_v51 = vld [vmem:[%s13071_s16 + $0x38] sm:$0xff]  ;;  %v7372_v4 = vld [vmem:[%s13071_s16 + $0x40] sm:$0xff] }
 0x8e3   : > { %v6882_v37 = vmul.f32 %v14677_v33, %v6846_v21  ;;  %v6816_v31 = vmax.f32 %v6714_v9, 0.0  ;;  %12585 = vmatprep.subr.bf16.mxu1 %v12584_v35  ;;  %v14815_v6 = vadd.f32 %v6948_v60, %v15681_v55  ;;  %12033 = vmatprep.mubr.msk.f32.mxu1 %vm399_vm0, %v7370_v34  ;;  %v15683_v21 = vld [vmem:[#allocation23_spill] sm:$0xff] }
 0x8e4   : > { %15679 = vst [vmem:[#allocation15_spill] sm:$0xff] %v14810_v52  ;;  %v6919_v62 = vadd.f32 %v14684_v38, %v6883_v46  ;;  %v6849_v18 = vmul.f32 %v6817_v28, %v15680_v59  ;;  %12587 = vmatpush3.bf16.msra.mxu1 %v12584_v35 }
 0x8e5   : > { %15682 = vst [vmem:[#allocation24_spill] sm:$0xff] %v14815_v6  ;;  %v6918_v25 = vadd.f32 %v14684_v38, %v6882_v37  ;;  %v6848_v9 = vmul.f32 %v6816_v31, %v15683_v21  ;;  %v11930_v32 = vpop.f32.mrb[112].mxu0  ;;  %11975 = vmatprep.mubr.msk.f32.mxu0 %vm399_vm0, %v14815_v6  ;;  %v12588_v34 = vpack.c.bf16 %v14810_v52, %v14815_v6  ;;  %v15687_v6 = vld [vmem:[#allocation25_spill] sm:$0xff] }
 0x8e6   : > { %v6951_v39 = vmax.f32 %v6919_v62, 0.0  ;;  %v6885_v56 = vmul.f32 %v14677_v33, %v6849_v18  ;;  %v6729_v46 = vadd.f32 %v11930_v32, %v14670_v0  ;;  %v6723_v28 = vpop.f32.mrb[113].mxu0  ;;  %11976 = vmatmul.mubr.msk.f32.gmra.mrb[42].mxu0 %vm399_vm0, %v14810_v52  ;;  %12034 = vmatmul.mubr.msk.f32.gmra.mrb[230].mxu1 %vm399_vm0, %v7371_v51  ;;  %v15684_v62 = vld [vmem:[#allocation8_spill] sm:$0xff] }
 0x8e7   : > { %v6950_v60 = vmax.f32 %v6918_v25, 0.0  ;;  %v6884_v37 = vmul.f32 %v14677_v33, %v6848_v9  ;;  %v6724_v31 = vadd.f32 %v14670_v0, %v6723_v28  ;;  %12589 = vmatprep.subr.bf16.mxu1 %v12588_v34  ;;  %12044 = vmatprep.mubr.msk.f32.mxu1 %vm399_vm0, %v7372_v4  ;;  %v15686_v28 = vld [vmem:[#allocation5_spill] sm:$0xff]  ;;  %v7373_v52 = vld [vmem:[%s13071_s16 + $0x48] sm:$0xff] }
 0x8e8   : > { %v6921_v32 = vadd.f32 %v14684_v38, %v6885_v56  ;;  %v6819_v35 = vmax.f32 %v6729_v46, 0.0  ;;  %v14835_v18 = vadd.f32 %v6951_v39, %v15684_v62  ;;  %12591 = vmatpush3.bf16.msra.mxu1 %v12588_v34  ;;  %v15688_v62 = vld [vmem:[#allocation27_spill] sm:$0xff] }
 0x8e9   : > { %v6920_v55 = vadd.f32 %v14684_v38, %v6884_v37  ;;  %v6818_v25 = vmax.f32 %v6724_v31, 0.0  ;;  %v11933_v9 = vpop.f32.mrb[114].mxu0  ;;  %v14840_v21 = vadd.f32 %v6950_v60, %v15686_v28 }
 0x8ea   : > { %15685 = vst [vmem:[#allocation16_spill] sm:$0xff] %v14835_v18  ;;  %v6953_v51 = vmax.f32 %v6921_v32, 0.0  ;;  %v6851_v59 = vmul.f32 %v6819_v35, %v15687_v6  ;;  %v6739_v56 = vadd.f32 %v11933_v9, %v14670_v0  ;;  %v6733_v46 = vpop.f32.mrb[115].mxu0  ;;  %v15689_v32 = vld [vmem:[#allocation12_spill] sm:$0xff]  ;;  %v15691_v9 = vld [vmem:[#allocation10_spill] sm:$0xff] }
 0x8eb   : > { %v6952_v39 = vmax.f32 %v6920_v55, 0.0  ;;  %v6850_v4 = vmul.f32 %v6818_v25, %v15688_v62  ;;  %v6734_v37 = vadd.f32 %v14670_v0, %v6733_v46  ;;  %11978 = vmatprep.mubr.msk.f32.mxu0 %vm399_vm0, %v14840_v21  ;;  %v12592_v34 = vpack.c.bf16 %v14835_v18, %v14840_v21  ;;  %12045 = vmatmul.mubr.msk.f32.vlgmr.msra.gmra.mrb[232].mxu1 %vm399_vm0, %v7373_v52  ;;  %v7375_v46 = vld [vmem:[%s13071_s16 + $0x58] sm:$0xff]  ;;  %v7376_v52 = vld [vmem:[%s13071_s16 + $0x60] sm:$0xff] }
 0x8ec   : > { %v6887_v60 = vmul.f32 %v14677_v33, %v6851_v59  ;;  %v6821_v31 = vmax.f32 %v6739_v56, 0.0  ;;  %11979 = vmatmul.mubr.msk.f32.gmra.mrb[44].mxu0 %vm399_vm0, %v14835_v18  ;;  %v14857_v35 = vadd.f32 %v6953_v51, %v15689_v32  ;;  %12047 = vmatprep.mubr.msk.f32.mxu1 %vm399_vm0, %v7374_v10  ;;  %v15693_v56 = vld [vmem:[#allocation29_spill] sm:$0xff]  ;;  %v15694_v32 = vld [vmem:[#allocation30_spill] sm:$0xff] }
 0x8ed   : > { %v6886_v55 = vmul.f32 %v14677_v33, %v6850_v4  ;;  %v6820_v25 = vmax.f32 %v6734_v37, 0.0  ;;  %12593 = vmatprep.subr.bf16.mxu1 %v12592_v34  ;;  %v14861_v28 = vadd.f32 %v6952_v39, %v15691_v9  ;;  %v11936_v18 = vpop.f32.mrb[116].mxu0 }
 0x8ee   : > { %15690 = vst [vmem:[#allocation26_spill] sm:$0xff] %v14857_v35  ;;  %v6923_v59 = vadd.f32 %v14684_v38, %v6887_v60  ;;  %v6853_v62 = vmul.f32 %v6821_v31, %v15693_v56  ;;  %12595 = vmatpush3.bf16.msra.mxu1 %v12592_v34  ;;  %v6749_v4 = vadd.f32 %v11936_v18, %v14670_v0  ;;  %v6743_v37 = vpop.f32.mrb[117].mxu0 }
 0x8ef   : > { %15692 = vst [vmem:[#allocation17_spill] sm:$0xff] %v14861_v28  ;;  %v6922_v51 = vadd.f32 %v14684_v38, %v6886_v55  ;;  %v6852_v6 = vmul.f32 %v6820_v25, %v15694_v32  ;;  %11981 = vmatprep.mubr.msk.f32.mxu0 %vm399_vm0, %v14861_v28  ;;  %v12596_v10 = vpack.c.bf16 %v14857_v35, %v14861_v28 }
 0x8f0   : > { %v6955_v39 = vmax.f32 %v6923_v59, 0.0  ;;  %v6889_v60 = vmul.f32 %v14677_v33, %v6853_v62  ;;  %v6744_v34 = vadd.f32 %v14670_v0, %v6743_v37  ;;  %11982 = vmatmul.mubr.msk.f32.gmra.mrb[46].mxu0 %vm399_vm0, %v14857_v35  ;;  %12048 = vmatmul.mubr.msk.f32.gmra.mrb[234].mxu1 %vm399_vm0, %v7375_v46  ;;  %v6823_v55 = vmax.f32 %v6749_v4, 0.0  ;;  %v7377_v37 = vld [vmem:[%s13071_s16 + $0x68] sm:$0xff]  ;;  %v15696_v46 = vld [vmem:[#allocation33_spill] sm:$0xff]  ;;  %v15697_v4 = vld [vmem:[#allocation11_spill] sm:$0xff] }
 0x8f1   : > { %v6954_v31 = vmax.f32 %v6922_v51, 0.0  ;;  %v6888_v18 = vmul.f32 %v14677_v33, %v6852_v6  ;;  %12597 = vmatprep.subr.bf16.mxu1 %v12596_v10  ;;  %12058 = vmatprep.mubr.msk.f32.mxu1 %vm399_vm0, %v7376_v52  ;;  %v11939_v59 = vpop.f32.mrb[118].mxu0  ;;  %v7378_v52 = vld [vmem:[%s13071_s16 + $0x70] sm:$0xff] }
 0x8f2   : > { %v6925_v25 = vadd.f32 %v14684_v38, %v6889_v60  ;;  %v6822_v9 = vmax.f32 %v6744_v34, 0.0  ;;  %12599 = vmatpush3.bf16.msra.mxu1 %v12596_v10  ;;  %v14884_v62 = vadd.f32 %v6955_v39, %v14350_v45  ;;  %v6855_v51 = vmul.f32 %v6823_v55, %v15696_v46  ;;  %v6753_v6 = vpop.f32.mrb[119].mxu0  ;;  %v15699_v34 = vld [vmem:[#allocation34_spill] sm:$0xff] }
 0x8f3   : > { %v6924_v32 = vadd.f32 %v14684_v38, %v6888_v18  ;;  %v6759_v35 = vadd.f32 %v11939_v59, %v14670_v0  ;;  %v14891_v56 = vadd.f32 %v6954_v31, %v15697_v4  ;;  %v6754_v10 = vadd.f32 %v14670_v0, %v6753_v6  ;;  %v15701_v59 = vld [vmem:[#allocation36_spill] sm:$0xff] }
 0x8f4   : > { %15695 = vst [vmem:[#allocation18_spill] sm:$0xff] %v14884_v62  ;;  %v6957_v60 = vmax.f32 %v6925_v25, 0.0  ;;  %v6854_v28 = vmul.f32 %v6822_v9, %v15699_v34  ;;  %v6891_v39 = vmul.f32 %v14677_v33, %v6855_v51 }
 0x8f5   : > { %15698 = vst [vmem:[#allocation28_spill] sm:$0xff] %v14891_v56  ;;  %v6956_v45 = vmax.f32 %v6924_v32, 0.0  ;;  %v6825_v18 = vmax.f32 %v6759_v35, 0.0  ;;  %11984 = vmatprep.mubr.msk.f32.mxu0 %vm399_vm0, %v14891_v56  ;;  %12059 = vmatmul.mubr.msk.f32.vlgmr.msra.gmra.mrb[236].mxu1 %vm399_vm0, %v7377_v37  ;;  %v12600_v31 = vpack.c.bf16 %v14884_v62, %v14891_v56  ;;  %v6824_v25 = vmax.f32 %v6754_v10, 0.0  ;;  %v7379_v35 = vld [vmem:[%s13071_s16 + $0x78] sm:$0xff] }
 0x8f6   : > { %v6890_v55 = vmul.f32 %v14677_v33, %v6854_v28  ;;  %11985 = vmatmul.mubr.msk.f32.gmra.mrb[48].mxu0 %vm399_vm0, %v14884_v62  ;;  %v14906_v32 = vadd.f32 %v6957_v60, %v14373_v27  ;;  %12061 = vmatprep.mubr.msk.f32.mxu1 %vm399_vm0, %v7378_v52  ;;  %v6927_v9 = vadd.f32 %v14684_v38, %v6891_v39  ;;  %v11942_v37 = vpop.f32.mrb[120].mxu0  ;;  %v7380_v28 = vld [vmem:[%s13071_s16 + $0x80] sm:$0xff]  ;;  %v15703_v10 = vld [vmem:[#allocation38_spill] sm:$0xff] }
 0x8f7   : > { %v6857_v51 = vmul.f32 %v6825_v18, %v15701_v59  ;;  %12601 = vmatprep.subr.bf16.mxu1 %v12600_v31  ;;  %v14913_v6 = vadd.f32 %v6956_v45, %v14380_v29  ;;  %v6856_v62 = vmul.f32 %v6824_v25, %v15703_v10  ;;  %v6769_v27 = vadd.f32 %v11942_v37, %v14670_v0  ;;  %v6763_v60 = vpop.f32.mrb[121].mxu0 }
 0x8f8   : > { %15700 = vst [vmem:[#allocation19_spill] sm:$0xff] %v14906_v32  ;;  %v6926_v4 = vadd.f32 %v14684_v38, %v6890_v55  ;;  %12603 = vmatpush3.bf16.msra.mxu1 %v12600_v31  ;;  %v6959_v52 = vmax.f32 %v6927_v9, 0.0  ;;  %v6764_v39 = vadd.f32 %v14670_v0, %v6763_v60 }
 0x8f9   : > { %15702 = vst [vmem:[#allocation32_spill] sm:$0xff] %v14913_v6  ;;  %v6893_v34 = vmul.f32 %v14677_v33, %v6857_v51  ;;  %11987 = vmatprep.mubr.msk.f32.mxu0 %vm399_vm0, %v14913_v6  ;;  %12062 = vmatmul.mubr.msk.f32.gmra.mrb[238].mxu1 %vm399_vm0, %v7379_v35  ;;  %v12604_v29 = vpack.c.bf16 %v14906_v32, %v14913_v6  ;;  %v6827_v55 = vmax.f32 %v6769_v27, 0.0  ;;  %v15704_v51 = vld [vmem:[#allocation9_spill] sm:$0xff] }
 0x8fa   : > { %v6958_v45 = vmax.f32 %v6926_v4, 0.0  ;;  %v6892_v18 = vmul.f32 %v14677_v33, %v6856_v62  ;;  %11988 = vmatmul.mubr.msk.f32.gmra.mrb[50].mxu0 %vm399_vm0, %v14906_v32  ;;  %12072 = vmatprep.mubr.msk.f32.mxu1 %vm399_vm0, %v7380_v28  ;;  %v6826_v25 = vmax.f32 %v6764_v39, 0.0  ;;  %v11945_v9 = vpop.f32.mrb[122].mxu0  ;;  %v14932_v35 = vadd.f32 %v6959_v52, %v15704_v51  ;;  %v15706_v4 = vld [vmem:[#allocation41_spill] sm:$0xff]  ;;  %v7381_v28 = vld [vmem:[%s13071_s16 + $0x88] sm:$0xff]  ;;  %v15708_v39 = vld [vmem:[#allocation42_spill] sm:$0xff] }
 0x8fb   : > { %v6929_v31 = vadd.f32 %v14684_v38, %v6893_v34  ;;  %12605 = vmatprep.subr.bf16.mxu1 %v12604_v29  ;;  %v6859_v60 = vmul.f32 %v6827_v55, %v15706_v4  ;;  %v6779_v62 = vadd.f32 %v11945_v9, %v14670_v0  ;;  %v6773_v27 = vpop.f32.mrb[123].mxu0  ;;  %v15707_v32 = vld [vmem:[#allocation13_spill] sm:$0xff] }
 0x8fc   : > { %15705 = vst [vmem:[#allocation20_spill] sm:$0xff] %v14932_v35  ;;  %v6928_v37 = vadd.f32 %v14684_v38, %v6892_v18  ;;  %12607 = vmatpush3.bf16.msra.mxu1 %v12604_v29  ;;  %v14938_v10 = vadd.f32 %v6958_v45, %v15707_v32  ;;  %v6858_v6 = vmul.f32 %v6826_v25, %v15708_v39  ;;  %v7382_v18 = vld [vmem:[%s13071_s16 + $0x90] sm:$0xff] }
 0x8fd   : > { %v6961_v34 = vmax.f32 %v6929_v31, 0.0  ;;  %v6774_v59 = vadd.f32 %v14670_v0, %v6773_v27  ;;  %v6895_v51 = vmul.f32 %v14677_v33, %v6859_v60  ;;  %v6829_v56 = vmax.f32 %v6779_v62, 0.0  ;;  %v15710_v9 = vld [vmem:[#allocation45_spill] sm:$0xff] }
 0x8fe   : > { %v6960_v52 = vmax.f32 %v6928_v37, 0.0  ;;  %11990 = vmatprep.mubr.msk.f32.mxu0 %vm399_vm0, %v14938_v10  ;;  %v12608_v29 = vpack.c.bf16 %v14932_v35, %v14938_v10  ;;  %v6894_v32 = vmul.f32 %v14677_v33, %v6858_v6  ;;  %v11948_v55 = vpop.f32.mrb[124].mxu0 }
 0x8ff   : > { %v6828_v45 = vmax.f32 %v6774_v59, 0.0  ;;  %11991 = vmatmul.mubr.msk.f32.gmra.mrb[52].mxu0 %vm399_vm0, %v14932_v35  ;;  %12073 = vmatmul.mubr.msk.f32.vlgmr.msra.gmra.mrb[240].mxu1 %vm399_vm0, %v7381_v28  ;;  %v14954_v31 = vadd.f32 %v6961_v34, %v14420_v14  ;;  %v6931_v25 = vadd.f32 %v14684_v38, %v6895_v51  ;;  %v6861_v37 = vmul.f32 %v6829_v56, %v15710_v9  ;;  %v6783_v62 = vpop.f32.mrb[125].mxu0  ;;  %v7383_v59 = vld [vmem:[%s13071_s16 + $0x98] sm:$0xff] }
 0x900   : > { %v6789_v60 = vadd.f32 %v11948_v55, %v14670_v0  ;;  %12609 = vmatprep.subr.bf16.mxu1 %v12608_v29  ;;  %v14960_v6 = vadd.f32 %v6960_v52, %v14428_v19  ;;  %v6930_v27 = vadd.f32 %v14684_v38, %v6894_v32  ;;  %v15711_v35 = vld [vmem:[#allocation46_spill] sm:$0xff]  ;;  %v6784_v14 = vadd.f32 %v14670_v0, %v6783_v62 }
 0x901   : > { %15709 = vst [vmem:[#allocation31_spill] sm:$0xff] %v14954_v31  ;;  %v6860_v28 = vmul.f32 %v6828_v45, %v15711_v35  ;;  %12611 = vmatpush3.bf16.msra.mxu1 %v12608_v29  ;;  %12075 = vmatprep.mubr.msk.f32.mxu1 %vm399_vm0, %v7382_v18  ;;  %v6963_v34 = vmax.f32 %v6931_v25, 0.0  ;;  %v6897_v56 = vmul.f32 %v14677_v33, %v6861_v37  ;;  %v7384_v29 = vld [vmem:[%s13071_s16 + $0xa0] sm:$0xff] }
 0x902   : > { %v6831_v51 = vmax.f32 %v6789_v60, 0.0  ;;  %11993 = vmatprep.mubr.msk.f32.mxu0 %vm399_vm0, %v14960_v6  ;;  %v12612_v19 = vpack.c.bf16 %v14954_v31, %v14960_v6  ;;  %v6962_v52 = vmax.f32 %v6930_v27, 0.0  ;;  %v6830_v55 = vmax.f32 %v6784_v14, 0.0  ;;  %v11951_v45 = vpop.f32.mrb[126].mxu0 }
 0x903   : > { %v6896_v32 = vmul.f32 %v14677_v33, %v6860_v28  ;;  %11994 = vmatmul.mubr.msk.f32.gmra.mrb[54].mxu0 %vm399_vm0, %v14954_v31  ;;  %12076 = vmatmul.mubr.msk.f32.gmra.mrb[242].mxu1 %vm399_vm0, %v7383_v59  ;;  %v6933_v18 = vadd.f32 %v14684_v38, %v6897_v56  ;;  %v6799_v37 = vadd.f32 %v11951_v45, %v14670_v0  ;;  %v6793_v60 = vpop.f32.mrb[127].mxu0  ;;  %v7385_v56 = vld [vmem:[%s13071_s16 + $0xa8] sm:$0xff] }
 0x904   : > { %v6863_v25 = vmul.f32 %v6831_v51, %v15675_v15  ;;  %12613 = vmatprep.subr.bf16.mxu1 %v12612_v19  ;;  %v14981_v62 = vadd.f32 %v6963_v34, %v14454_v41  ;;  %v6862_v28 = vmul.f32 %v6830_v55, %v15676_v53  ;;  %v6794_v14 = vadd.f32 %v14670_v0, %v6793_v60  ;;  %v7386_v15 = vld [vmem:[%s13071_s16 + $0xb0] sm:$0xff] }
 0x905   : > { %v6932_v27 = vadd.f32 %v14684_v38, %v6896_v32  ;;  %12615 = vmatpush3.bf16.msra.mxu1 %v12612_v19  ;;  %v14987_v59 = vadd.f32 %v6962_v52, %v14449_v58  ;;  %v6965_v31 = vmax.f32 %v6933_v18, 0.0  ;;  %v6833_v45 = vmax.f32 %v6799_v37, 0.0  ;;  %12086 = vmatprep.mubr.msk.f32.mxu1 %vm399_vm0, %v7384_v29 }
 0x906   : > { %v6899_v51 = vmul.f32 %v14677_v33, %v6863_v25  ;;  %v6898_v34 = vmul.f32 %v14677_v33, %v6862_v28  ;;  %v6832_v32 = vmax.f32 %v6794_v14, 0.0  ;;  %v7387_v25 = vld [vmem:[%s13071_s16 + $0xb8] sm:$0xff] }
 0x907   : > { %v6964_v41 = vmax.f32 %v6932_v27, 0.0  ;;  %11996 = vmatprep.mubr.msk.f32.mxu0 %vm399_vm0, %v14987_v59  ;;  %v12616_v58 = vpack.c.bf16 %v14981_v62, %v14987_v59  ;;  %v6865_v19 = vmul.f32 %v6833_v45, %v13840_v61  ;;  %v15004_v52 = vadd.f32 %v6965_v31, %v14462_v36  ;;  %v7388_v27 = vld [vmem:[%s13071_s16 + $0xc0] sm:$0xff] }
 0x908   : > { %v6935_v0 = vadd.f32 %v14684_v38, %v6899_v51  ;;  %11997 = vmatmul.mubr.msk.f32.gmra.mrb[56].mxu0 %vm399_vm0, %v14981_v62  ;;  %12087 = vmatmul.mubr.msk.f32.vlgmr.msra.gmra.mrb[244].mxu1 %vm399_vm0, %v7385_v56  ;;  %v6934_v55 = vadd.f32 %v14684_v38, %v6898_v34  ;;  %v6864_v29 = vmul.f32 %v6832_v32, %v13846_v13  ;;  %v7389_v51 = vld [vmem:[%s13071_s16 + $0xc8] sm:$0xff] }
 0x909   : > { %12617 = vmatprep.subr.bf16.mxu1 %v12616_v58  ;;  %v15009_v18 = vadd.f32 %v6964_v41, %v14471_v30  ;;  %12089 = vmatprep.mubr.msk.f32.mxu1 %vm399_vm0, %v7386_v15  ;;  %v6901_v60 = vmul.f32 %v14677_v33, %v6865_v19  ;;  %v7390_v41 = vld [vmem:[%s13071_s16 + $0xd0] sm:$0xff]  ;;  %v10179_v34 = vld [vmem:[%s15471_s3 + $0xe8] sm:$0xff] }
 0x90a   : > { %v6967_v37 = vmax.f32 %v6935_v0, 0.0  ;;  %12619 = vmatpush3.bf16.msra.mxu1 %v12616_v58  ;;  %v6966_v28 = vmax.f32 %v6934_v55, 0.0  ;;  %v6900_v36 = vmul.f32 %v14677_v33, %v6864_v29  ;;  %v7392_v0 = vld [vmem:[%s13071_s16 + $0xe0] sm:$0xff]  ;;  %v10181_v55 = vld [vmem:[%s15471_s3 + $0xf8] sm:$0xff]  ;;  %v7393_v29 = vld [vmem:[%s13071_s16 + $0xe8] sm:$0xff] }
 0x90b   : > { %11999 = vmatprep.mubr.msk.f32.mxu0 %vm399_vm0, %v15009_v18  ;;  %v12620_v30 = vpack.c.bf16 %v15004_v52, %v15009_v18  ;;  %v6937_v31 = vadd.f32 %v14684_v38, %v6901_v60  ;;  %v7395_v60 = vld [vmem:[%s13071_s16 + $0xf8] sm:$0xff] }
 0x90c   : > { %12000 = vmatmul.mubr.msk.f32.gmra.mrb[58].mxu0 %vm399_vm0, %v15004_v52  ;;  %12090 = vmatmul.mubr.msk.f32.gmra.mrb[246].mxu1 %vm399_vm0, %v7387_v25  ;;  %v15025_v15 = vadd.f32 %v6967_v37, %v14485_v48  ;;  %v6936_v14 = vadd.f32 %v14684_v38, %v6900_v36  ;;  %v15029_v33 = vadd.f32 %v6966_v28, %v14492_v42  ;;  %v10178_v38 = vld [vmem:[%s15471_s3 + $0xe0] sm:$0xff]  ;;  %v7394_v25 = vld [vmem:[%s13071_s16 + $0xf0] sm:$0xff]  ;;  %v10216_v28 = vld [vmem:[%s15471_s3 + $0x108] sm:$0xff] }
 0x90d   : > { %12621 = vmatprep.subr.bf16.mxu1 %v12620_v30  ;;  %12100 = vmatprep.mubr.msk.f32.mxu1 %vm399_vm0, %v7388_v27  ;;  %v6969_v56 = vmax.f32 %v6937_v31, 0.0  ;;  %v12632_v19 = vpack.c.bf16 %v10179_v34, %v10178_v38  ;;  %v10215_v27 = vld [vmem:[%s15471_s3 + $0x100] sm:$0xff] }
 0x90e   : > { %12623 = vmatpush3.bf16.msra.mxu1 %v12620_v30  ;;  %v6968_v45 = vmax.f32 %v6936_v14, 0.0  ;;  %12002 = vmatprep.mubr.msk.f32.mxu0 %vm399_vm0, %v15029_v33  ;;  %v12624_v48 = vpack.c.bf16 %v15025_v15, %v15029_v33  ;;  %v12640_v36 = vpack.c.bf16 %v10216_v28, %v10215_v27 }
 0x90f   : > { %v15041_v42 = vadd.f32 %v6969_v56, %v14502_v26  ;;  %v7391_v26 = vld [vmem:[%s13071_s16 + $0xd8] sm:$0xff] }
 0x910   : > { %12003 = vmatmul.mubr.msk.f32.gmra.mrb[60].mxu0 %vm399_vm0, %v15025_v15  ;;  %12625 = vmatprep.subr.bf16.mxu1 %v12624_v48  ;;  %v15051_v32 = vadd.f32 %v6968_v45, %v14507_v1  ;;  %v10180_v1 = vld [vmem:[%s15471_s3 + $0xf0] sm:$0xff] }
 0x911   : > { %12101 = vmatmul.mubr.msk.f32.vlgmr.msra.gmra.mrb[248].mxu1 %vm399_vm0, %v7389_v51  ;;  %v12636_v37 = vpack.c.bf16 %v10181_v55, %v10180_v1  ;;  %12641 = vmatprep.subr.bf16.mxu0 %v12640_v36 }
 0x912   : > { %12627 = vmatpush3.bf16.msra.mxu1 %v12624_v48  ;;  %12103 = vmatprep.mubr.msk.f32.mxu1 %vm399_vm0, %v7390_v41  ;;  %v12628_v58 = vpack.c.bf16 %v15041_v42, %v15051_v32 }
 0x913   : > { %12005 = vmatprep.mubr.msk.f32.mxu0 %vm399_vm0, %v15051_v32  ;;  %12643 = vmatpush3.bf16.msra.mxu0 %v12640_v36 }
 0x914   : > { %12006 = vmatmul.mubr.msk.f32.gmra.mrb[62].mxu0 %vm399_vm0, %v15041_v42  ;;  %12629 = vmatprep.subr.bf16.mxu1 %v12628_v58 }
 0x915   : > { %12104 = vmatmul.mubr.msk.f32.gmra.mrb[250].mxu1 %vm399_vm0, %v7391_v26 }
 0x916   : > { %12631 = vmatpush3.bf16.msra.mxu1 %v12628_v58  ;;  %12114 = vmatprep.mubr.msk.f32.mxu1 %vm399_vm0, %v7392_v0 }
 0x917   : > { %12633 = vmatprep.subr.bf16.mxu1 %v12632_v19 }
 0x919   : > { %12115 = vmatmul.mubr.msk.f32.vlgmr.msra.gmra.mrb[252].mxu1 %vm399_vm0, %v7393_v29 }
 0x91a   : > { %12117 = vmatprep.mubr.msk.f32.mxu1 %vm399_vm0, %v7394_v25  ;;  %12635 = vmatpush3.bf16.msra.mxu1 %v12632_v19 }
 0x91b   : > { %12637 = vmatprep.subr.bf16.mxu1 %v12636_v37 }
 0x91d   : > { %12118 = vmatmul.mubr.msk.f32.gmra.mrb[254].mxu1 %vm399_vm0, %v7395_v60 }
 0x91e   : > { %12639 = vmatpush3.bf16.msra.mxu1 %v12636_v37 }
 0x9ac   : > { %v12018_v30 = vpop.f32.mrb[224].mxu1 }
 0x9ad   : > { %v7474_v31 = vpop.f32.mrb[225].mxu1 }
 0x9ae   : > { %12128 = vmatprep.mubr.msk.f32.mxu1 %vm399_vm0, %v7474_v31 }
 0x9af   : > { %12129 = vmatmul.mubr.msk.f32.vlgmr.msra.gmra.mrb[0].mxu1 %vm399_vm0, %v12018_v30 }
 0x9b0   : > { %v12021_v14 = vpop.f32.mrb[226].mxu1 }
 0x9b1   : > { %v7484_v56 = vpop.f32.mrb[227].mxu1 }
 0x9b2   : > { %12131 = vmatprep.mubr.msk.f32.mxu1 %vm399_vm0, %v7484_v56 }
 0x9b3   : > { %12132 = vmatmul.mubr.msk.f32.gmra.mrb[2].mxu1 %vm399_vm0, %v12021_v14 }
 0x9b5   : > { %v12032_v51 = vpop.f32.mrb[228].mxu1 }
 0x9b6   : > { %v7571_v45 = vpop.f32.mrb[229].mxu1 }
 0x9b7   : > { %12134 = vmatprep.mubr.msk.f32.mxu1 %vm399_vm0, %v7571_v45 }
 0x9b8   : > { %12135 = vmatmul.mubr.msk.f32.gmra.mrb[4].mxu1 %vm399_vm0, %v12032_v51 }
 0x9b9   : > { %v12035_v48 = vpop.f32.mrb[230].mxu1 }
 0x9ba   : > { %v7581_v41 = vpop.f32.mrb[231].mxu1 }
 0x9bb   : > { %12137 = vmatprep.mubr.msk.f32.mxu1 %vm399_vm0, %v7581_v41 }
 0x9bc   : > { %12138 = vmatmul.mubr.msk.f32.gmra.mrb[6].mxu1 %vm399_vm0, %v12035_v48 }
 0x9be   : > { %v12046_v38 = vpop.f32.mrb[232].mxu1 }
 0x9bf   : > { %v7668_v34 = vpop.f32.mrb[233].mxu1 }
 0x9c0   : > { %12140 = vmatprep.mubr.msk.f32.mxu1 %vm399_vm0, %v7668_v34  ;;  %v10217_v34 = vld [vmem:[%s15471_s3 + $0x110] sm:$0xff] }
 0x9c1   : > { %12141 = vmatmul.mubr.msk.f32.gmra.mrb[8].mxu1 %vm399_vm0, %v12046_v38 }
 0x9c3   : > { %v12049_v26 = vpop.f32.mrb[234].mxu1 }
 0x9c4   : > { %v7678_v58 = vpop.f32.mrb[235].mxu1 }
 0x9c5   : > { %12143 = vmatprep.mubr.msk.f32.mxu1 %vm399_vm0, %v7678_v58 }
 0x9c6   : > { %12144 = vmatmul.mubr.msk.f32.gmra.mrb[10].mxu1 %vm399_vm0, %v12049_v26  ;;  %v10218_v26 = vld [vmem:[%s15471_s3 + $0x118] sm:$0xff] }
 0x9c7   : > { %v12644_v58 = vpack.c.bf16 %v10218_v26, %v10217_v34 }
 0x9c8   : > { %v12060_v0 = vpop.f32.mrb[236].mxu1 }
 0x9c9   : > { %v7765_v19 = vpop.f32.mrb[237].mxu1  ;;  %12645 = vmatprep.subr.bf16.mxu0 %v12644_v58 }
 0x9ca   : > { %12146 = vmatprep.mubr.msk.f32.mxu1 %vm399_vm0, %v7765_v19  ;;  %12647 = vmatpush3.bf16.msra.mxu0 %v12644_v58 }
 0x9cb   : > { %12147 = vmatmul.mubr.msk.f32.gmra.mrb[12].mxu1 %vm399_vm0, %v12060_v0  ;;  %v15123_v0 = vld [vmem:[%s15472_s4 + $0xd] ss:$0 sm:$0xff] }
 0x9cc   : > { %v12063_v1 = vpop.f32.mrb[238].mxu1 }
 0x9cd   : > { %v7775_v55 = vpop.f32.mrb[239].mxu1 }
 0x9ce   : > { %12149 = vmatprep.mubr.msk.f32.mxu1 %vm399_vm0, %v7775_v55 }
 0x9cf   : > { %12150 = vmatmul.mubr.msk.f32.gmra.mrb[14].mxu1 %vm399_vm0, %v12063_v1 }
 0x9d2   : > { %v12074_v29 = vpop.f32.mrb[240].mxu1 }
 0x9d3   : > { %v7862_v25 = vpop.f32.mrb[241].mxu1 }
 0x9d4   : > { %12152 = vmatprep.mubr.msk.f32.mxu1 %vm399_vm0, %v7862_v25 }
 0x9d5   : > { %12153 = vmatmul.mubr.msk.f32.gmra.mrb[16].mxu1 %vm399_vm0, %v12074_v29 }
 0x9d6   : > { %v12077_v37 = vpop.f32.mrb[242].mxu1 }
 0x9d7   : > { %v7872_v60 = vpop.f32.mrb[243].mxu1 }
 0x9d8   : > { %12155 = vmatprep.mubr.msk.f32.mxu1 %vm399_vm0, %v7872_v60 }
 0x9d9   : > { %12156 = vmatmul.mubr.msk.f32.gmra.mrb[18].mxu1 %vm399_vm0, %v12077_v37 }
 0x9db   : > { %v12088_v27 = vpop.f32.mrb[244].mxu1 }
 0x9dc   : > { %v7959_v28 = vpop.f32.mrb[245].mxu1 }
 0x9dd   : > { %12158 = vmatprep.mubr.msk.f32.mxu1 %vm399_vm0, %v7959_v28 }
 0x9de   : > { %12159 = vmatmul.mubr.msk.f32.gmra.mrb[20].mxu1 %vm399_vm0, %v12088_v27 }
 0x9df   : > { %v12091_v36 = vpop.f32.mrb[246].mxu1 }
 0x9e0   : > { %v7969_v30 = vpop.f32.mrb[247].mxu1 }
 0x9e1   : > { %12161 = vmatprep.mubr.msk.f32.mxu1 %vm399_vm0, %v7969_v30 }
 0x9e2   : > { %12162 = vmatmul.mubr.msk.f32.gmra.mrb[22].mxu1 %vm399_vm0, %v12091_v36 }
 0x9e4   : > { %v12102_v31 = vpop.f32.mrb[248].mxu1 }
 0x9e5   : > { %v8056_v14 = vpop.f32.mrb[249].mxu1 }
 0x9e6   : > { %12164 = vmatprep.mubr.msk.f32.mxu1 %vm399_vm0, %v8056_v14 }
 0x9e7   : > { %12165 = vmatmul.mubr.msk.f32.gmra.mrb[24].mxu1 %vm399_vm0, %v12102_v31 }
 0x9e8   : > { %v12105_v56 = vpop.f32.mrb[250].mxu1 }
 0x9e9   : > { %v8066_v51 = vpop.f32.mrb[251].mxu1 }
 0x9ea   : > { %12167 = vmatprep.mubr.msk.f32.mxu1 %vm399_vm0, %v8066_v51 }
 0x9eb   : > { %12168 = vmatmul.mubr.msk.f32.gmra.mrb[26].mxu1 %vm399_vm0, %v12105_v56 }
 0x9ec   : > { %v12116_v45 = vpop.f32.mrb[252].mxu1 }
 0x9ed   : > { %v8153_v48 = vpop.f32.mrb[253].mxu1 }
 0x9ee   : > { %12170 = vmatprep.mubr.msk.f32.mxu1 %vm399_vm0, %v8153_v48 }
 0x9ef   : > { %12171 = vmatmul.mubr.msk.f32.gmra.mrb[28].mxu1 %vm399_vm0, %v12116_v45 }
 0x9f0   : > { %v12119_v41 = vpop.f32.mrb[254].mxu1 }
 0x9f1   : > { %v8163_v38 = vpop.f32.mrb[255].mxu1 }
 0x9f2   : > { %12173 = vmatprep.mubr.msk.f32.mxu1 %vm399_vm0, %v8163_v38 }
 0x9f3   : > { %12174 = vmatmul.mubr.msk.f32.gmra.mrb[30].mxu1 %vm399_vm0, %v12119_v41 }
 0xa82   : > { %v12130_v19 = vpop.f32.mrb[0].mxu1 }
 0xa83   : > { %v8349_v1 = vadd.f32 %v12130_v19, %v15123_v0  ;;  %v8343_v55 = vpop.f32.mrb[1].mxu1 }
 0xa84   : > { %v8344_v29 = vadd.f32 %v15123_v0, %v8343_v55 }
 0xa85   : > { %v8503_v60 = vmax.f32 %v8349_v1, 0.0 }
 0xa86   : > { %v8502_v25 = vmax.f32 %v8344_v29, 0.0  ;;  %v12133_v37 = vpop.f32.mrb[2].mxu1 }
 0xa87   : > { %v8359_v27 = vadd.f32 %v12133_v37, %v15123_v0  ;;  %v8353_v28 = vpop.f32.mrb[3].mxu1 }
 0xa88   : > { %v8354_v36 = vadd.f32 %v15123_v0, %v8353_v28  ;;  %12184 = vmatprep.mubr.msk.f32.mxu0 %vm399_vm0, %v8502_v25 }
 0xa89   : > { %12185 = vmatmul.mubr.msk.f32.vlgmr.msra.gmra.mrb[128].mxu0 %vm399_vm0, %v8503_v60  ;;  %v8505_v31 = vmax.f32 %v8359_v27, 0.0 }
 0xa8a   : > { %v8504_v30 = vmax.f32 %v8354_v36, 0.0 }
 0xa8b   : > { %v12136_v14 = vpop.f32.mrb[4].mxu1 }
 0xa8c   : > { %v8369_v56 = vadd.f32 %v12136_v14, %v15123_v0  ;;  %v8363_v51 = vpop.f32.mrb[5].mxu1  ;;  %12187 = vmatprep.mubr.msk.f32.mxu0 %vm399_vm0, %v8504_v30 }
 0xa8d   : > { %v8364_v45 = vadd.f32 %v15123_v0, %v8363_v51  ;;  %12188 = vmatmul.mubr.msk.f32.gmra.mrb[130].mxu0 %vm399_vm0, %v8505_v31 }
 0xa8e   : > { %v8507_v38 = vmax.f32 %v8369_v56, 0.0 }
 0xa8f   : > { %v8506_v48 = vmax.f32 %v8364_v45, 0.0  ;;  %v12139_v41 = vpop.f32.mrb[6].mxu1 }
 0xa90   : > { %v8379_v34 = vadd.f32 %v12139_v41, %v15123_v0  ;;  %v8373_v26 = vpop.f32.mrb[7].mxu1 }
 0xa91   : > { %v8374_v58 = vadd.f32 %v15123_v0, %v8373_v26  ;;  %12190 = vmatprep.mubr.msk.f32.mxu0 %vm399_vm0, %v8506_v48 }
 0xa92   : > { %12191 = vmatmul.mubr.msk.f32.gmra.mrb[132].mxu0 %vm399_vm0, %v8507_v38  ;;  %v8509_v1 = vmax.f32 %v8379_v34, 0.0 }
 0xa93   : > { %v8508_v19 = vmax.f32 %v8374_v58, 0.0 }
 0xa94   : > { %v12142_v55 = vpop.f32.mrb[8].mxu1 }
 0xa95   : > { %v8389_v29 = vadd.f32 %v12142_v55, %v15123_v0  ;;  %v8383_v25 = vpop.f32.mrb[9].mxu1  ;;  %12193 = vmatprep.mubr.msk.f32.mxu0 %vm399_vm0, %v8508_v19 }
 0xa96   : > { %v8384_v37 = vadd.f32 %v15123_v0, %v8383_v25  ;;  %12194 = vmatmul.mubr.msk.f32.gmra.mrb[134].mxu0 %vm399_vm0, %v8509_v1 }
 0xa97   : > { %v8511_v28 = vmax.f32 %v8389_v29, 0.0 }
 0xa98   : > { %v8510_v60 = vmax.f32 %v8384_v37, 0.0 }
 0xa99   : > { %v12145_v27 = vpop.f32.mrb[10].mxu1 }
 0xa9a   : > { %v8399_v36 = vadd.f32 %v12145_v27, %v15123_v0  ;;  %v8393_v30 = vpop.f32.mrb[11].mxu1  ;;  %12196 = vmatprep.mubr.msk.f32.mxu0 %vm399_vm0, %v8510_v60 }
 0xa9b   : > { %v8394_v31 = vadd.f32 %v15123_v0, %v8393_v30  ;;  %12197 = vmatmul.mubr.msk.f32.gmra.mrb[136].mxu0 %vm399_vm0, %v8511_v28 }
 0xa9c   : > { %v8513_v56 = vmax.f32 %v8399_v36, 0.0 }
 0xa9d   : > { %v8512_v14 = vmax.f32 %v8394_v31, 0.0 }
 0xa9e   : > { %v12148_v51 = vpop.f32.mrb[12].mxu1 }
 0xa9f   : > { %v8409_v45 = vadd.f32 %v12148_v51, %v15123_v0  ;;  %v8403_v48 = vpop.f32.mrb[13].mxu1  ;;  %12199 = vmatprep.mubr.msk.f32.mxu0 %vm399_vm0, %v8512_v14 }
 0xaa0   : > { %v8404_v41 = vadd.f32 %v15123_v0, %v8403_v48  ;;  %12200 = vmatmul.mubr.msk.f32.gmra.mrb[138].mxu0 %vm399_vm0, %v8513_v56 }
 0xaa1   : > { %v8515_v26 = vmax.f32 %v8409_v45, 0.0 }
 0xaa2   : > { %v8514_v38 = vmax.f32 %v8404_v41, 0.0  ;;  %v12151_v34 = vpop.f32.mrb[14].mxu1 }
 0xaa3   : > { %v8419_v58 = vadd.f32 %v12151_v34, %v15123_v0  ;;  %v8413_v19 = vpop.f32.mrb[15].mxu1 }
 0xaa4   : > { %v8414_v1 = vadd.f32 %v15123_v0, %v8413_v19  ;;  %12202 = vmatprep.mubr.msk.f32.mxu0 %vm399_vm0, %v8514_v38 }
 0xaa5   : > { %12203 = vmatmul.mubr.msk.f32.gmra.mrb[140].mxu0 %vm399_vm0, %v8515_v26  ;;  %v8517_v29 = vmax.f32 %v8419_v58, 0.0 }
 0xaa6   : > { %v8516_v55 = vmax.f32 %v8414_v1, 0.0 }
 0xaa8   : > { %v12154_v25 = vpop.f32.mrb[16].mxu1  ;;  %12205 = vmatprep.mubr.msk.f32.mxu0 %vm399_vm0, %v8516_v55 }
 0xaa9   : > { %v8429_v37 = vadd.f32 %v12154_v25, %v15123_v0  ;;  %v8423_v60 = vpop.f32.mrb[17].mxu1  ;;  %12206 = vmatmul.mubr.msk.f32.gmra.mrb[142].mxu0 %vm399_vm0, %v8517_v29 }
 0xaaa   : > { %v8424_v27 = vadd.f32 %v15123_v0, %v8423_v60 }
 0xaab   : > { %v8519_v30 = vmax.f32 %v8429_v37, 0.0 }
 0xaac   : > { %v8518_v28 = vmax.f32 %v8424_v27, 0.0  ;;  %v12157_v36 = vpop.f32.mrb[18].mxu1 }
 0xaad   : > { %v8439_v31 = vadd.f32 %v12157_v36, %v15123_v0  ;;  %v8433_v14 = vpop.f32.mrb[19].mxu1 }
 0xaae   : > { %v8434_v56 = vadd.f32 %v15123_v0, %v8433_v14  ;;  %12208 = vmatprep.mubr.msk.f32.mxu0 %vm399_vm0, %v8518_v28 }
 0xaaf   : > { %12209 = vmatmul.mubr.msk.f32.gmra.mrb[144].mxu0 %vm399_vm0, %v8519_v30  ;;  %v8521_v45 = vmax.f32 %v8439_v31, 0.0 }
 0xab0   : > { %v8520_v51 = vmax.f32 %v8434_v56, 0.0 }
 0xab1   : > { %v12160_v48 = vpop.f32.mrb[20].mxu1 }
 0xab2   : > { %v8449_v41 = vadd.f32 %v12160_v48, %v15123_v0  ;;  %v8443_v38 = vpop.f32.mrb[21].mxu1  ;;  %12211 = vmatprep.mubr.msk.f32.mxu0 %vm399_vm0, %v8520_v51 }
 0xab3   : > { %v8444_v34 = vadd.f32 %v15123_v0, %v8443_v38  ;;  %12212 = vmatmul.mubr.msk.f32.gmra.mrb[146].mxu0 %vm399_vm0, %v8521_v45 }
 0xab4   : > { %v8523_v19 = vmax.f32 %v8449_v41, 0.0 }
 0xab5   : > { %v8522_v26 = vmax.f32 %v8444_v34, 0.0  ;;  %v12163_v58 = vpop.f32.mrb[22].mxu1 }
 0xab6   : > { %v8459_v1 = vadd.f32 %v12163_v58, %v15123_v0  ;;  %v8453_v55 = vpop.f32.mrb[23].mxu1 }
 0xab7   : > { %v8454_v29 = vadd.f32 %v15123_v0, %v8453_v55  ;;  %12214 = vmatprep.mubr.msk.f32.mxu0 %vm399_vm0, %v8522_v26 }
 0xab8   : > { %12215 = vmatmul.mubr.msk.f32.gmra.mrb[148].mxu0 %vm399_vm0, %v8523_v19  ;;  %v8525_v37 = vmax.f32 %v8459_v1, 0.0 }
 0xab9   : > { %v8524_v25 = vmax.f32 %v8454_v29, 0.0 }
 0xaba   : > { %v12166_v60 = vpop.f32.mrb[24].mxu1 }
 0xabb   : > { %v8469_v27 = vadd.f32 %v12166_v60, %v15123_v0  ;;  %v8463_v28 = vpop.f32.mrb[25].mxu1  ;;  %12217 = vmatprep.mubr.msk.f32.mxu0 %vm399_vm0, %v8524_v25 }
 0xabc   : > { %v8464_v36 = vadd.f32 %v15123_v0, %v8463_v28  ;;  %12218 = vmatmul.mubr.msk.f32.gmra.mrb[150].mxu0 %vm399_vm0, %v8525_v37  ;;  %v10254_v28 = vld [vmem:[%s15473_s5 + $0x80] sm:$0xff] }
 0xabd   : > { %v8527_v14 = vmax.f32 %v8469_v27, 0.0 }
 0xabe   : > { %v8526_v30 = vmax.f32 %v8464_v36, 0.0  ;;  %v12169_v31 = vpop.f32.mrb[26].mxu1  ;;  %v10255_v36 = vld [vmem:[%s15473_s5 + $0x88] sm:$0xff] }
 0xabf   : > { %v8479_v56 = vadd.f32 %v12169_v31, %v15123_v0  ;;  %v8473_v51 = vpop.f32.mrb[27].mxu1  ;;  %v10257_v31 = vld [vmem:[%s15473_s5 + $0x98] sm:$0xff] }
 0xac0   : > { %v8474_v45 = vadd.f32 %v15123_v0, %v8473_v51  ;;  %12220 = vmatprep.mubr.msk.f32.mxu0 %vm399_vm0, %v8526_v30  ;;  %v12648_v30 = vpack.c.bf16 %v10255_v36, %v10254_v28 }
 0xac1   : > { %12221 = vmatmul.mubr.msk.f32.gmra.mrb[152].mxu0 %vm399_vm0, %v8527_v14  ;;  %v8529_v38 = vmax.f32 %v8479_v56, 0.0  ;;  %v15204_v56 = vld [vmem:[%s15472_s4 + $0xe] ss:$0 sm:$0xff] }
 0xac2   : > { %v8528_v48 = vmax.f32 %v8474_v45, 0.0  ;;  %v12172_v41 = vpop.f32.mrb[28].mxu1  ;;  %12649 = vmatprep.subr.bf16.mxu0 %v12648_v30 }
 0xac3   : > { %v8489_v34 = vadd.f32 %v12172_v41, %v15123_v0  ;;  %v8483_v26 = vpop.f32.mrb[29].mxu1  ;;  %12651 = vmatpush3.bf16.msra.mxu0 %v12648_v30 }
 0xac4   : > { %v8484_v58 = vadd.f32 %v15123_v0, %v8483_v26  ;;  %12223 = vmatprep.mubr.msk.f32.mxu0 %vm399_vm0, %v8528_v48 }
 0xac5   : > { %12224 = vmatmul.mubr.msk.f32.gmra.mrb[154].mxu0 %vm399_vm0, %v8529_v38  ;;  %v8531_v55 = vmax.f32 %v8489_v34, 0.0  ;;  %v15211_v34 = vld [vmem:[%s15472_s4 + $0xf] ss:$0 sm:$0xff] }
 0xac6   : > { %v8530_v19 = vmax.f32 %v8484_v58, 0.0  ;;  %v12175_v1 = vpop.f32.mrb[30].mxu1 }
 0xac7   : > { %v8499_v29 = vadd.f32 %v12175_v1, %v15123_v0  ;;  %v8493_v25 = vpop.f32.mrb[31].mxu1 }
 0xac8   : > { %v8494_v37 = vadd.f32 %v15123_v0, %v8493_v25  ;;  %12226 = vmatprep.mubr.msk.f32.mxu0 %vm399_vm0, %v8530_v19  ;;  %v10256_v0 = vld [vmem:[%s15473_s5 + $0x90] sm:$0xff] }
 0xac9   : > { %12227 = vmatmul.mubr.msk.f32.gmra.mrb[156].mxu0 %vm399_vm0, %v8531_v55  ;;  %v8533_v27 = vmax.f32 %v8499_v29, 0.0  ;;  %v12652_v14 = vpack.c.bf16 %v10257_v31, %v10256_v0  ;;  %v15218_v29 = vld [vmem:[%s15472_s4 + $0x10] ss:$0 sm:$0xff] }
 0xaca   : > { %v8532_v60 = vmax.f32 %v8494_v37, 0.0 }
 0xacb   : > { %12653 = vmatprep.subr.bf16.mxu0 %v12652_v14 }
 0xacc   : > { %12229 = vmatprep.mubr.msk.f32.mxu0 %vm399_vm0, %v8532_v60  ;;  %12655 = vmatpush3.bf16.msra.mxu0 %v12652_v14 }
 0xacd   : > { %12230 = vmatmul.mubr.msk.f32.gmra.mrb[158].mxu0 %vm399_vm0, %v8533_v27 }
 0xb5c   : > { %v12186_v51 = vpop.f32.mrb[128].mxu0 }
 0xb5d   : > { %v8711_v45 = vadd.f32 %v12186_v51, %v15204_v56  ;;  %v8705_v48 = vpop.f32.mrb[129].mxu0 }
 0xb5e   : > { %v8706_v41 = vadd.f32 %v15204_v56, %v8705_v48 }
 0xb5f   : > { %v8865_v38 = vmax.f32 %v8711_v45, 0.0 }
 0xb60   : > { %v8864_v26 = vmax.f32 %v8706_v41, 0.0  ;;  %v12189_v58 = vpop.f32.mrb[130].mxu0 }
 0xb61   : > { %v8897_v19 = vmul.f32 %v8865_v38, %v15627_v20  ;;  %v8721_v1 = vadd.f32 %v12189_v58, %v15204_v56  ;;  %v8715_v55 = vpop.f32.mrb[131].mxu0 }
 0xb62   : > { %v8896_v25 = vmul.f32 %v8864_v26, %v15628_v5  ;;  %v8716_v37 = vadd.f32 %v15204_v56, %v8715_v55 }
 0xb63   : > { %v8933_v60 = vmul.f32 %v15211_v34, %v8897_v19  ;;  %v8867_v27 = vmax.f32 %v8721_v1, 0.0 }
 0xb64   : > { %v8932_v28 = vmul.f32 %v15211_v34, %v8896_v25  ;;  %v8866_v36 = vmax.f32 %v8716_v37, 0.0 }
 0xb65   : > { %v8969_v20 = vadd.f32 %v15218_v29, %v8933_v60  ;;  %v8899_v30 = vmul.f32 %v8867_v27, %v15629_v57  ;;  %v12192_v0 = vpop.f32.mrb[132].mxu0 }
 0xb66   : > { %v8968_v31 = vadd.f32 %v15218_v29, %v8932_v28  ;;  %v8898_v14 = vmul.f32 %v8866_v36, %v15630_v7  ;;  %v8731_v51 = vadd.f32 %v12192_v0, %v15204_v56  ;;  %v8725_v5 = vpop.f32.mrb[133].mxu0 }
 0xb67   : > { %v9001_v45 = vmax.f32 %v8969_v20, 0.0  ;;  %v8935_v48 = vmul.f32 %v15211_v34, %v8899_v30  ;;  %v8726_v41 = vadd.f32 %v15204_v56, %v8725_v5 }
 0xb68   : > { %v9000_v38 = vmax.f32 %v8968_v31, 0.0  ;;  %v8934_v26 = vmul.f32 %v15211_v34, %v8898_v14  ;;  %v8869_v58 = vmax.f32 %v8731_v51, 0.0 }
 0xb69   : > { %v8971_v19 = vadd.f32 %v15218_v29, %v8935_v48  ;;  %v8868_v57 = vmax.f32 %v8726_v41, 0.0  ;;  %v12195_v1 = vpop.f32.mrb[134].mxu0  ;;  %v9033_v27 = vadd.f32 %v9001_v45, %v14699_v24 }
 0xb6a   : > { %v8970_v55 = vadd.f32 %v15218_v29, %v8934_v26  ;;  %v8901_v7 = vmul.f32 %v8869_v58, %v15631_v3  ;;  %v8741_v25 = vadd.f32 %v12195_v1, %v15204_v56  ;;  %v8735_v37 = vpop.f32.mrb[135].mxu0  ;;  %v9032_v60 = vadd.f32 %v9000_v38, %v14706_v49 }
 0xb6b   : > { %v9003_v28 = vmax.f32 %v8971_v19, 0.0  ;;  %v8900_v36 = vmul.f32 %v8868_v57, %v13467_v40  ;;  %v8736_v20 = vadd.f32 %v15204_v56, %v8735_v37 }
 0xb6c   : > { %v9002_v30 = vmax.f32 %v8970_v55, 0.0  ;;  %v8937_v0 = vmul.f32 %v15211_v34, %v8901_v7  ;;  %v8871_v31 = vmax.f32 %v8741_v25, 0.0  ;;  %12240 = vmatprep.mubr.msk.f32.mxu0 %vm399_vm0, %v9032_v60 }
 0xb6d   : > { %v8936_v3 = vmul.f32 %v15211_v34, %v8900_v36  ;;  %v8870_v14 = vmax.f32 %v8736_v20, 0.0  ;;  %12241 = vmatmul.mubr.msk.f32.vlgmr.msra.gmra.mrb[32].mxu0 %vm399_vm0, %v9033_v27  ;;  %v9035_v38 = vadd.f32 %v9003_v28, %v14719_v22 }
 0xb6e   : > { %v8973_v49 = vadd.f32 %v15218_v29, %v8937_v0  ;;  %v8903_v24 = vmul.f32 %v8871_v31, %v15632_v50  ;;  %v12198_v51 = vpop.f32.mrb[136].mxu0  ;;  %v9034_v40 = vadd.f32 %v9002_v30, %v14724_v43 }
 0xb6f   : > { %v8972_v5 = vadd.f32 %v15218_v29, %v8936_v3  ;;  %v8902_v45 = vmul.f32 %v8870_v14, %v15633_v2  ;;  %v8751_v48 = vadd.f32 %v12198_v51, %v15204_v56  ;;  %v8745_v41 = vpop.f32.mrb[137].mxu0 }
 0xb70   : > { %v9005_v26 = vmax.f32 %v8973_v49, 0.0  ;;  %v8939_v58 = vmul.f32 %v15211_v34, %v8903_v24  ;;  %v8746_v19 = vadd.f32 %v15204_v56, %v8745_v41  ;;  %12243 = vmatprep.mubr.msk.f32.mxu0 %vm399_vm0, %v9034_v40 }
 0xb71   : > { %v9004_v50 = vmax.f32 %v8972_v5, 0.0  ;;  %v8938_v57 = vmul.f32 %v15211_v34, %v8902_v45  ;;  %v8873_v43 = vmax.f32 %v8751_v48, 0.0  ;;  %12244 = vmatmul.mubr.msk.f32.gmra.mrb[34].mxu0 %vm399_vm0, %v9035_v38 }
 0xb72   : > { %v8975_v2 = vadd.f32 %v15218_v29, %v8939_v58  ;;  %v8872_v1 = vmax.f32 %v8746_v19, 0.0  ;;  %v9037_v20 = vadd.f32 %v9005_v26, %v14740_v11 }
 0xb73   : > { %v12201_v55 = vpop.f32.mrb[138].mxu0  ;;  %v8974_v7 = vadd.f32 %v15218_v29, %v8938_v57  ;;  %v8905_v22 = vmul.f32 %v8873_v43, %v15635_v12  ;;  %v9036_v60 = vadd.f32 %v9004_v50, %v14746_v17 }
 0xb74   : > { %v8761_v25 = vadd.f32 %v12201_v55, %v15204_v56  ;;  %v8755_v37 = vpop.f32.mrb[139].mxu0  ;;  %v9007_v27 = vmax.f32 %v8975_v2, 0.0  ;;  %v8904_v28 = vmul.f32 %v8872_v1, %v15637_v8  ;;  %v15712_v1 = vld [vmem:[#allocation21_spill] sm:$0xff] }
 0xb75   : > { %v8756_v36 = vadd.f32 %v15204_v56, %v8755_v37  ;;  %v9006_v30 = vmax.f32 %v8974_v7, 0.0  ;;  %v8941_v0 = vmul.f32 %v15211_v34, %v8905_v22  ;;  %12246 = vmatprep.mubr.msk.f32.mxu0 %vm399_vm0, %v9036_v60  ;;  %v15713_v22 = vld [vmem:[#allocation14_spill] sm:$0xff] }
 0xb76   : > { %v8875_v31 = vmax.f32 %v8761_v25, 0.0  ;;  %v8940_v12 = vmul.f32 %v15211_v34, %v8904_v28  ;;  %12247 = vmatmul.mubr.msk.f32.gmra.mrb[36].mxu0 %vm399_vm0, %v9037_v20  ;;  %v9039_v5 = vadd.f32 %v9007_v27, %v14762_v54 }
 0xb77   : > { %v8874_v3 = vmax.f32 %v8756_v36, 0.0  ;;  %v8977_v17 = vadd.f32 %v15218_v29, %v8941_v0  ;;  %v9038_v49 = vadd.f32 %v9006_v30, %v14767_v63  ;;  %v15714_v36 = vld [vmem:[#allocation22_spill] sm:$0xff]  ;;  %v15715_v30 = vld [vmem:[#allocation24_spill] sm:$0xff] }
 0xb78   : > { %v8907_v14 = vmul.f32 %v8875_v31, %v15638_v23  ;;  %v12204_v8 = vpop.f32.mrb[140].mxu0  ;;  %v8976_v11 = vadd.f32 %v15218_v29, %v8940_v12  ;;  %v15716_v12 = vld [vmem:[#allocation23_spill] sm:$0xff] }
 0xb79   : > { %v8906_v24 = vmul.f32 %v8874_v3, %v15640_v44  ;;  %v8771_v51 = vadd.f32 %v12204_v8, %v15204_v56  ;;  %v8765_v40 = vpop.f32.mrb[141].mxu0  ;;  %v9009_v45 = vmax.f32 %v8977_v17, 0.0  ;;  %12249 = vmatprep.mubr.msk.f32.mxu0 %vm399_vm0, %v9038_v49 }
 0xb7a   : > { %v8943_v48 = vmul.f32 %v15211_v34, %v8907_v14  ;;  %v8766_v41 = vadd.f32 %v15204_v56, %v8765_v40  ;;  %v9008_v23 = vmax.f32 %v8976_v11, 0.0  ;;  %12250 = vmatmul.mubr.msk.f32.gmra.mrb[38].mxu0 %vm399_vm0, %v9039_v5  ;;  %v15717_v14 = vld [vmem:[#allocation15_spill] sm:$0xff] }
 0xb7b   : > { %v8942_v38 = vmul.f32 %v15211_v34, %v8906_v24  ;;  %v8877_v63 = vmax.f32 %v8771_v51, 0.0  ;;  %v9041_v25 = vadd.f32 %v9009_v45, %v15713_v22 }
 0xb7c   : > { %v8979_v44 = vadd.f32 %v15218_v29, %v8943_v48  ;;  %v8876_v26 = vmax.f32 %v8766_v41, 0.0  ;;  %v12207_v58 = vpop.f32.mrb[142].mxu0  ;;  %v9040_v43 = vadd.f32 %v9008_v23, %v14794_v47 }
 0xb7d   : > { %v8978_v19 = vadd.f32 %v15218_v29, %v8942_v38  ;;  %v8909_v54 = vmul.f32 %v8877_v63, %v15642_v16  ;;  %v8781_v50 = vadd.f32 %v12207_v58, %v15204_v56  ;;  %v8775_v57 = vpop.f32.mrb[143].mxu0  ;;  %v15718_v58 = vld [vmem:[#allocation25_spill] sm:$0xff] }
 0xb7e   : > { %v9011_v2 = vmax.f32 %v8979_v44, 0.0  ;;  %v8908_v55 = vmul.f32 %v8876_v26, %v15712_v1  ;;  %v8776_v7 = vadd.f32 %v15204_v56, %v8775_v57  ;;  %12252 = vmatprep.mubr.msk.f32.mxu0 %vm399_vm0, %v9040_v43  ;;  %v15719_v57 = vld [vmem:[#allocation16_spill] sm:$0xff]  ;;  %v15720_v1 = vld [vmem:[#allocation27_spill] sm:$0xff] }
 0xb7f   : > { %v9010_v37 = vmax.f32 %v8978_v19, 0.0  ;;  %v8945_v60 = vmul.f32 %v15211_v34, %v8909_v54  ;;  %v8879_v27 = vmax.f32 %v8781_v50, 0.0  ;;  %12253 = vmatmul.mubr.msk.f32.gmra.mrb[40].mxu0 %vm399_vm0, %v9041_v25 }
 0xb80   : > { %v8944_v16 = vmul.f32 %v15211_v34, %v8908_v55  ;;  %v8878_v28 = vmax.f32 %v8776_v7, 0.0  ;;  %v9043_v8 = vadd.f32 %v9011_v2, %v15717_v14 }
 0xb81   : > { %v8981_v47 = vadd.f32 %v15218_v29, %v8945_v60  ;;  %v8911_v20 = vmul.f32 %v8879_v27, %v15714_v36  ;;  %v9042_v0 = vadd.f32 %v9010_v37, %v15715_v30  ;;  %v15721_v60 = vld [vmem:[#allocation17_spill] sm:$0xff] }
 0xb82   : > { %v8980_v31 = vadd.f32 %v15218_v29, %v8944_v16  ;;  %v8910_v3 = vmul.f32 %v8878_v28, %v15716_v12  ;;  %v12210_v17 = vpop.f32.mrb[144].mxu0  ;;  %v15722_v28 = vld [vmem:[#allocation29_spill] sm:$0xff] }
 0xb83   : > { %v9013_v49 = vmax.f32 %v8981_v47, 0.0  ;;  %v8947_v11 = vmul.f32 %v15211_v34, %v8911_v20  ;;  %v8791_v24 = vadd.f32 %v12210_v17, %v15204_v56  ;;  %v8785_v51 = vpop.f32.mrb[145].mxu0  ;;  %12255 = vmatprep.mubr.msk.f32.mxu0 %vm399_vm0, %v9042_v0  ;;  %v15723_v20 = vld [vmem:[#allocation26_spill] sm:$0xff] }
 0xb84   : > { %v9012_v40 = vmax.f32 %v8980_v31, 0.0  ;;  %v8946_v5 = vmul.f32 %v15211_v34, %v8910_v3  ;;  %v8786_v45 = vadd.f32 %v15204_v56, %v8785_v51  ;;  %12256 = vmatmul.mubr.msk.f32.gmra.mrb[42].mxu0 %vm399_vm0, %v9043_v8  ;;  %v15724_v31 = vld [vmem:[#allocation30_spill] sm:$0xff] }
 0xb85   : > { %v8983_v48 = vadd.f32 %v15218_v29, %v8947_v11  ;;  %v8881_v41 = vmax.f32 %v8791_v24, 0.0  ;;  %v9045_v43 = vadd.f32 %v9013_v49, %v15719_v57 }
 0xb86   : > { %v8982_v23 = vadd.f32 %v15218_v29, %v8946_v5  ;;  %v8880_v38 = vmax.f32 %v8786_v45, 0.0  ;;  %v12213_v63 = vpop.f32.mrb[146].mxu0  ;;  %v9044_v44 = vadd.f32 %v9012_v40, %v14840_v21 }
 0xb87   : > { %v9015_v26 = vmax.f32 %v8983_v48, 0.0  ;;  %v8913_v19 = vmul.f32 %v8881_v41, %v15718_v58  ;;  %v8801_v54 = vadd.f32 %v12213_v63, %v15204_v56  ;;  %v8795_v50 = vpop.f32.mrb[147].mxu0  ;;  %v15725_v63 = vld [vmem:[#allocation28_spill] sm:$0xff]  ;;  %v15726_v58 = vld [vmem:[#allocation34_spill] sm:$0xff] }
 0xb88   : > { %v9014_v2 = vmax.f32 %v8982_v23, 0.0  ;;  %v8912_v55 = vmul.f32 %v8880_v38, %v15720_v1  ;;  %v8796_v7 = vadd.f32 %v15204_v56, %v8795_v50  ;;  %12258 = vmatprep.mubr.msk.f32.mxu0 %vm399_vm0, %v9044_v44  ;;  %v15727_v50 = vld [vmem:[#allocation18_spill] sm:$0xff] }
 0xb89   : > { %v8949_v22 = vmul.f32 %v15211_v34, %v8913_v19  ;;  %v8883_v25 = vmax.f32 %v8801_v54, 0.0  ;;  %12259 = vmatmul.mubr.msk.f32.gmra.mrb[44].mxu0 %vm399_vm0, %v9045_v43  ;;  %v9047_v30 = vadd.f32 %v9015_v26, %v15723_v20  ;;  %v15731_v20 = vld [vmem:[#allocation19_spill] sm:$0xff] }
 0xb8a   : > { %v8948_v21 = vmul.f32 %v15211_v34, %v8912_v55  ;;  %v8882_v37 = vmax.f32 %v8796_v7, 0.0  ;;  %v9046_v27 = vadd.f32 %v9014_v2, %v15721_v60 }
 0xb8b   : > { %v8985_v16 = vadd.f32 %v15218_v29, %v8949_v22  ;;  %v8915_v47 = vmul.f32 %v8883_v25, %v15722_v28  ;;  %v12216_v36 = vpop.f32.mrb[148].mxu0  ;;  %v15728_v22 = vld [vmem:[#allocation36_spill] sm:$0xff] }
 0xb8c   : > { %v8984_v0 = vadd.f32 %v15218_v29, %v8948_v21  ;;  %v8914_v12 = vmul.f32 %v8882_v37, %v15724_v31  ;;  %v8811_v3 = vadd.f32 %v12216_v36, %v15204_v56  ;;  %v8805_v17 = vpop.f32.mrb[149].mxu0  ;;  %12261 = vmatprep.mubr.msk.f32.mxu0 %vm399_vm0, %v9046_v27  ;;  %v15729_v37 = vld [vmem:[#allocation32_spill] sm:$0xff] }
 0xb8d   : > { %v9017_v14 = vmax.f32 %v8985_v16, 0.0  ;;  %v8951_v8 = vmul.f32 %v15211_v34, %v8915_v47  ;;  %v8806_v49 = vadd.f32 %v15204_v56, %v8805_v17  ;;  %12262 = vmatmul.mubr.msk.f32.gmra.mrb[46].mxu0 %vm399_vm0, %v9047_v30  ;;  %v15730_v16 = vld [vmem:[#allocation38_spill] sm:$0xff] }
 0xb8e   : > { %v9016_v11 = vmax.f32 %v8984_v0, 0.0  ;;  %v8950_v24 = vmul.f32 %v15211_v34, %v8914_v12  ;;  %v8885_v51 = vmax.f32 %v8811_v3, 0.0 }
 0xb8f   : > { %v8987_v40 = vadd.f32 %v15218_v29, %v8951_v8  ;;  %v8884_v5 = vmax.f32 %v8806_v49, 0.0  ;;  %v12219_v45 = vpop.f32.mrb[150].mxu0  ;;  %v9049_v57 = vadd.f32 %v9017_v14, %v15727_v50 }
 0xb90   : > { %v8986_v48 = vadd.f32 %v15218_v29, %v8950_v24  ;;  %v8917_v41 = vmul.f32 %v8885_v51, %v15696_v46  ;;  %v8821_v23 = vadd.f32 %v12219_v45, %v15204_v56  ;;  %v8815_v38 = vpop.f32.mrb[151].mxu0  ;;  %v9048_v44 = vadd.f32 %v9016_v11, %v15725_v63 }
 0xb91   : > { %v9019_v26 = vmax.f32 %v8987_v40, 0.0  ;;  %v8916_v19 = vmul.f32 %v8884_v5, %v15726_v58  ;;  %v8816_v54 = vadd.f32 %v15204_v56, %v8815_v38  ;;  %v15732_v38 = vld [vmem:[#allocation20_spill] sm:$0xff] }
 0xb92   : > { %v9018_v43 = vmax.f32 %v8986_v48, 0.0  ;;  %v8953_v2 = vmul.f32 %v15211_v34, %v8917_v41  ;;  %v8887_v1 = vmax.f32 %v8821_v23, 0.0  ;;  %12264 = vmatprep.mubr.msk.f32.mxu0 %vm399_vm0, %v9048_v44 }
 0xb93   : > { %v8952_v46 = vmul.f32 %v15211_v34, %v8916_v19  ;;  %v8886_v55 = vmax.f32 %v8816_v54, 0.0  ;;  %12265 = vmatmul.mubr.msk.f32.gmra.mrb[48].mxu0 %vm399_vm0, %v9049_v57  ;;  %v9051_v30 = vadd.f32 %v9019_v26, %v15731_v20 }
 0xb94   : > { %v8989_v7 = vadd.f32 %v15218_v29, %v8953_v2  ;;  %v8919_v25 = vmul.f32 %v8887_v1, %v15728_v22  ;;  %v12222_v21 = vpop.f32.mrb[152].mxu0  ;;  %v9050_v60 = vadd.f32 %v9018_v43, %v15729_v37 }
 0xb95   : > { %v8988_v27 = vadd.f32 %v15218_v29, %v8952_v46  ;;  %v8918_v28 = vmul.f32 %v8886_v55, %v15730_v16  ;;  %v8831_v47 = vadd.f32 %v12222_v21, %v15204_v56  ;;  %v8825_v36 = vpop.f32.mrb[153].mxu0  ;;  %v15733_v55 = vld [vmem:[#allocation31_spill] sm:$0xff] }
 0xb96   : > { %v9021_v0 = vmax.f32 %v8989_v7, 0.0  ;;  %v8955_v31 = vmul.f32 %v15211_v34, %v8919_v25  ;;  %v8826_v12 = vadd.f32 %v15204_v56, %v8825_v36  ;;  %12267 = vmatprep.mubr.msk.f32.mxu0 %vm399_vm0, %v9050_v60 }
 0xb97   : > { %v9020_v3 = vmax.f32 %v8988_v27, 0.0  ;;  %v8954_v17 = vmul.f32 %v15211_v34, %v8918_v28  ;;  %v8889_v14 = vmax.f32 %v8831_v47, 0.0  ;;  %12268 = vmatmul.mubr.msk.f32.gmra.mrb[50].mxu0 %vm399_vm0, %v9051_v30 }
 0xb98   : > { %v8991_v8 = vadd.f32 %v15218_v29, %v8955_v31  ;;  %v8888_v49 = vmax.f32 %v8826_v12, 0.0  ;;  %v12225_v11 = vpop.f32.mrb[154].mxu0  ;;  %v9053_v63 = vadd.f32 %v9021_v0, %v15732_v38 }
 0xb99   : > { %v8990_v24 = vadd.f32 %v15218_v29, %v8954_v17  ;;  %v8921_v51 = vmul.f32 %v8889_v14, %v15706_v4  ;;  %v8841_v40 = vadd.f32 %v12225_v11, %v15204_v56  ;;  %v8835_v5 = vpop.f32.mrb[155].mxu0  ;;  %v9052_v45 = vadd.f32 %v9020_v3, %v14938_v10 }
 0xb9a   : > { %v9023_v48 = vmax.f32 %v8991_v8, 0.0  ;;  %v8920_v41 = vmul.f32 %v8888_v49, %v15708_v39  ;;  %v8836_v23 = vadd.f32 %v15204_v56, %v8835_v5 }
 0xb9b   : > { %v9022_v44 = vmax.f32 %v8990_v24, 0.0  ;;  %v8957_v26 = vmul.f32 %v15211_v34, %v8921_v51  ;;  %v8891_v58 = vmax.f32 %v8841_v40, 0.0  ;;  %12270 = vmatprep.mubr.msk.f32.mxu0 %vm399_vm0, %v9052_v45 }
 0xb9c   : > { %v8956_v4 = vmul.f32 %v15211_v34, %v8920_v41  ;;  %v8890_v19 = vmax.f32 %v8836_v23, 0.0  ;;  %v12228_v54 = vpop.f32.mrb[156].mxu0  ;;  %12271 = vmatmul.mubr.msk.f32.gmra.mrb[52].mxu0 %vm399_vm0, %v9053_v63  ;;  %v9055_v7 = vadd.f32 %v9023_v48, %v15733_v55 }
 0xb9d   : > { %v8993_v10 = vadd.f32 %v15218_v29, %v8957_v26  ;;  %v8923_v39 = vmul.f32 %v8891_v58, %v15710_v9  ;;  %v8851_v50 = vadd.f32 %v12228_v54, %v15204_v56  ;;  %v8845_v57 = vpop.f32.mrb[157].mxu0  ;;  %v9054_v43 = vadd.f32 %v9022_v44, %v14960_v6 }
 0xb9e   : > { %v8992_v2 = vadd.f32 %v15218_v29, %v8956_v4  ;;  %v8922_v1 = vmul.f32 %v8890_v19, %v15711_v35  ;;  %v8846_v46 = vadd.f32 %v15204_v56, %v8845_v57  ;;  %v15734_v35 = vld [vmem:[#allocation48_spill] sm:$0xff] }
 0xb9f   : > { %v9025_v22 = vmax.f32 %v8993_v10, 0.0  ;;  %v8959_v25 = vmul.f32 %v15211_v34, %v8923_v39  ;;  %v8893_v21 = vmax.f32 %v8851_v50, 0.0  ;;  %12273 = vmatprep.mubr.msk.f32.mxu0 %vm399_vm0, %v9054_v43 }
 0xba0   : > { %v9024_v9 = vmax.f32 %v8992_v2, 0.0  ;;  %v8958_v37 = vmul.f32 %v15211_v34, %v8922_v1  ;;  %v8892_v60 = vmax.f32 %v8846_v46, 0.0  ;;  %v12231_v27 = vpop.f32.mrb[158].mxu0  ;;  %12274 = vmatmul.mubr.msk.f32.gmra.mrb[54].mxu0 %vm399_vm0, %v9055_v7 }
 0xba1   : > { %v8995_v6 = vadd.f32 %v15218_v29, %v8959_v25  ;;  %v8925_v16 = vmul.f32 %v8893_v21, %v15734_v35  ;;  %v8861_v28 = vadd.f32 %v12231_v27, %v15204_v56  ;;  %v8855_v47 = vpop.f32.mrb[159].mxu0  ;;  %v9057_v17 = vadd.f32 %v9025_v22, %v14981_v62 }
 0xba2   : > { %v8994_v36 = vadd.f32 %v15218_v29, %v8958_v37  ;;  %v8924_v20 = vmul.f32 %v8892_v60, %v15676_v53  ;;  %v8856_v30 = vadd.f32 %v15204_v56, %v8855_v47  ;;  %v9056_v0 = vadd.f32 %v9024_v9, %v14987_v59 }
 0xba3   : > { %v9027_v31 = vmax.f32 %v8995_v6, 0.0  ;;  %v8961_v12 = vmul.f32 %v15211_v34, %v8925_v16  ;;  %v8895_v3 = vmax.f32 %v8861_v28, 0.0 }
 0xba4   : > { %v9026_v14 = vmax.f32 %v8994_v36, 0.0  ;;  %v8960_v8 = vmul.f32 %v15211_v34, %v8924_v20  ;;  %v8894_v49 = vmax.f32 %v8856_v30, 0.0  ;;  %12276 = vmatprep.mubr.msk.f32.mxu0 %vm399_vm0, %v9056_v0  ;;  %v15411_v30 = vld [vmem:[%s15474_s6] ss:$0 sm:$0xff] }
 0xba5   : > { %v8997_v11 = vadd.f32 %v15218_v29, %v8961_v12  ;;  %v8927_v53 = vmul.f32 %v8895_v3, %v13840_v61  ;;  %12277 = vmatmul.mubr.msk.f32.gmra.mrb[56].mxu0 %vm399_vm0, %v9057_v17  ;;  %v9059_v40 = vadd.f32 %v9027_v31, %v15004_v52 }
 0xba6   : > { %v8996_v59 = vadd.f32 %v15218_v29, %v8960_v8  ;;  %v8926_v56 = vmul.f32 %v8894_v49, %v13846_v13  ;;  %v9058_v24 = vadd.f32 %v9026_v14, %v15009_v18 }
 0xba7   : > { %v9029_v51 = vmax.f32 %v8997_v11, 0.0  ;;  %v8963_v62 = vmul.f32 %v15211_v34, %v8927_v53 }
 0xba8   : > { %v9028_v5 = vmax.f32 %v8996_v59, 0.0  ;;  %v8962_v45 = vmul.f32 %v15211_v34, %v8926_v56  ;;  %12279 = vmatprep.mubr.msk.f32.mxu0 %vm399_vm0, %v9058_v24 }
 0xba9   : > { %v8999_v61 = vadd.f32 %v15218_v29, %v8963_v62  ;;  %12280 = vmatmul.mubr.msk.f32.gmra.mrb[58].mxu0 %vm399_vm0, %v9059_v40  ;;  %v9061_v18 = vadd.f32 %v9029_v51, %v15025_v15 }
 0xbaa   : > { %v8998_v48 = vadd.f32 %v15218_v29, %v8962_v45  ;;  %v9060_v13 = vadd.f32 %v9028_v5, %v15029_v33 }
 0xbab   : > { %v9031_v41 = vmax.f32 %v8999_v61, 0.0 }
 0xbac   : > { %v9030_v23 = vmax.f32 %v8998_v48, 0.0  ;;  %12282 = vmatprep.mubr.msk.f32.mxu0 %vm399_vm0, %v9060_v13 }
 0xbad   : > { %12283 = vmatmul.mubr.msk.f32.gmra.mrb[60].mxu0 %vm399_vm0, %v9061_v18  ;;  %v9063_v34 = vadd.f32 %v9031_v41, %v15041_v42 }
 0xbae   : > { %v9062_v52 = vadd.f32 %v9030_v23, %v15051_v32 }
 0xbb0   : > { %12285 = vmatprep.mubr.msk.f32.mxu0 %vm399_vm0, %v9062_v52 }
 0xbb1   : > { %12286 = vmatmul.mubr.msk.f32.gmra.mrb[62].mxu0 %vm399_vm0, %v9063_v34 }
 0xc40   : > { %v12242_v38 = vpop.f32.mrb[32].mxu0 }
 0xc41   : > { %v9231_v29 = vpop.f32.mrb[33].mxu0 }
 0xc42   : > { %v9422_v63 = vadd.f32 %v12242_v38, %v9231_v29 }
 0xc44   : > { %v12245_v33 = vpop.f32.mrb[34].mxu0 }
 0xc45   : > { %v9241_v44 = vpop.f32.mrb[35].mxu0 }
 0xc46   : > { %v9423_v26 = vadd.f32 %v9422_v63, %v9241_v44 }
 0xc48   : > { %v9424_v15 = vadd.f32 %v12245_v33, %v9423_v26 }
 0xc49   : > { %v12248_v58 = vpop.f32.mrb[36].mxu0 }
 0xc4a   : > { %v9425_v4 = vrot.slane %v9424_v15, 4  ;;  %v9251_v19 = vpop.f32.mrb[37].mxu0 }
 0xc4b   : > { %v9431_v54 = vadd.f32 %v12248_v58, %v9251_v19 }
 0xc4c   : > { %v9426_v10 = vadd.f32 %v9425_v4, %v9424_v15 }
 0xc4d   : > { %v12251_v39 = vpop.f32.mrb[38].mxu0 }
 0xc4e   : > { %v9261_v32 = vpop.f32.mrb[39].mxu0  ;;  %v9427_v42 = vrot.slane %v9426_v10, 2 }
 0xc4f   : > { %v9432_v50 = vadd.f32 %v9431_v54, %v9261_v32 }
 0xc50   : > { %v9428_v55 = vadd.f32 %v9427_v42, %v9426_v10 }
 0xc51   : > { %v9433_v57 = vadd.f32 %v12251_v39, %v9432_v50 }
 0xc52   : > { %v12254_v43 = vpop.f32.mrb[40].mxu0  ;;  %v9429_v37 = vrot.slane %v9428_v55, 1 }
 0xc53   : > { %v9434_v2 = vrot.slane %v9433_v57, 4  ;;  %v9271_v1 = vpop.f32.mrb[41].mxu0 }
 0xc54   : > { %v9440_v46 = vadd.f32 %v12254_v43, %v9271_v1  ;;  %v9430_v47 = vadd.f32 %v9429_v37, %v9428_v55 }
 0xc55   : > { %v9435_v7 = vadd.f32 %v9434_v2, %v9433_v57 }
 0xc56   : > { %v9501_v14 = vadd.f32 %v15411_v30, %v9430_v47 }
 0xc57   : > { %v12257_v22 = vpop.f32.mrb[42].mxu0  ;;  %v9436_v25 = vrot.slane %v9435_v7, 2 }
 0xc58   : > { %v9281_v21 = vpop.f32.mrb[43].mxu0 }
 0xc59   : > { %v9441_v9 = vadd.f32 %v9440_v46, %v9281_v21  ;;  %v9437_v60 = vadd.f32 %v9436_v25, %v9435_v7 }
 0xc5b   : > { %v9442_v27 = vadd.f32 %v12257_v22, %v9441_v9  ;;  %v9438_v6 = vrot.slane %v9437_v60, 1 }
 0xc5c   : > { %v12260_v35 = vpop.f32.mrb[44].mxu0 }
 0xc5d   : > { %v9443_v16 = vrot.slane %v9442_v27, 4  ;;  %v9291_v28 = vpop.f32.mrb[45].mxu0  ;;  %v9439_v36 = vadd.f32 %v9438_v6, %v9437_v60 }
 0xc5e   : > { %v9449_v20 = vadd.f32 %v12260_v35, %v9291_v28 }
 0xc5f   : > { %v9444_v0 = vadd.f32 %v9443_v16, %v9442_v27  ;;  %v9502_v31 = vadd.f32 %v15411_v30, %v9439_v36 }
 0xc60   : > { %v12263_v12 = vpop.f32.mrb[46].mxu0 }
 0xc61   : > { %v9445_v3 = vrot.slane %v9444_v0, 2  ;;  %v9301_v17 = vpop.f32.mrb[47].mxu0  ;;  %v9517_v8 = vrot.slane %v9502_v31, 7 }
 0xc62   : > { %v9450_v49 = vadd.f32 %v9449_v20, %v9301_v17 }
 0xc63   : > { %v9446_v11 = vadd.f32 %v9445_v3, %v9444_v0  ;;  %v9519_v53 = vsel %vm9518_vm1, %v9517_v8, %v9501_v14 }
 0xc64   : > { %v9451_v59 = vadd.f32 %v12263_v12, %v9450_v49 }
 0xc65   : > { %v9447_v56 = vrot.slane %v9446_v11, 1 }
 0xc66   : > { %v9452_v24 = vrot.slane %v9451_v59, 4  ;;  %v12266_v51 = vpop.f32.mrb[48].mxu0 }
 0xc67   : > { %v9448_v62 = vadd.f32 %v9447_v56, %v9446_v11  ;;  %v9311_v40 = vpop.f32.mrb[49].mxu0 }
 0xc68   : > { %v9453_v5 = vadd.f32 %v9452_v24, %v9451_v59  ;;  %v9458_v45 = vadd.f32 %v12266_v51, %v9311_v40 }
 0xc69   : > { %v9503_v61 = vadd.f32 %v15411_v30, %v9448_v62 }
 0xc6a   : > { %v9454_v48 = vrot.slane %v9453_v5, 2  ;;  %v12269_v13 = vpop.f32.mrb[50].mxu0 }
 0xc6b   : > { %v9520_v41 = vrot.slane %v9503_v61, 6  ;;  %v9321_v18 = vpop.f32.mrb[51].mxu0 }
 0xc6c   : > { %v9455_v23 = vadd.f32 %v9454_v48, %v9453_v5  ;;  %v9459_v52 = vadd.f32 %v9458_v45, %v9321_v18 }
 0xc6d   : > { %v9522_v34 = vsel %vm9521_vm2, %v9520_v41, %v9519_v53 }
 0xc6e   : > { %v9456_v38 = vrot.slane %v9455_v23, 1  ;;  %v9460_v29 = vadd.f32 %v12269_v13, %v9459_v52 }
 0xc6f   : > { %v12272_v63 = vpop.f32.mrb[52].mxu0 }
 0xc70   : > { %v9457_v33 = vadd.f32 %v9456_v38, %v9455_v23  ;;  %v9461_v44 = vrot.slane %v9460_v29, 4  ;;  %v9331_v26 = vpop.f32.mrb[53].mxu0 }
 0xc71   : > { %v9467_v15 = vadd.f32 %v12272_v63, %v9331_v26 }
 0xc72   : > { %v9504_v58 = vadd.f32 %v15411_v30, %v9457_v33  ;;  %v9462_v4 = vadd.f32 %v9461_v44, %v9460_v29 }
 0xc73   : > { %v12275_v19 = vpop.f32.mrb[54].mxu0 }
 0xc74   : > { %v9523_v54 = vrot.slane %v9504_v58, 5  ;;  %v9463_v10 = vrot.slane %v9462_v4, 2  ;;  %v9341_v39 = vpop.f32.mrb[55].mxu0 }
 0xc75   : > { %v9468_v32 = vadd.f32 %v9467_v15, %v9341_v39 }
 0xc76   : > { %v9464_v50 = vadd.f32 %v9463_v10, %v9462_v4  ;;  %v9525_v42 = vsel %vm9524_vm3, %v9523_v54, %v9522_v34 }
 0xc77   : > { %v9469_v57 = vadd.f32 %v12275_v19, %v9468_v32 }
 0xc78   : > { %v9465_v43 = vrot.slane %v9464_v50, 1  ;;  %v12278_v2 = vpop.f32.mrb[56].mxu0 }
 0xc79   : > { %v9470_v1 = vrot.slane %v9469_v57, 4  ;;  %v9351_v46 = vpop.f32.mrb[57].mxu0 }
 0xc7a   : > { %v9466_v55 = vadd.f32 %v9465_v43, %v9464_v50  ;;  %v9476_v7 = vadd.f32 %v12278_v2, %v9351_v46 }
 0xc7b   : > { %v9471_v22 = vadd.f32 %v9470_v1, %v9469_v57 }
 0xc7c   : > { %v9505_v25 = vadd.f32 %v15411_v30, %v9466_v55  ;;  %v12281_v21 = vpop.f32.mrb[58].mxu0 }
 0xc7d   : > { %v9472_v9 = vrot.slane %v9471_v22, 2  ;;  %v9361_v37 = vpop.f32.mrb[59].mxu0 }
 0xc7e   : > { %v9526_v60 = vrot.slane %v9505_v25, 4  ;;  %v9477_v27 = vadd.f32 %v9476_v7, %v9361_v37 }
 0xc7f   : > { %v9473_v6 = vadd.f32 %v9472_v9, %v9471_v22 }
 0xc80   : > { %v9478_v35 = vadd.f32 %v12281_v21, %v9477_v27  ;;  %v12284_v16 = vpop.f32.mrb[60].mxu0  ;;  %v9528_v28 = vsel %vm9527_vm4, %v9526_v60, %v9525_v42 }
 0xc81   : > { %v9474_v47 = vrot.slane %v9473_v6, 1  ;;  %v9371_v36 = vpop.f32.mrb[61].mxu0 }
 0xc82   : > { %v9479_v20 = vrot.slane %v9478_v35, 4  ;;  %v9485_v0 = vadd.f32 %v12284_v16, %v9371_v36 }
 0xc83   : > { %v9475_v31 = vadd.f32 %v9474_v47, %v9473_v6 }
 0xc84   : > { %v9480_v12 = vadd.f32 %v9479_v20, %v9478_v35  ;;  %v12287_v3 = vpop.f32.mrb[62].mxu0 }
 0xc85   : > { %v9506_v17 = vadd.f32 %v15411_v30, %v9475_v31  ;;  %v9381_v14 = vpop.f32.mrb[63].mxu0 }
 0xc86   : > { %v9481_v8 = vrot.slane %v9480_v12, 2  ;;  %v9486_v49 = vadd.f32 %v9485_v0, %v9381_v14 }
 0xc87   : > { %v9529_v11 = vrot.slane %v9506_v17, 3 }
 0xc88   : > { %v9482_v53 = vadd.f32 %v9481_v8, %v9480_v12  ;;  %v9487_v59 = vadd.f32 %v12287_v3, %v9486_v49 }
 0xc89   : > { %v9531_v56 = vsel %vm9530_vm5, %v9529_v11, %v9528_v28 }
 0xc8a   : > { %v9483_v24 = vrot.slane %v9482_v53, 1  ;;  %v9488_v51 = vrot.slane %v9487_v59, 4 }
 0xc8c   : > { %v9484_v62 = vadd.f32 %v9483_v24, %v9482_v53  ;;  %v9489_v40 = vadd.f32 %v9488_v51, %v9487_v59 }
 0xc8e   : > { %v9507_v5 = vadd.f32 %v15411_v30, %v9484_v62  ;;  %v9490_v45 = vrot.slane %v9489_v40, 2 }
 0xc90   : > { %v9532_v61 = vrot.slane %v9507_v5, 2  ;;  %v9491_v48 = vadd.f32 %v9490_v45, %v9489_v40 }
 0xc92   : > { %v9492_v13 = vrot.slane %v9491_v48, 1  ;;  %v9534_v41 = vsel %vm9533_vm6, %v9532_v61, %v9531_v56 }
 0xc94   : > { %v9493_v18 = vadd.f32 %v9492_v13, %v9491_v48 }
 0xc96   : > { %v9508_v23 = vadd.f32 %v15411_v30, %v9493_v18 }
 0xc98   : > { %v9535_v52 = vrot.slane %v9508_v23, 1 }
 0xc9a   : > { %v9537_v34 = vsel %vm9536_vm7, %v9535_v52, %v9534_v41 }
 0xc9b   : > { %9539 = vst [vmem:[%s306_s21] sm:$0xff] %v9537_v34 }
 0xc9c   : > { %12839 = shalt.err (!%p12836_p4)
}
 0xc9d   : > { %s12840_s22 = scalar_lea.hbm %s15426_s8, 128  ;;  %s12844_s18 = scalar_lea.hbm %s15475_s7, 256 }
 0xc9e   : > { %p12841_p7 = scmp.ne.s32.totalorder %s15426_s8, %s12840_s22  ;;  %p12845_p10 = scmp.lt.u32.totalorder %s15426_s8, %s15475_s7 }
 0xc9f   : > { %p12846_p11 = scmp.lt.u32.totalorder %s12844_s18, %s12840_s22  ;;  %p12848_p13 = scmp.lt.u32.totalorder %s12840_s22, %s15426_s8 }
 0xca0   : > { %p12842_p8 = pnand %p12841_p7, %p12970_p5 }
 0xca1   : > { %p12847_p12 = por %p12846_p11, %p12845_p10 }
 0xca2   : > { %p12843_p9 = pneg %p12842_p8 }
 0xca3   : > { %p12849_p0 = por %p12848_p13, %p12847_p12 }
 0xca5   : > { %p12850_p1 = pnand %p12849_p0, %p12843_p9 }
 0xca7   : > { %12853 = shalt.err (!%p12850_p1)
}
 0xca8   : > { %12784 = dma.vmem_to_hbm [thread:$0]  (%p12970_p5), %s15428_s23, 128, %s15426_s8, %s9541_s9  }
 0xca9 PF: > { %p12790_p2 = scmp.ge.s32.totalorder %s12888_s27, 2  ;;  %s9566_s29 = sand.u32 1, %s12876_s24  }
 0xcaa   : > { %s9567_s16 = scalar_lea.sflag [#allocation3], %s9566_s29 }
 0xcab   : > { %p12787_p3 = pnand %p12790_p2, %p12974_p6 }
 0xcad   : > { %12871 = dma.done.wait (!%p12787_p3), %s9567_s16, 128  }
 0xcae   : > { %12873 = vsyncadd (!%p12787_p3), %s9567_s16, 4294967168  ;;  %p17_p4 = scmp.ge.s32.totalorder %s12957_s30, 4   ;;  %s15735_s24 = smov %s12880_s25 }
 0xcaf   : > { %s15736_s25 = smov %s12884_s26  ;;  %s15737_s26 = smov %s12968_s10 }
 0xcb0   : > { %s15738_s27 = smov %s12957_s30  ;;  %19 = sbr.rel (!%p17_p4) target bundleno = 3 (0x3), region = 101 }
 0xcb7   :  { %9572 = vsyncpa [#allocation3], 1 }
 0xcb8   :  { %9574 = vsyncpa [#allocation3 + $0x1], 1 }

</bundles_post_ra>
